<compile_context>
chip_gen: v6e
topology: v6e:2x2x1
jax: 0.10.0
libtpu: 0.0.40
codegen_flags: <defaults>
</compile_context>

<pallas_src>
import functools

import jax
import jax.numpy as jnp
from jax.experimental import pallas as pl
from jax.experimental.pallas import tpu as pltpu


def _round_up(x: int, m: int) -> int:
    return ((x + m - 1) // m) * m


def _cdiv(a: int, b: int) -> int:
    return (a + b - 1) // b


def _sage_conv_kernel(a_ref, hs_ref, hd_ref, idg_ref, ws_ref, wn_ref, b_ref,
                      o_ref, acc_ref, *, apply_relu: bool):
    # a_ref  : [tm, tk]           int8  0/1 adjacency mask tile (un-normalized)
    # hs_ref : [tk, f_in_p]       bf16  source-node features (reduction stream)
    # hd_ref : [tm, f_in_p]       bf16  destination-node features (constant over k)
    # idg_ref: [tm, 1]            f32   1/deg per dst row (exact mean normalization)
    # ws_ref : [f_in_p, f_out_p]  bf16  W_self   (constant tile)
    # wn_ref : [f_in_p, f_out_p]  bf16  W_neigh  (constant tile)
    # b_ref  : [1, f_out_p]       f32   bias (constant tile)
    # o_ref  : [tm, f_out_p]      bf16 (hidden) / f32 (last layer) output tile
    # acc_ref: [tm, f_in_p]       f32   neighbor-sum accumulator (VMEM scratch)
    k = pl.program_id(1)

    # Widen the 0/1 int8 mask (exact) and accumulate the neighbor sum in f32.
    a_bf16 = a_ref[...].astype(jnp.float32).astype(jnp.bfloat16)
    partial = jnp.dot(a_bf16, hs_ref[...], preferred_element_type=jnp.float32)

    @pl.when(k == 0)
    def _init():
        acc_ref[...] = partial

    @pl.when(k != 0)
    def _accum():
        acc_ref[...] += partial

    @pl.when(k == pl.num_programs(1) - 1)
    def _finalize():
        # Exact mean: f32 per-row 1/deg applied to the f32 sum.
        h_neigh = (acc_ref[...] * idg_ref[...]).astype(jnp.bfloat16)
        # Fused self + neighbor projection as two MXU matmuls (no concatenate).
        out = jnp.dot(hd_ref[...], ws_ref[...], preferred_element_type=jnp.float32)
        out = out + jnp.dot(h_neigh, wn_ref[...], preferred_element_type=jnp.float32)
        out = out + b_ref[...]
        if apply_relu:
            out = jnp.maximum(out, 0.0)   # ReLU in f32 (v5e-safe)
        o_ref[...] = out.astype(o_ref.dtype)


def _pad_cast(x, rows, cols, dtype):
    """Cast and zero-pad a 2-D array up to (rows, cols); larger dims stay as-is."""
    x = x.astype(dtype)
    pr = max(0, rows - x.shape[0])
    pc = max(0, cols - x.shape[1])
    if pr or pc:
        x = jnp.pad(x, ((0, pr), (0, pc)))
    return x


def sage_conv(adj, h, w_self, w_neigh, bias, *, apply_relu,
              tm_max: int = 512, tk_max: int = 2048):
    """One SAGEConv layer (mean aggregator) as a fused, tiled Pallas kernel.

    adj : [n_dst, n_src] dense 0/1 adjacency (dst <- src), un-normalized.
    h   : [>=n_src, >=f_in] node features (possibly already padded, f32/bf16);
          rows/cols beyond the valid region are ignored (weights are zero-padded).
    Returns a PADDED output (n_dst_p, f_out_p): bf16 for hidden layers, f32 last.
    """
    n_dst, n_src = adj.shape
    f_in, f_out = w_self.shape
    f_in_p = _round_up(f_in, 128)      # lane-dense features
    f_out_p = _round_up(f_out, 128)    # lane-dense output (no masked vst)

    # dst-row tiles: as few as possible, evenly sized, 32-aligned (int8/bf16
    # sublane packing; balanced split across v7x's 2 TensorCores for >=2 tiles).
    n_m = _cdiv(n_dst, tm_max)
    tm = _round_up(_cdiv(n_dst, n_m), 32)
    n_dst_p = n_m * tm
    # src reduction tiles: as large as possible so the reduction usually
    # collapses to a single grid step (per-step pipeline overhead dominates
    # small tiles at these problem sizes).
    n_k = _cdiv(_round_up(n_src, 128), tk_max)
    tk = _round_up(_cdiv(n_src, n_k), 128)
    n_src_p = n_k * tk
    n_h_p = max(n_dst_p, n_src_p)      # one padded H serves both src and dst streams

    # Inputs: int8 0/1 mask (half the HBM bytes of bf16, exact), f32 1/deg,
    # bf16 features/weights, f32 bias.
    a_p = _pad_cast(adj, n_dst_p, n_src_p, jnp.int8)
    deg = jnp.sum(adj.astype(jnp.float32), axis=1, keepdims=True)
    inv_deg = 1.0 / jnp.maximum(deg, 1.0)
    idg_p = _pad_cast(inv_deg, n_dst_p, 1, jnp.float32)
    h_p = _pad_cast(h, n_h_p, f_in_p, jnp.bfloat16)
    ws_p = _pad_cast(w_self, f_in_p, f_out_p, jnp.bfloat16)
    wn_p = _pad_cast(w_neigh, f_in_p, f_out_p, jnp.bfloat16)
    b_p = _pad_cast(bias.reshape(1, -1), 1, f_out_p, jnp.float32)

    out_dtype = jnp.bfloat16 if apply_relu else jnp.float32

    # VMEM budget: double-buffered streams + constants + scratch, with headroom,
    # capped below every generation's physical VMEM (v7x: 64 MiB per TC).
    est = 2 * (tm * tk                       # A int8
               + tk * f_in_p * 2             # H src bf16
               + tm * f_in_p * 2             # H dst bf16
               + tm * 4                      # 1/deg f32
               + 2 * f_in_p * f_out_p * 2    # W_self + W_neigh bf16
               + f_out_p * 4                 # bias f32
               + tm * f_out_p * jnp.dtype(out_dtype).itemsize)
    est += tm * f_in_p * 4                   # accumulator scratch
    vmem_limit = int(min(64 * 2**20, max(16 * 2**20, 2 * est)))

    grid = (n_m, n_k)
    kernel = functools.partial(_sage_conv_kernel, apply_relu=apply_relu)

    out_p = pl.pallas_call(
        kernel,
        out_shape=jax.ShapeDtypeStruct((n_dst_p, f_out_p), out_dtype),
        grid_spec=pltpu.PrefetchScalarGridSpec(
            num_scalar_prefetch=0,
            grid=grid,
            in_specs=[
                pl.BlockSpec((tm, tk), lambda i, k: (i, k)),            # A mask (int8)
                pl.BlockSpec((tk, f_in_p), lambda i, k: (k, 0)),        # H (src stream)
                pl.BlockSpec((tm, f_in_p), lambda i, k: (i, 0)),        # H (dst stream)
                pl.BlockSpec((tm, 1), lambda i, k: (i, 0)),             # 1/deg
                pl.BlockSpec((f_in_p, f_out_p), lambda i, k: (0, 0)),   # W_self (constant)
                pl.BlockSpec((f_in_p, f_out_p), lambda i, k: (0, 0)),   # W_neigh (constant)
                pl.BlockSpec((1, f_out_p), lambda i, k: (0, 0)),        # bias (constant)
            ],
            out_specs=pl.BlockSpec((tm, f_out_p), lambda i, k: (i, 0)),
            scratch_shapes=[pltpu.VMEM((tm, f_in_p), jnp.float32)],
        ),
        compiler_params=pltpu.CompilerParams(
            dimension_semantics=("parallel", "arbitrary"),
            vmem_limit_bytes=vmem_limit),
    )(a_p, h_p, h_p, idg_p, ws_p, wn_p, b_p)

    return out_p


def graphsage_forward(blocks, feas, params):
    """GraphSAGE.forward: h = feas; for each layer h = SAGEConv(block, h);
    activation (ReLU) + dropout (identity, eval mode) on all but the last layer.
    Hidden activations stay padded + bf16 between layers; only the final logits
    are sliced back to (n_dst_last, n_classes) in f32."""
    n_layers = len(params)
    h = feas
    for i, (adj, (w_self, w_neigh, bias)) in enumerate(zip(blocks, params)):
        h = sage_conv(adj, h, w_self, w_neigh, bias,
                      apply_relu=(i != n_layers - 1))
    n_dst_last = blocks[-1].shape[0]
    n_classes = params[-1][0].shape[1]
    return h[:n_dst_last, :n_classes]


def _make_block(key, n_dst, n_src, density=0.05):
    """Dense random 0/1 block adjacency (dst <- src).  The mean normalization
    (1/deg) is done inside sage_conv, matching DGL SAGEConv('mean')."""
    adj = (jax.random.uniform(key, (n_dst, n_src)) < density).astype(jnp.float32)
    # guarantee every dst node has at least one neighbor (dst nodes lead the src
    # set in DGL blocks, so connect to "itself" within the src set).
    eye = jnp.zeros((n_dst, n_src)).at[jnp.arange(n_dst), jnp.arange(n_dst)].set(1.0)
    return jnp.maximum(adj, eye)


def _init_sage_params(key, f_in, f_out):
    k1, k2 = jax.random.split(key)
    w_self = jax.random.normal(k1, (f_in, f_out), jnp.float32) * 0.1
    w_neigh = jax.random.normal(k2, (f_in, f_out), jnp.float32) * 0.1
    bias = jnp.zeros((1, f_out), jnp.float32)
    return w_self, w_neigh, bias


if __name__ == "__main__":
    # 2-layer GraphSAGE, mean aggregator.  Sizes chosen so layer 0 exercises a
    # multi-dst-tile grid (2 balanced 320-row tiles) with a 1-step reduction.
    in_feats, n_hidden, n_classes = 64, 128, 16
    n_src0, n_dst0 = 1200, 600      # block 0: 1200 src nodes -> 600 dst nodes
    n_src1, n_dst1 = n_dst0, 200    # block 1:  600 src nodes -> 200 dst nodes

    key = jax.random.PRNGKey(0)
    k_feat, k_b0, k_b1, k_p0, k_p1 = jax.random.split(key, 5)

    feas = jax.random.normal(k_feat, (n_src0, in_feats), jnp.float32)
    blocks = [_make_block(k_b0, n_dst0, n_src0),
              _make_block(k_b1, n_dst1, n_src1)]
    params = [_init_sage_params(k_p0, in_feats, n_hidden),
              _init_sage_params(k_p1, n_hidden, n_classes)]

    fwd = jax.jit(graphsage_forward)
    out = jax.block_until_ready(fwd(blocks, feas, params))

    # Pure-JAX f32 reference (exact mean aggregator).
    h_ref = feas
    for i, (adj, (ws, wn, b)) in enumerate(zip(blocks, params)):
        deg = jnp.sum(adj, axis=1, keepdims=True)
        a_norm = adj / jnp.maximum(deg, 1.0)
        h_ref = h_ref[: adj.shape[0]] @ ws + (a_norm @ h_ref) @ wn + b
        if i != len(params) - 1:
            h_ref = jnp.maximum(h_ref, 0.0)

    assert out.shape == (n_dst1, n_classes)
    max_err = float(jnp.max(jnp.abs(out - h_ref)))
    # bf16 features/weights + f32 accumulation and EXACT 1/deg mean vs f32 ref
    # -> tolerance tightened from 1e-1 to 5e-2.
    assert max_err < 5e-2, f"mismatch vs JAX reference (max abs err {max_err})"

    print("KERNEL_OK")
</pallas_src>

<mosaic_0001>
module attributes {stable_mosaic.version = 11 : i64} {
  func.func @_sage_conv_kernel(%arg0: i32, %arg1: i32, %arg2: memref<320x1280xi8, #tpu.memory_space<vmem>>, %arg3: memref<1280x128xbf16, #tpu.memory_space<vmem>>, %arg4: memref<320x128xbf16, #tpu.memory_space<vmem>>, %arg5: memref<320x1xf32, #tpu.memory_space<vmem>>, %arg6: memref<128x128xbf16, #tpu.memory_space<vmem>>, %arg7: memref<128x128xbf16, #tpu.memory_space<vmem>>, %arg8: memref<1x128xf32, #tpu.memory_space<vmem>>, %arg9: memref<320x128xbf16, #tpu.memory_space<vmem>>, %arg10: memref<320x128xf32, #tpu.memory_space<vmem>>) attributes {dimension_semantics = [#tpu.dimension_semantics<parallel>, #tpu.dimension_semantics<arbitrary>], iteration_bounds = array<i64: 2, 1>, scalar_prefetch = 0 : i64, scratch_operands = 1 : i64, tpu.core_type = #tpu.core_type<tc>, window_params = [{transform_indices = @transform_0, window_bounds = array<i64: 320, 1280>}, {transform_indices = @transform_1, window_bounds = array<i64: 1280, 128>}, {transform_indices = @transform_2, window_bounds = array<i64: 320, 128>}, {transform_indices = @transform_3, window_bounds = array<i64: 320, 1>}, {pipeline_mode = #tpu.pipeline_mode<synchronous>, transform_indices = @transform_4, window_bounds = array<i64: 128, 128>}, {pipeline_mode = #tpu.pipeline_mode<synchronous>, transform_indices = @transform_5, window_bounds = array<i64: 128, 128>}, {pipeline_mode = #tpu.pipeline_mode<synchronous>, transform_indices = @transform_6, window_bounds = array<i64: 1, 128>}, {transform_indices = @transform_7, window_bounds = array<i64: 320, 128>}]} {
    %c0 = arith.constant 0 : index
    %c0_0 = arith.constant 0 : index
    %0 = vector.load %arg2[%c0, %c0_0] : memref<320x1280xi8, #tpu.memory_space<vmem>>, vector<320x1280xi8>
    %1 = arith.sitofp %0 : vector<320x1280xi8> to vector<320x1280xf32>
    %2 = arith.truncf %1 : vector<320x1280xf32> to vector<320x1280xbf16>
    %c0_1 = arith.constant 0 : index
    %c0_2 = arith.constant 0 : index
    %3 = vector.load %arg3[%c0_1, %c0_2] : memref<1280x128xbf16, #tpu.memory_space<vmem>>, vector<1280x128xbf16>
    %cst = arith.constant dense<0.000000e+00> : vector<320x128xf32>
    %4 = tpu.matmul %2, %3, %cst {dimension_numbers = #tpu.dot_dimension_numbers<[1], [0], [0], [1], [0, 0, 1, 1], [], []>} : vector<320x1280xbf16>, vector<1280x128xbf16>, vector<320x128xf32> -> vector<320x128xf32>
    %c0_i32 = arith.constant 0 : i32
    %5 = arith.cmpi eq, %arg1, %c0_i32 : i32
    %6 = arith.extui %5 : i1 to i32
    %c0_i32_3 = arith.constant 0 : i32
    %7 = arith.cmpi ne, %6, %c0_i32_3 : i32
    scf.if %7 {
      %c0_8 = arith.constant 0 : index
      %c0_9 = arith.constant 0 : index
      %14 = vector.load %arg10[%c0_8, %c0_9] : memref<320x128xf32, #tpu.memory_space<vmem>>, vector<320x128xf32>
      tpu.vector_store %arg10[%c0_8, %c0_9], %4 {strides = array<i32>} : memref<320x128xf32, #tpu.memory_space<vmem>>, vector<320x128xf32>,
    } else {
    }
    %c0_i32_4 = arith.constant 0 : i32
    %8 = arith.cmpi ne, %arg1, %c0_i32_4 : i32
    %9 = arith.extui %8 : i1 to i32
    %c0_i32_5 = arith.constant 0 : i32
    %10 = arith.cmpi ne, %9, %c0_i32_5 : i32
    scf.if %10 {
      %c0_8 = arith.constant 0 : index
      %c0_9 = arith.constant 0 : index
      %14 = vector.load %arg10[%c0_8, %c0_9] : memref<320x128xf32, #tpu.memory_space<vmem>>, vector<320x128xf32>
      %15 = arith.addf %14, %4 : vector<320x128xf32>
      %c0_10 = arith.constant 0 : index
      %c0_11 = arith.constant 0 : index
      %16 = vector.load %arg10[%c0_10, %c0_11] : memref<320x128xf32, #tpu.memory_space<vmem>>, vector<320x128xf32>
      tpu.vector_store %arg10[%c0_10, %c0_11], %15 {strides = array<i32>} : memref<320x128xf32, #tpu.memory_space<vmem>>, vector<320x128xf32>,
    } else {
    }
    %c0_i32_6 = arith.constant 0 : i32
    %11 = arith.cmpi eq, %arg1, %c0_i32_6 : i32
    %12 = arith.extui %11 : i1 to i32
    %c0_i32_7 = arith.constant 0 : i32
    %13 = arith.cmpi ne, %12, %c0_i32_7 : i32
    scf.if %13 {
      %c0_8 = arith.constant 0 : index
      %c0_9 = arith.constant 0 : index
      %14 = vector.load %arg10[%c0_8, %c0_9] : memref<320x128xf32, #tpu.memory_space<vmem>>, vector<320x128xf32>
      %c0_10 = arith.constant 0 : index
      %c0_11 = arith.constant 0 : index
      %15 = vector.load %arg5[%c0_10, %c0_11] : memref<320x1xf32, #tpu.memory_space<vmem>>, vector<320x1xf32>
      %16 = vector.broadcast %15 : vector<320x1xf32> to vector<320x128xf32>
      %17 = arith.mulf %14, %16 : vector<320x128xf32>
      %18 = arith.truncf %17 : vector<320x128xf32> to vector<320x128xbf16>
      %c0_12 = arith.constant 0 : index
      %c0_13 = arith.constant 0 : index
      %19 = vector.load %arg4[%c0_12, %c0_13] : memref<320x128xbf16, #tpu.memory_space<vmem>>, vector<320x128xbf16>
      %c0_14 = arith.constant 0 : index
      %c0_15 = arith.constant 0 : index
      %20 = vector.load %arg6[%c0_14, %c0_15] : memref<128x128xbf16, #tpu.memory_space<vmem>>, vector<128x128xbf16>
      %cst_16 = arith.constant dense<0.000000e+00> : vector<320x128xf32>
      %21 = tpu.matmul %19, %20, %cst_16 {dimension_numbers = #tpu.dot_dimension_numbers<[1], [0], [0], [1], [0, 0, 1, 1], [], []>} : vector<320x128xbf16>, vector<128x128xbf16>, vector<320x128xf32> -> vector<320x128xf32>
      %c0_17 = arith.constant 0 : index
      %c0_18 = arith.constant 0 : index
      %22 = vector.load %arg7[%c0_17, %c0_18] : memref<128x128xbf16, #tpu.memory_space<vmem>>, vector<128x128xbf16>
      %cst_19 = arith.constant dense<0.000000e+00> : vector<320x128xf32>
      %23 = tpu.matmul %18, %22, %cst_19 {dimension_numbers = #tpu.dot_dimension_numbers<[1], [0], [0], [1], [0, 0, 1, 1], [], []>} : vector<320x128xbf16>, vector<128x128xbf16>, vector<320x128xf32> -> vector<320x128xf32>
      %24 = arith.addf %21, %23 : vector<320x128xf32>
      %c0_20 = arith.constant 0 : index
      %c0_21 = arith.constant 0 : index
      %25 = vector.load %arg8[%c0_20, %c0_21] : memref<1x128xf32, #tpu.memory_space<vmem>>, vector<1x128xf32>
      %26 = vector.broadcast %25 : vector<1x128xf32> to vector<320x128xf32>
      %27 = arith.addf %24, %26 : vector<320x128xf32>
      %cst_22 = arith.constant 0.000000e+00 : f32
      %28 = vector.broadcast %cst_22 : f32 to vector<320x128xf32>
      %29 = arith.maximumf %27, %28 : vector<320x128xf32>
      %30 = arith.truncf %29 : vector<320x128xf32> to vector<320x128xbf16>
      %c0_23 = arith.constant 0 : index
      %c0_24 = arith.constant 0 : index
      %31 = vector.load %arg9[%c0_23, %c0_24] : memref<320x128xbf16, #tpu.memory_space<vmem>>, vector<320x128xbf16>
      tpu.vector_store %arg9[%c0_23, %c0_24], %30 {strides = array<i32>} : memref<320x128xbf16, #tpu.memory_space<vmem>>, vector<320x128xbf16>,
    } else {
    }
    return
  }
  func.func @transform_0(%arg0: i32, %arg1: i32) -> (i32, i32) {
    %c0_i32 = arith.constant 0 : i32
    return %arg0, %arg1 : i32, i32
  }
  func.func @transform_1(%arg0: i32, %arg1: i32) -> (i32, i32) {
    %c0_i32 = arith.constant 0 : i32
    %c0_i32_0 = arith.constant 0 : i32
    return %arg1, %c0_i32 : i32, i32
  }
  func.func @transform_2(%arg0: i32, %arg1: i32) -> (i32, i32) {
    %c0_i32 = arith.constant 0 : i32
    %c0_i32_0 = arith.constant 0 : i32
    return %arg0, %c0_i32 : i32, i32
  }
  func.func @transform_3(%arg0: i32, %arg1: i32) -> (i32, i32) {
    %c0_i32 = arith.constant 0 : i32
    %c0_i32_0 = arith.constant 0 : i32
    return %arg0, %c0_i32 : i32, i32
  }
  func.func @transform_4(%arg0: i32, %arg1: i32) -> (i32, i32) {
    %c0_i32 = arith.constant 0 : i32
    %c0_i32_0 = arith.constant 0 : i32
    %c0_i32_1 = arith.constant 0 : i32
    return %c0_i32, %c0_i32_0 : i32, i32
  }
  func.func @transform_5(%arg0: i32, %arg1: i32) -> (i32, i32) {
    %c0_i32 = arith.constant 0 : i32
    %c0_i32_0 = arith.constant 0 : i32
    %c0_i32_1 = arith.constant 0 : i32
    return %c0_i32, %c0_i32_0 : i32, i32
  }
  func.func @transform_6(%arg0: i32, %arg1: i32) -> (i32, i32) {
    %c0_i32 = arith.constant 0 : i32
    %c0_i32_0 = arith.constant 0 : i32
    %c0_i32_1 = arith.constant 0 : i32
    return %c0_i32, %c0_i32_0 : i32, i32
  }
  func.func @transform_7(%arg0: i32, %arg1: i32) -> (i32, i32) {
    %c0_i32 = arith.constant 0 : i32
    %c0_i32_0 = arith.constant 0 : i32
    return %arg0, %c0_i32 : i32, i32
  }
}

module attributes {stable_mosaic.version = 11 : i64} {
  func.func @_sage_conv_kernel(%arg0: i32, %arg1: i32, %arg2: memref<224x640xi8, #tpu.memory_space<vmem>>, %arg3: memref<640x128xbf16, #tpu.memory_space<vmem>>, %arg4: memref<224x128xbf16, #tpu.memory_space<vmem>>, %arg5: memref<224x1xf32, #tpu.memory_space<vmem>>, %arg6: memref<128x128xbf16, #tpu.memory_space<vmem>>, %arg7: memref<128x128xbf16, #tpu.memory_space<vmem>>, %arg8: memref<1x128xf32, #tpu.memory_space<vmem>>, %arg9: memref<224x128xf32, #tpu.memory_space<vmem>>, %arg10: memref<224x128xf32, #tpu.memory_space<vmem>>) attributes {dimension_semantics = [#tpu.dimension_semantics<parallel>, #tpu.dimension_semantics<arbitrary>], iteration_bounds = array<i64: 1, 1>, scalar_prefetch = 0 : i64, scratch_operands = 1 : i64, tpu.core_type = #tpu.core_type<tc>, window_params = [{transform_indices = @transform_0, window_bounds = array<i64: 224, 640>}, {transform_indices = @transform_1, window_bounds = array<i64: 640, 128>}, {transform_indices = @transform_2, window_bounds = array<i64: 224, 128>}, {transform_indices = @transform_3, window_bounds = array<i64: 224, 1>}, {pipeline_mode = #tpu.pipeline_mode<synchronous>, transform_indices = @transform_4, window_bounds = array<i64: 128, 128>}, {pipeline_mode = #tpu.pipeline_mode<synchronous>, transform_indices = @transform_5, window_bounds = array<i64: 128, 128>}, {pipeline_mode = #tpu.pipeline_mode<synchronous>, transform_indices = @transform_6, window_bounds = array<i64: 1, 128>}, {transform_indices = @transform_7, window_bounds = array<i64: 224, 128>}]} {
    %c0 = arith.constant 0 : index
    %c0_0 = arith.constant 0 : index
    %0 = vector.load %arg2[%c0, %c0_0] : memref<224x640xi8, #tpu.memory_space<vmem>>, vector<224x640xi8>
    %1 = arith.sitofp %0 : vector<224x640xi8> to vector<224x640xf32>
    %2 = arith.truncf %1 : vector<224x640xf32> to vector<224x640xbf16>
    %c0_1 = arith.constant 0 : index
    %c0_2 = arith.constant 0 : index
    %3 = vector.load %arg3[%c0_1, %c0_2] : memref<640x128xbf16, #tpu.memory_space<vmem>>, vector<640x128xbf16>
    %cst = arith.constant dense<0.000000e+00> : vector<224x128xf32>
    %4 = tpu.matmul %2, %3, %cst {dimension_numbers = #tpu.dot_dimension_numbers<[1], [0], [0], [1], [0, 0, 1, 1], [], []>} : vector<224x640xbf16>, vector<640x128xbf16>, vector<224x128xf32> -> vector<224x128xf32>
    %c0_i32 = arith.constant 0 : i32
    %5 = arith.cmpi eq, %arg1, %c0_i32 : i32
    %6 = arith.extui %5 : i1 to i32
    %c0_i32_3 = arith.constant 0 : i32
    %7 = arith.cmpi ne, %6, %c0_i32_3 : i32
    scf.if %7 {
      %c0_8 = arith.constant 0 : index
      %c0_9 = arith.constant 0 : index
      %14 = vector.load %arg10[%c0_8, %c0_9] : memref<224x128xf32, #tpu.memory_space<vmem>>, vector<224x128xf32>
      tpu.vector_store %arg10[%c0_8, %c0_9], %4 {strides = array<i32>} : memref<224x128xf32, #tpu.memory_space<vmem>>, vector<224x128xf32>,
    } else {
    }
    %c0_i32_4 = arith.constant 0 : i32
    %8 = arith.cmpi ne, %arg1, %c0_i32_4 : i32
    %9 = arith.extui %8 : i1 to i32
    %c0_i32_5 = arith.constant 0 : i32
    %10 = arith.cmpi ne, %9, %c0_i32_5 : i32
    scf.if %10 {
      %c0_8 = arith.constant 0 : index
      %c0_9 = arith.constant 0 : index
      %14 = vector.load %arg10[%c0_8, %c0_9] : memref<224x128xf32, #tpu.memory_space<vmem>>, vector<224x128xf32>
      %15 = arith.addf %14, %4 : vector<224x128xf32>
      %c0_10 = arith.constant 0 : index
      %c0_11 = arith.constant 0 : index
      %16 = vector.load %arg10[%c0_10, %c0_11] : memref<224x128xf32, #tpu.memory_space<vmem>>, vector<224x128xf32>
      tpu.vector_store %arg10[%c0_10, %c0_11], %15 {strides = array<i32>} : memref<224x128xf32, #tpu.memory_space<vmem>>, vector<224x128xf32>,
    } else {
    }
    %c0_i32_6 = arith.constant 0 : i32
    %11 = arith.cmpi eq, %arg1, %c0_i32_6 : i32
    %12 = arith.extui %11 : i1 to i32
    %c0_i32_7 = arith.constant 0 : i32
    %13 = arith.cmpi ne, %12, %c0_i32_7 : i32
    scf.if %13 {
      %c0_8 = arith.constant 0 : index
      %c0_9 = arith.constant 0 : index
      %14 = vector.load %arg10[%c0_8, %c0_9] : memref<224x128xf32, #tpu.memory_space<vmem>>, vector<224x128xf32>
      %c0_10 = arith.constant 0 : index
      %c0_11 = arith.constant 0 : index
      %15 = vector.load %arg5[%c0_10, %c0_11] : memref<224x1xf32, #tpu.memory_space<vmem>>, vector<224x1xf32>
      %16 = vector.broadcast %15 : vector<224x1xf32> to vector<224x128xf32>
      %17 = arith.mulf %14, %16 : vector<224x128xf32>
      %18 = arith.truncf %17 : vector<224x128xf32> to vector<224x128xbf16>
      %c0_12 = arith.constant 0 : index
      %c0_13 = arith.constant 0 : index
      %19 = vector.load %arg4[%c0_12, %c0_13] : memref<224x128xbf16, #tpu.memory_space<vmem>>, vector<224x128xbf16>
      %c0_14 = arith.constant 0 : index
      %c0_15 = arith.constant 0 : index
      %20 = vector.load %arg6[%c0_14, %c0_15] : memref<128x128xbf16, #tpu.memory_space<vmem>>, vector<128x128xbf16>
      %cst_16 = arith.constant dense<0.000000e+00> : vector<224x128xf32>
      %21 = tpu.matmul %19, %20, %cst_16 {dimension_numbers = #tpu.dot_dimension_numbers<[1], [0], [0], [1], [0, 0, 1, 1], [], []>} : vector<224x128xbf16>, vector<128x128xbf16>, vector<224x128xf32> -> vector<224x128xf32>
      %c0_17 = arith.constant 0 : index
      %c0_18 = arith.constant 0 : index
      %22 = vector.load %arg7[%c0_17, %c0_18] : memref<128x128xbf16, #tpu.memory_space<vmem>>, vector<128x128xbf16>
      %cst_19 = arith.constant dense<0.000000e+00> : vector<224x128xf32>
      %23 = tpu.matmul %18, %22, %cst_19 {dimension_numbers = #tpu.dot_dimension_numbers<[1], [0], [0], [1], [0, 0, 1, 1], [], []>} : vector<224x128xbf16>, vector<128x128xbf16>, vector<224x128xf32> -> vector<224x128xf32>
      %24 = arith.addf %21, %23 : vector<224x128xf32>
      %c0_20 = arith.constant 0 : index
      %c0_21 = arith.constant 0 : index
      %25 = vector.load %arg8[%c0_20, %c0_21] : memref<1x128xf32, #tpu.memory_space<vmem>>, vector<1x128xf32>
      %26 = vector.broadcast %25 : vector<1x128xf32> to vector<224x128xf32>
      %27 = arith.addf %24, %26 : vector<224x128xf32>
      %c0_22 = arith.constant 0 : index
      %c0_23 = arith.constant 0 : index
      %28 = vector.load %arg9[%c0_22, %c0_23] : memref<224x128xf32, #tpu.memory_space<vmem>>, vector<224x128xf32>
      tpu.vector_store %arg9[%c0_22, %c0_23], %27 {strides = array<i32>} : memref<224x128xf32, #tpu.memory_space<vmem>>, vector<224x128xf32>,
    } else {
    }
    return
  }
  func.func @transform_0(%arg0: i32, %arg1: i32) -> (i32, i32) {
    %c0_i32 = arith.constant 0 : i32
    return %arg0, %arg1 : i32, i32
  }
  func.func @transform_1(%arg0: i32, %arg1: i32) -> (i32, i32) {
    %c0_i32 = arith.constant 0 : i32
    %c0_i32_0 = arith.constant 0 : i32
    return %arg1, %c0_i32 : i32, i32
  }
  func.func @transform_2(%arg0: i32, %arg1: i32) -> (i32, i32) {
    %c0_i32 = arith.constant 0 : i32
    %c0_i32_0 = arith.constant 0 : i32
    return %arg0, %c0_i32 : i32, i32
  }
  func.func @transform_3(%arg0: i32, %arg1: i32) -> (i32, i32) {
    %c0_i32 = arith.constant 0 : i32
    %c0_i32_0 = arith.constant 0 : i32
    return %arg0, %c0_i32 : i32, i32
  }
  func.func @transform_4(%arg0: i32, %arg1: i32) -> (i32, i32) {
    %c0_i32 = arith.constant 0 : i32
    %c0_i32_0 = arith.constant 0 : i32
    %c0_i32_1 = arith.constant 0 : i32
    return %c0_i32, %c0_i32_0 : i32, i32
  }
  func.func @transform_5(%arg0: i32, %arg1: i32) -> (i32, i32) {
    %c0_i32 = arith.constant 0 : i32
    %c0_i32_0 = arith.constant 0 : i32
    %c0_i32_1 = arith.constant 0 : i32
    return %c0_i32, %c0_i32_0 : i32, i32
  }
  func.func @transform_6(%arg0: i32, %arg1: i32) -> (i32, i32) {
    %c0_i32 = arith.constant 0 : i32
    %c0_i32_0 = arith.constant 0 : i32
    %c0_i32_1 = arith.constant 0 : i32
    return %c0_i32, %c0_i32_0 : i32, i32
  }
  func.func @transform_7(%arg0: i32, %arg1: i32) -> (i32, i32) {
    %c0_i32 = arith.constant 0 : i32
    %c0_i32_0 = arith.constant 0 : i32
    return %arg0, %c0_i32 : i32, i32
  }
}

</mosaic_0001>

<bundles_post_ra>
// kernel: graphsage_forward.2
= control target key start
LH: loop header
LB: loop body
LE: loop exit
PB: predicated region body
PF: predicated region fallthrough
CT: control target
= control target key end

     0   :  { %s4572_s24 = smov 0   ;;  %s4574_s25 = smov 0   ;;  %s5579_s0 = inlined_call_operand.vmem [shape: s8[640,1280], index: 0, kind: input, shape index: {}]   ;;  %s5580_s1 = inlined_call_operand.vmem [shape: bf16[1280,128], index: 1, kind: input, shape index: {}, may-alias: {1,2}]   ;;  %s5581_s2 = inlined_call_operand.vmem [shape: bf16[1280,128], index: 2, kind: input, shape index: {}, may-alias: {1,2}]   ;;  %s5582_s3 = inlined_call_operand.vmem [shape: f32[640,1], index: 3, kind: input, shape index: {}]   ;;  %s5583_s4 = inlined_call_operand.vmem [shape: bf16[128,128], index: 4, kind: input, shape index: {}]   ;;  %s5584_s5 = inlined_call_operand.vmem [shape: bf16[128,128], index: 5, kind: input, shape index: {}]   ;;  %s5585_s6 = inlined_call_operand.vmem [shape: f32[1,128], index: 6, kind: input, shape index: {}]   ;;  %s5586_s7 = inlined_call_operand.vmem [shape: bf16[640,128], index: 7, kind: output, shape index: {}]  }
   0x1   :  { %s4576_s26 = smov 0  }
   0x2 LB: > { %s29_s27 = sadd.s32 1, %s4525_s25  ;;  %p3872_p0 = scmp.ge.s32.totalorder %s4529_s26, 1  ;;  %s4529_s26 = sphi %s4576_s26, %s17_s26   ;;  %s4525_s25 = sphi %s4574_s25, %s5588_s25   ;;  %s4521_s24 = sphi %s4572_s24, %s5587_s24  }
   0x3   : > { %p31_p1 = scmp.ge.s32.totalorder %s29_s27, 2  ;;  %p291_p2 = scmp.lt.s32.totalorder %s4529_s26, 3 }
   0x5   : > { %s5590_s27 = smov (%p31_p1, %s29_s27), 0  ;;  %p292_p3 = pnand %p3872_p0, %p291_p2 }
   0x6   : > { %s343_s21 = smul.u32 (!%p292_p3), 10, %s4521_s24 }
   0x7   : > { %295 = sbr.rel (%p292_p3) target bundleno = 1040 (0x410), region = 48 }
   0x8   : > { %p345_p4 = scmp.lt.s32.totalorder (!%p292_p3), %s343_s21, 19  ;;  %s5029_s29 = smul.u32 (!%p292_p3), 40, %s4521_s24 }
   0xa   : > { %p368_p5 = scmp.lt.s32.totalorder (!%p292_p3), %s5029_s29, 79  ;;  %p362_p6 = scmp.lt.s32.totalorder (!%p292_p3), %s5029_s29, 159 }
   0xc   : > { %v4391_v0 = vld [vmem:[%s5580_s1 + $0x38] sm:$0xff]   ;;  %v4531_v1 = vmov 0   ;;  %v4393_v3 = vld [vmem:[%s5580_s1 + $0x30] sm:$0xff]   ;;  %v4395_v5 = vld [vmem:[%s5580_s1 + $0x28] sm:$0xff]   ;;  %s5592_s21 = smov (!%p345_p4, %s343_s21), 19 }
   0xd   : > { %1320 = vmatprep.subr.bf16.mxu0 %v4531_v1  ;;  %1513 = vmatprep.subr.bf16.mxu1 %v4531_v1  ;;  %v4392_v2 = vld [vmem:[%s5580_s1 + $0xb8] sm:$0xff]   ;;  %v4394_v4 = vld [vmem:[%s5580_s1 + $0xb0] sm:$0xff]   ;;  %v4396_v6 = vld [vmem:[%s5580_s1 + $0xa8] sm:$0xff]   ;;  %s4363_s15 = smul.u32 80, %s5592_s21 }
   0xe   : > { %1321 = vmatpush1.bf16.msra.mxu0 %v4391_v0  ;;  %4389 = vset.pattern.permute.xlu0 %v4531_v1  ;;  %v4397_v7 = vld [vmem:[%s5580_s1 + $0x20] sm:$0xff]   ;;  %v4399_v9 = vld [vmem:[%s5580_s1 + $0x18] sm:$0xff]   ;;  %v4401_v11 = vld [vmem:[%s5580_s1 + $0x10] sm:$0xff]   ;;  %s5037_s30 = scalar_select %p368_p5, %s5029_s29, 79 }
   0xf   : > { %1514 = vmatpush1.bf16.msra.mxu1 %v4392_v2  ;;  %1322 = vmatprep.subr.bf16.mxu0 %v4531_v1  ;;  %v4398_v8 = vld [vmem:[%s5580_s1 + $0xa0] sm:$0xff]   ;;  %v4400_v10 = vld [vmem:[%s5580_s1 + $0x98] sm:$0xff]   ;;  %v4402_v12 = vld [vmem:[%s5580_s1 + $0x90] sm:$0xff]   ;;  %s4662_s23 = scalar_lea.vmem %s5579_s0, %s4363_s15  ;;  %s5594_s29 = smov (!%p362_p6, %s5029_s29), 159 }
  0x10   : > { %1515 = vmatprep.subr.bf16.mxu1 %v4531_v1  ;;  %4390 = vset.pattern.permute.xlu1 %v4531_v1  ;;  %v4403_v13 = vld [vmem:[%s5580_s1 + $0x8] sm:$0xff]   ;;  %v4405_v15 = vld [vmem:[%s5580_s1] sm:$0xff]   ;;  %v4407_v17 = vld [vmem:[%s5580_s1 + $0x78] sm:$0xff]   ;;  %s3875_s24 = sshll.u32 %s5037_s30, 3  ;;  %s3874_s28 = sshll.u32 %s5594_s29, 2 }
  0x11   : > { %v4404_v14 = vld [vmem:[%s5580_s1 + $0x88] sm:$0xff]   ;;  %v4406_v16 = vld [vmem:[%s5580_s1 + $0x80] sm:$0xff]   ;;  %v4408_v18 = vld [vmem:[%s5580_s1 + $0xf8] sm:$0xff]   ;;  %s5045_s10 = scalar_lea.vmem %s5582_s3, %s3875_s24  ;;  %s5345_s9 = scalar_lea.vmem %s5581_s2, %s3874_s28 }
  0x12   : > { %1323 = vmatpush1.bf16.msra.mxu0 %v4393_v3  ;;  %v4673_v19 = vld [vmem:[%s4662_s23 + $0x8] sm:$0xff]  ;;  %v4676_v20 = vld [vmem:[%s4662_s23 + $0x18] sm:$0xff]  ;;  %v4409_v23 = vld [vmem:[%s5580_s1 + $0x70] sm:$0xff]   ;;  %s3876_s12 = sshll.u32 %s5037_s30, 2 }
  0x13   : > { %1516 = vmatpush1.bf16.msra.mxu1 %v4394_v4  ;;  %1324 = vmatprep.subr.bf16.mxu0 %v4531_v1  ;;  %v481_v21 = vunpack.c.l.s8.bf16 %v4673_v19  ;;  %v483_v22 = vunpack.c.l.s8.bf16 %v4676_v20  ;;  %v4410_v24 = vld [vmem:[%s5580_s1 + $0xf0] sm:$0xff]   ;;  %v4411_v25 = vld [vmem:[%s5580_s1 + $0x68] sm:$0xff]   ;;  %v4413_v27 = vld [vmem:[%s5580_s1 + $0x60] sm:$0xff]   ;;  %v491_v42 = vunpack.c.h.s8.bf16 %v4673_v19  ;;  %v493_v43 = vunpack.c.h.s8.bf16 %v4676_v20  ;;  %s5479_s15 = scalar_lea.vmem %s5586_s7, %s3876_s12 }
  0x14   : > { %1517 = vmatprep.subr.bf16.mxu1 %v4531_v1  ;;  %v4412_v26 = vld [vmem:[%s5580_s1 + $0xe8] sm:$0xff]   ;;  %v4414_v28 = vld [vmem:[%s5580_s1 + $0xe0] sm:$0xff]   ;;  %v4415_v29 = vld [vmem:[%s5580_s1 + $0x58] sm:$0xff]  }
  0x15   : > { %1352 = vmatprep.mubr.bf16.mxu0 %v481_v21  ;;  %1545 = vmatprep.mubr.bf16.mxu1 %v483_v22  ;;  %v4416_v30 = vld [vmem:[%s5580_s1 + $0xd8] sm:$0xff]   ;;  %v4417_v31 = vld [vmem:[%s5580_s1 + $0x50] sm:$0xff]   ;;  %v4419_v33 = vld [vmem:[%s5580_s1 + $0x48] sm:$0xff]  }
  0x16   : > { %1325 = vmatpush1.bf16.msra.mxu0 %v4395_v5  ;;  %v4418_v32 = vld [vmem:[%s5580_s1 + $0xd0] sm:$0xff]   ;;  %v4420_v34 = vld [vmem:[%s5580_s1 + $0xc8] sm:$0xff]   ;;  %v4421_v35 = vld [vmem:[%s5580_s1 + $0x40] sm:$0xff]  }
  0x17   : > { %1518 = vmatpush1.bf16.msra.mxu1 %v4396_v6  ;;  %1326 = vmatprep.subr.bf16.mxu0 %v4531_v1  ;;  %v4422_v36 = vld [vmem:[%s5580_s1 + $0xc0] sm:$0xff]   ;;  %v382_v38 = vld [vmem:[%s4662_s23 + $0x10] sm:$0xff]  ;;  %v4423_v41 = vld [vmem:[%s5580_s1 + $0x138] sm:$0xff]  }
  0x18   : > { %1519 = vmatprep.subr.bf16.mxu1 %v4531_v1  ;;  %v380_v37 = vld [vmem:[%s4662_s23] sm:$0xff]  ;;  %v482_v40 = vunpack.c.l.s8.bf16 %v382_v38  ;;  %v4424_v44 = vld [vmem:[%s5580_s1 + $0x130] sm:$0xff]   ;;  %v4433_v45 = vld [vmem:[%s5580_s1 + $0x1b8] sm:$0xff]   ;;  %v492_v51 = vunpack.c.h.s8.bf16 %v382_v38 }
  0x19   : > { %v480_v39 = vunpack.c.l.s8.bf16 %v380_v37  ;;  %v391_v46 = vld [vmem:[%s4662_s23 + $0x58] sm:$0xff]  ;;  %v393_v47 = vld [vmem:[%s4662_s23 + $0x68] sm:$0xff]  ;;  %v4435_v48 = vld [vmem:[%s5580_s1 + $0x1b0] sm:$0xff]   ;;  %v490_v49 = vunpack.c.h.s8.bf16 %v380_v37 }
  0x1a   : > { %1327 = vmatpush1.bf16.msra.mxu0 %v4397_v7  ;;  %v4425_v50 = vld [vmem:[%s5580_s1 + $0x128] sm:$0xff]   ;;  %v501_v52 = vunpack.c.l.s8.bf16 %v391_v46  ;;  %v503_v54 = vunpack.c.l.s8.bf16 %v393_v47  ;;  %v390_v55 = vld [vmem:[%s4662_s23 + $0x50] sm:$0xff]  ;;  %v392_v56 = vld [vmem:[%s4662_s23 + $0x60] sm:$0xff]  ;;  %v511_v62 = vunpack.c.h.s8.bf16 %v391_v46  ;;  %v513_v63 = vunpack.c.h.s8.bf16 %v393_v47 }
  0x1b   : > { %1520 = vmatpush1.bf16.msra.mxu1 %v4398_v8  ;;  %1328 = vmatprep.subr.bf16.mxu0 %v4531_v1  ;;  %v4436_v53 = vld [vmem:[%s5580_s1 + $0x1a8] sm:$0xff]   ;;  %v4426_v57 = vld [vmem:[%s5580_s1 + $0x120] sm:$0xff]   ;;  %v500_v59 = vunpack.c.l.s8.bf16 %v390_v55  ;;  %v4427_v60 = vld [vmem:[%s5580_s1 + $0x118] sm:$0xff]   ;;  %v502_v61 = vunpack.c.l.s8.bf16 %v392_v56  ;;  %v510_v6 = vunpack.c.h.s8.bf16 %v390_v55  ;;  %v512_v8 = vunpack.c.h.s8.bf16 %v392_v56 }
  0x1c   : > { %1521 = vmatprep.subr.bf16.mxu1 %v4531_v1  ;;  %v4438_v58 = vld [vmem:[%s5580_s1 + $0x1a0] sm:$0xff]   ;;  %v4439_v0 = vld [vmem:[%s5580_s1 + $0x198] sm:$0xff]   ;;  %v401_v2 = vld [vmem:[%s4662_s23 + $0xa8] sm:$0xff] }
  0x1d   : > { %v403_v3 = vld [vmem:[%s4662_s23 + $0xb8] sm:$0xff]  ;;  %v4428_v4 = vld [vmem:[%s5580_s1 + $0x110] sm:$0xff]   ;;  %v4429_v7 = vld [vmem:[%s5580_s1 + $0x108] sm:$0xff]   ;;  %v531_v19 = vunpack.c.h.s8.bf16 %v401_v2 }
  0x1e   : > { %1329 = vmatpush1.bf16.msra.mxu0 %v4399_v9  ;;  %v4440_v5 = vld [vmem:[%s5580_s1 + $0x190] sm:$0xff]   ;;  %v521_v9 = vunpack.c.l.s8.bf16 %v401_v2  ;;  %v533_v20 = vunpack.c.h.s8.bf16 %v403_v3  ;;  %v4445_v21 = vld [vmem:[%s5580_s1 + $0x1f8] sm:$0xff]   ;;  %v4454_v55 = vld [vmem:[%s5580_s1 + $0x1c0] sm:$0xff]  }
  0x1f   : > { %1522 = vmatpush1.bf16.msra.mxu1 %v4400_v10  ;;  %1330 = vmatprep.subr.bf16.mxu0 %v4531_v1  ;;  %v4442_v10 = vld [vmem:[%s5580_s1 + $0x188] sm:$0xff]   ;;  %v411_v22 = vld [vmem:[%s4662_s23 + $0xf8] sm:$0xff] }
  0x20   : > { %1523 = vmatprep.subr.bf16.mxu1 %v4531_v1  ;;  %v551_v38 = vunpack.c.h.s8.bf16 %v411_v22 }
  0x22   : > { %1331 = vmatpush1.bf16.msra.mxu0 %v4401_v11  ;;  %v523_v11 = vunpack.c.l.s8.bf16 %v403_v3  ;;  %v430_v3 = vld [vmem:[%s4662_s23 + $0x190] sm:$0xff] }
  0x23   : > { %1524 = vmatpush1.bf16.msra.mxu1 %v4402_v12  ;;  %1332 = vmatprep.subr.bf16.mxu0 %v4531_v1  ;;  %v400_v12 = vld [vmem:[%s4662_s23 + $0xa0] sm:$0xff] }
  0x24   : > { %1525 = vmatprep.subr.bf16.mxu1 %v4531_v1 }
  0x26   : > { %1333 = vmatpush1.bf16.msra.mxu0 %v4403_v13  ;;  %v402_v13 = vld [vmem:[%s4662_s23 + $0xb0] sm:$0xff] }
  0x27   : > { %1526 = vmatpush1.bf16.msra.mxu1 %v4404_v14  ;;  %1334 = vmatprep.subr.bf16.mxu0 %v4531_v1  ;;  %v4430_v14 = vld [vmem:[%s5580_s1 + $0x100] sm:$0xff]  }
  0x28   : > { %1527 = vmatprep.subr.bf16.mxu1 %v4531_v1 }
  0x2a   : > { %1335 = vmatpush1.bf16.msra.mxu0 %v4405_v15  ;;  %v4443_v15 = vld [vmem:[%s5580_s1 + $0x180] sm:$0xff]  }
  0x2b   : > { %1528 = vmatpush1.bf16.msra.mxu1 %v4406_v16  ;;  %1336 = vmatprep.subr.bf16.mxu0 %v4531_v1  ;;  %v520_v16 = vunpack.c.l.s8.bf16 %v400_v12 }
  0x2c   : > { %1529 = vmatprep.subr.bf16.mxu1 %v4531_v1 }
  0x2e   : > { %1337 = vmatpush2.bf16.msra.mxu0 %v4407_v17  ;;  %v4431_v17 = vld [vmem:[%s5580_s1 + $0x178] sm:$0xff]  }
  0x2f   : > { %1530 = vmatpush2.bf16.msra.mxu1 %v4408_v18  ;;  %1338 = vmatprep.subr.bf16.mxu0 %v4531_v1  ;;  %v522_v18 = vunpack.c.l.s8.bf16 %v402_v13 }
  0x30   : > { %1531 = vmatprep.subr.bf16.mxu1 %v4531_v1 }
  0x32   : > { %1339 = vmatpush2.bf16.msra.mxu0 %v4409_v23  ;;  %v4432_v23 = vld [vmem:[%s5580_s1 + $0x170] sm:$0xff]  }
  0x33   : > { %1532 = vmatpush2.bf16.msra.mxu1 %v4410_v24  ;;  %1340 = vmatprep.subr.bf16.mxu0 %v4531_v1  ;;  %v413_v24 = vld [vmem:[%s4662_s23 + $0x108] sm:$0xff] }
  0x34   : > { %1533 = vmatprep.subr.bf16.mxu1 %v4531_v1 }
  0x36   : > { %1341 = vmatpush2.bf16.msra.mxu0 %v4411_v25  ;;  %v4446_v25 = vld [vmem:[%s5580_s1 + $0x1f0] sm:$0xff]  }
  0x37   : > { %1534 = vmatpush2.bf16.msra.mxu1 %v4412_v26  ;;  %1342 = vmatprep.subr.bf16.mxu0 %v4531_v1  ;;  %v530_v26 = vunpack.c.h.s8.bf16 %v400_v12 }
  0x38   : > { %1535 = vmatprep.subr.bf16.mxu1 %v4531_v1 }
  0x3a   : > { %1343 = vmatpush2.bf16.msra.mxu0 %v4413_v27  ;;  %v532_v27 = vunpack.c.h.s8.bf16 %v402_v13 }
  0x3b   : > { %1536 = vmatpush2.bf16.msra.mxu1 %v4414_v28  ;;  %1344 = vmatprep.subr.bf16.mxu0 %v4531_v1  ;;  %v541_v28 = vunpack.c.l.s8.bf16 %v411_v22  ;;  %v453_v22 = vld [vmem:[%s4662_s23 + $0x248] sm:$0xff] }
  0x3c   : > { %1537 = vmatprep.subr.bf16.mxu1 %v4531_v1 }
  0x3e   : > { %1345 = vmatpush2.bf16.msra.mxu0 %v4415_v29  ;;  %v543_v29 = vunpack.c.l.s8.bf16 %v413_v24 }
  0x3f   : > { %1538 = vmatpush2.bf16.msra.mxu1 %v4416_v30  ;;  %1346 = vmatprep.subr.bf16.mxu0 %v4531_v1  ;;  %v4434_v30 = vld [vmem:[%s5580_s1 + $0x168] sm:$0xff]  }
  0x40   : > { %1539 = vmatprep.subr.bf16.mxu1 %v4531_v1 }
  0x42   : > { %1347 = vmatpush2.bf16.msra.mxu0 %v4417_v31  ;;  %v4447_v31 = vld [vmem:[%s5580_s1 + $0x1e8] sm:$0xff]  }
  0x43   : > { %1540 = vmatpush2.bf16.msra.mxu1 %v4418_v32  ;;  %1348 = vmatprep.subr.bf16.mxu0 %v4531_v1  ;;  %v410_v32 = vld [vmem:[%s4662_s23 + $0xf0] sm:$0xff] }
  0x44   : > { %1541 = vmatprep.subr.bf16.mxu1 %v4531_v1  ;;  %v550_v46 = vunpack.c.h.s8.bf16 %v410_v32 }
  0x46   : > { %1349 = vmatpush2.bf16.msra.mxu0 %v4419_v33  ;;  %v412_v33 = vld [vmem:[%s4662_s23 + $0x100] sm:$0xff] }
  0x47   : > { %1542 = vmatpush2.bf16.msra.mxu1 %v4420_v34  ;;  %1350 = vmatprep.subr.bf16.mxu0 %v4531_v1  ;;  %v4437_v34 = vld [vmem:[%s5580_s1 + $0x160] sm:$0xff]   ;;  %v542_v37 = vunpack.c.l.s8.bf16 %v412_v33  ;;  %v552_v47 = vunpack.c.h.s8.bf16 %v412_v33  ;;  %v461_v33 = vld [vmem:[%s4662_s23 + $0x288] sm:$0xff] }
  0x48   : > { %1543 = vmatprep.subr.bf16.mxu1 %v4531_v1 }
  0x4a   : > { %1351 = vmatpush2.bf16.msra.mxu0 %v4421_v35  ;;  %v4449_v35 = vld [vmem:[%s5580_s1 + $0x1e0] sm:$0xff]  }
  0x4b   : > { %1544 = vmatpush2.bf16.msra.mxu1 %v4422_v36  ;;  %1706 = vmatprep.subr.bf16.mxu0 %v4531_v1  ;;  %v540_v36 = vunpack.c.l.s8.bf16 %v410_v32  ;;  %v633_v32 = vunpack.c.h.s8.bf16 %v453_v22 }
  0x4c   : > { %1899 = vmatprep.subr.bf16.mxu1 %v4531_v1 }
  0x4d   : > { %1353 = vmatmul.mubr.bf16.vlgmr.msra.gmra.mxu0 %v480_v39  ;;  %v553_v39 = vunpack.c.h.s8.bf16 %v413_v24 }
  0x4e   : > { %1546 = vmatmul.mubr.bf16.vlgmr.msra.gmra.mxu1 %v482_v40  ;;  %1707 = vmatpush1.bf16.msra.mxu0 %v4423_v41  ;;  %v4441_v40 = vld [vmem:[%s5580_s1 + $0x158] sm:$0xff]  }
  0x4f   : > { %1360 = vmatprep.mubr.bf16.mxu0 %v491_v42  ;;  %1553 = vmatprep.mubr.bf16.mxu1 %v493_v43  ;;  %v4450_v41 = vld [vmem:[%s5580_s1 + $0x1d8] sm:$0xff]   ;;  %v421_v42 = vld [vmem:[%s4662_s23 + $0x148] sm:$0xff]  ;;  %v4444_v43 = vld [vmem:[%s5580_s1 + $0x150] sm:$0xff]  }
  0x50   : > { %1708 = vmatprep.subr.bf16.mxu0 %v4531_v1  ;;  %1900 = vmatpush1.bf16.msra.mxu1 %v4433_v45  ;;  %v4452_v45 = vld [vmem:[%s5580_s1 + $0x1d0] sm:$0xff]  }
  0x51   : > { %1901 = vmatprep.subr.bf16.mxu1 %v4531_v1 }
  0x52   : > { %1709 = vmatpush1.bf16.msra.mxu0 %v4424_v44  ;;  %v423_v44 = vld [vmem:[%s4662_s23 + $0x158] sm:$0xff] }
  0x53   : > { %1710 = vmatprep.subr.bf16.mxu0 %v4531_v1 }
  0x54   : > { %1902 = vmatpush1.bf16.msra.mxu1 %v4435_v48  ;;  %v561_v48 = vunpack.c.l.s8.bf16 %v421_v42 }
  0x55   : > { %1361 = vmatmul.mubr.bf16.gmra.mxu0 %v490_v49  ;;  %1903 = vmatprep.subr.bf16.mxu1 %v4531_v1  ;;  %v563_v49 = vunpack.c.l.s8.bf16 %v423_v44 }
  0x56   : > { %1554 = vmatmul.mubr.bf16.gmra.mxu1 %v492_v51  ;;  %1368 = vmatprep.mubr.bf16.mxu0 %v501_v52  ;;  %v4453_v51 = vld [vmem:[%s5580_s1 + $0x1c8] sm:$0xff]   ;;  %v420_v52 = vld [vmem:[%s4662_s23 + $0x140] sm:$0xff] }
  0x57   : > { %1561 = vmatprep.mubr.bf16.mxu1 %v503_v54  ;;  %1711 = vmatpush1.bf16.msra.mxu0 %v4425_v50  ;;  %v4448_v50 = vld [vmem:[%s5580_s1 + $0x148] sm:$0xff]   ;;  %v4451_v54 = vld [vmem:[%s5580_s1 + $0x140] sm:$0xff]   ;;  %v560_v56 = vunpack.c.l.s8.bf16 %v420_v52 }
  0x58   : > { %1712 = vmatprep.subr.bf16.mxu0 %v4531_v1  ;;  %1904 = vmatpush1.bf16.msra.mxu1 %v4436_v53  ;;  %v422_v53 = vld [vmem:[%s4662_s23 + $0x150] sm:$0xff] }
  0x59   : > { %1905 = vmatprep.subr.bf16.mxu1 %v4531_v1 }
  0x5b   : > { %1713 = vmatpush1.bf16.msra.mxu0 %v4426_v57  ;;  %v562_v57 = vunpack.c.l.s8.bf16 %v422_v53 }
  0x5c   : > { %1714 = vmatprep.subr.bf16.mxu0 %v4531_v1  ;;  %1906 = vmatpush1.bf16.msra.mxu1 %v4438_v58  ;;  %v571_v58 = vunpack.c.h.s8.bf16 %v421_v42 }
  0x5d   : > { %1369 = vmatmul.mubr.bf16.gmra.mxu0 %v500_v59  ;;  %1907 = vmatprep.subr.bf16.mxu1 %v4531_v1  ;;  %v573_v59 = vunpack.c.h.s8.bf16 %v423_v44 }
  0x5e   : > { %1562 = vmatmul.mubr.bf16.gmra.mxu1 %v502_v61  ;;  %1376 = vmatprep.mubr.bf16.mxu0 %v511_v62  ;;  %v433_v61 = vld [vmem:[%s4662_s23 + $0x1a8] sm:$0xff]  ;;  %v570_v62 = vunpack.c.h.s8.bf16 %v420_v52  ;;  %v472_v52 = vld [vmem:[%s4662_s23 + $0x2e0] sm:$0xff] }
  0x5f   : > { %1569 = vmatprep.mubr.bf16.mxu1 %v513_v63  ;;  %1715 = vmatpush1.bf16.msra.mxu0 %v4427_v60  ;;  %v431_v60 = vld [vmem:[%s4662_s23 + $0x198] sm:$0xff]  ;;  %v572_v63 = vunpack.c.h.s8.bf16 %v422_v53  ;;  %v583_v2 = vunpack.c.l.s8.bf16 %v433_v61 }
  0x60   : > { %1716 = vmatprep.subr.bf16.mxu0 %v4531_v1  ;;  %1908 = vmatpush1.bf16.msra.mxu1 %v4439_v0  ;;  %v581_v0 = vunpack.c.l.s8.bf16 %v431_v60 }
  0x61   : > { %1909 = vmatprep.subr.bf16.mxu1 %v4531_v1 }
  0x63   : > { %1717 = vmatpush1.bf16.msra.mxu0 %v4428_v4  ;;  %v432_v4 = vld [vmem:[%s4662_s23 + $0x1a0] sm:$0xff] }
  0x64   : > { %1718 = vmatprep.subr.bf16.mxu0 %v4531_v1  ;;  %1910 = vmatpush1.bf16.msra.mxu1 %v4440_v5  ;;  %v580_v5 = vunpack.c.l.s8.bf16 %v430_v3  ;;  %v592_v12 = vunpack.c.h.s8.bf16 %v432_v4 }
  0x65   : > { %1377 = vmatmul.mubr.bf16.gmra.mxu0 %v510_v6  ;;  %1911 = vmatprep.subr.bf16.mxu1 %v4531_v1  ;;  %v582_v6 = vunpack.c.l.s8.bf16 %v432_v4 }
  0x66   : > { %1570 = vmatmul.mubr.bf16.gmra.mxu1 %v512_v8  ;;  %1384 = vmatprep.mubr.bf16.mxu0 %v521_v9  ;;  %v593_v8 = vunpack.c.h.s8.bf16 %v433_v61  ;;  %v441_v9 = vld [vmem:[%s4662_s23 + $0x1e8] sm:$0xff] }
  0x67   : > { %1577 = vmatprep.mubr.bf16.mxu1 %v523_v11  ;;  %1719 = vmatpush1.bf16.msra.mxu0 %v4429_v7  ;;  %v591_v7 = vunpack.c.h.s8.bf16 %v431_v60  ;;  %v590_v11 = vunpack.c.h.s8.bf16 %v430_v3  ;;  %v601_v13 = vunpack.c.l.s8.bf16 %v441_v9  ;;  %v672_v60 = vunpack.c.h.s8.bf16 %v472_v52  ;;  %v4455_v3 = vld [vmem:[%s5580_s1 + $0x238] sm:$0xff]  }
  0x68   : > { %1720 = vmatprep.subr.bf16.mxu0 %v4531_v1  ;;  %1912 = vmatpush1.bf16.msra.mxu1 %v4442_v10  ;;  %v443_v10 = vld [vmem:[%s4662_s23 + $0x1f8] sm:$0xff] }
  0x69   : > { %1913 = vmatprep.subr.bf16.mxu1 %v4531_v1 }
  0x6b   : > { %1721 = vmatpush1.bf16.msra.mxu0 %v4430_v14  ;;  %v603_v14 = vunpack.c.l.s8.bf16 %v443_v10 }
  0x6c   : > { %1722 = vmatprep.subr.bf16.mxu0 %v4531_v1  ;;  %1914 = vmatpush1.bf16.msra.mxu1 %v4443_v15  ;;  %v440_v15 = vld [vmem:[%s4662_s23 + $0x1e0] sm:$0xff] }
  0x6d   : > { %1385 = vmatmul.mubr.bf16.gmra.mxu0 %v520_v16  ;;  %1915 = vmatprep.subr.bf16.mxu1 %v4531_v1  ;;  %v442_v16 = vld [vmem:[%s4662_s23 + $0x1f0] sm:$0xff] }
  0x6e   : > { %1578 = vmatmul.mubr.bf16.gmra.mxu1 %v522_v18  ;;  %1392 = vmatprep.mubr.bf16.mxu0 %v531_v19  ;;  %v602_v18 = vunpack.c.l.s8.bf16 %v442_v16  ;;  %v611_v19 = vunpack.c.h.s8.bf16 %v441_v9  ;;  %v612_v24 = vunpack.c.h.s8.bf16 %v442_v16  ;;  %v397_v9 = vld [vmem:[%s4662_s23 + $0x88] sm:$0xff]  ;;  %v396_v16 = vld [vmem:[%s4662_s23 + $0x80] sm:$0xff] }
  0x6f   : > { %1585 = vmatprep.mubr.bf16.mxu1 %v533_v20  ;;  %1723 = vmatpush2.bf16.msra.mxu0 %v4431_v17  ;;  %v600_v17 = vunpack.c.l.s8.bf16 %v440_v15  ;;  %v613_v20 = vunpack.c.h.s8.bf16 %v443_v10 }
  0x70   : > { %1724 = vmatprep.subr.bf16.mxu0 %v4531_v1  ;;  %1916 = vmatpush2.bf16.msra.mxu1 %v4445_v21  ;;  %v451_v21 = vld [vmem:[%s4662_s23 + $0x238] sm:$0xff] }
  0x71   : > { %1917 = vmatprep.subr.bf16.mxu1 %v4531_v1 }
  0x73   : > { %1725 = vmatpush2.bf16.msra.mxu0 %v4432_v23  ;;  %v610_v23 = vunpack.c.h.s8.bf16 %v440_v15  ;;  %v394_v15 = vld [vmem:[%s4662_s23 + $0x70] sm:$0xff] }
  0x74   : > { %1726 = vmatprep.subr.bf16.mxu0 %v4531_v1  ;;  %1918 = vmatpush2.bf16.msra.mxu1 %v4446_v25  ;;  %v621_v25 = vunpack.c.l.s8.bf16 %v451_v21 }
  0x75   : > { %1393 = vmatmul.mubr.bf16.gmra.mxu0 %v530_v26  ;;  %1919 = vmatprep.subr.bf16.mxu1 %v4531_v1  ;;  %v623_v26 = vunpack.c.l.s8.bf16 %v453_v22  ;;  %v4459_v22 = vld [vmem:[%s5580_s1 + $0x218] sm:$0xff]  }
  0x76   : > { %1586 = vmatmul.mubr.bf16.gmra.mxu1 %v532_v27  ;;  %1400 = vmatprep.mubr.bf16.mxu0 %v541_v28  ;;  %v450_v27 = vld [vmem:[%s4662_s23 + $0x230] sm:$0xff]  ;;  %v452_v28 = vld [vmem:[%s4662_s23 + $0x240] sm:$0xff] }
  0x77   : > { %1593 = vmatprep.mubr.bf16.mxu1 %v543_v29  ;;  %1727 = vmatpush2.bf16.msra.mxu0 %v4434_v30  ;;  %v620_v29 = vunpack.c.l.s8.bf16 %v450_v27  ;;  %v622_v30 = vunpack.c.l.s8.bf16 %v452_v28 }
  0x78   : > { %1728 = vmatprep.subr.bf16.mxu0 %v4531_v1  ;;  %1920 = vmatpush2.bf16.msra.mxu1 %v4447_v31  ;;  %v631_v31 = vunpack.c.h.s8.bf16 %v451_v21  ;;  %v517_v21 = vunpack.c.h.s8.bf16 %v397_v9 }
  0x79   : > { %1921 = vmatprep.subr.bf16.mxu1 %v4531_v1 }
  0x7b   : > { %1729 = vmatpush2.bf16.msra.mxu0 %v4437_v34  ;;  %v463_v34 = vld [vmem:[%s4662_s23 + $0x298] sm:$0xff] }
  0x7c   : > { %1730 = vmatprep.subr.bf16.mxu0 %v4531_v1  ;;  %1922 = vmatpush2.bf16.msra.mxu1 %v4449_v35  ;;  %v630_v35 = vunpack.c.h.s8.bf16 %v450_v27  ;;  %v653_v44 = vunpack.c.h.s8.bf16 %v463_v34  ;;  %v516_v27 = vunpack.c.h.s8.bf16 %v396_v16 }
  0x7d   : > { %1401 = vmatmul.mubr.bf16.gmra.mxu0 %v540_v36  ;;  %1923 = vmatprep.subr.bf16.mxu1 %v4531_v1  ;;  %v632_v36 = vunpack.c.h.s8.bf16 %v452_v28 }
  0x7e   : > { %1594 = vmatmul.mubr.bf16.gmra.mxu1 %v542_v37  ;;  %1408 = vmatprep.mubr.bf16.mxu0 %v551_v38  ;;  %v641_v37 = vunpack.c.l.s8.bf16 %v461_v33  ;;  %v643_v38 = vunpack.c.l.s8.bf16 %v463_v34 }
  0x7f   : > { %1601 = vmatprep.mubr.bf16.mxu1 %v553_v39  ;;  %1731 = vmatpush2.bf16.msra.mxu0 %v4441_v40  ;;  %v460_v39 = vld [vmem:[%s4662_s23 + $0x280] sm:$0xff]  ;;  %v462_v40 = vld [vmem:[%s4662_s23 + $0x290] sm:$0xff] }
  0x80   : > { %1732 = vmatprep.subr.bf16.mxu0 %v4531_v1  ;;  %1924 = vmatpush2.bf16.msra.mxu1 %v4450_v41  ;;  %v640_v41 = vunpack.c.l.s8.bf16 %v460_v39  ;;  %v642_v42 = vunpack.c.l.s8.bf16 %v462_v40 }
  0x81   : > { %1925 = vmatprep.subr.bf16.mxu1 %v4531_v1 }
  0x83   : > { %1733 = vmatpush2.bf16.msra.mxu0 %v4444_v43  ;;  %v651_v43 = vunpack.c.h.s8.bf16 %v461_v33  ;;  %v4462_v33 = vld [vmem:[%s5580_s1 + $0x200] sm:$0xff]  }
  0x84   : > { %1734 = vmatprep.subr.bf16.mxu0 %v4531_v1  ;;  %1926 = vmatpush2.bf16.msra.mxu1 %v4452_v45  ;;  %v471_v45 = vld [vmem:[%s4662_s23 + $0x2d8] sm:$0xff] }
  0x85   : > { %1409 = vmatmul.mubr.bf16.gmra.mxu0 %v550_v46  ;;  %1927 = vmatprep.subr.bf16.mxu1 %v4531_v1  ;;  %v473_v46 = vld [vmem:[%s4662_s23 + $0x2e8] sm:$0xff] }
  0x86   : > { %1602 = vmatmul.mubr.bf16.gmra.mxu1 %v552_v47  ;;  %1416 = vmatprep.mubr.bf16.mxu0 %v561_v48  ;;  %v650_v47 = vunpack.c.h.s8.bf16 %v460_v39  ;;  %v652_v48 = vunpack.c.h.s8.bf16 %v462_v40 }
  0x87   : > { %1609 = vmatprep.mubr.bf16.mxu1 %v563_v49  ;;  %1735 = vmatpush2.bf16.msra.mxu0 %v4448_v50  ;;  %v661_v49 = vunpack.c.l.s8.bf16 %v471_v45  ;;  %v663_v50 = vunpack.c.l.s8.bf16 %v473_v46 }
  0x88   : > { %1736 = vmatprep.subr.bf16.mxu0 %v4531_v1  ;;  %1928 = vmatpush2.bf16.msra.mxu1 %v4453_v51  ;;  %v470_v51 = vld [vmem:[%s4662_s23 + $0x2d0] sm:$0xff] }
  0x89   : > { %1929 = vmatprep.subr.bf16.mxu1 %v4531_v1  ;;  %v660_v53 = vunpack.c.l.s8.bf16 %v470_v51 }
  0x8b   : > { %1737 = vmatpush2.bf16.msra.mxu0 %v4451_v54  ;;  %v662_v54 = vunpack.c.l.s8.bf16 %v472_v52 }
  0x8c   : > { %1930 = vmatpush2.bf16.msra.mxu1 %v4454_v55  ;;  %2092 = vmatprep.subr.bf16.mxu0 %v4531_v1  ;;  %v671_v55 = vunpack.c.h.s8.bf16 %v471_v45 }
  0x8d   : > { %1417 = vmatmul.mubr.bf16.gmra.mxu0 %v560_v56  ;;  %v673_v56 = vunpack.c.h.s8.bf16 %v473_v46  ;;  %v417_v46 = vld [vmem:[%s4662_s23 + $0x128] sm:$0xff] }
  0x8e   : > { %1610 = vmatmul.mubr.bf16.gmra.mxu1 %v562_v57  ;;  %1424 = vmatprep.mubr.bf16.mxu0 %v571_v58  ;;  %v385_v57 = vld [vmem:[%s4662_s23 + $0x28] sm:$0xff]  ;;  %v387_v58 = vld [vmem:[%s4662_s23 + $0x38] sm:$0xff] }
  0x8f   : > { %1617 = vmatprep.mubr.bf16.mxu1 %v573_v59  ;;  %v670_v59 = vunpack.c.h.s8.bf16 %v470_v51  ;;  %v485_v61 = vunpack.c.l.s8.bf16 %v385_v57 }
  0x95   : > { %1425 = vmatmul.mubr.bf16.gmra.mxu0 %v570_v62  ;;  %v487_v62 = vunpack.c.l.s8.bf16 %v387_v58 }
  0x96   : > { %1618 = vmatmul.mubr.bf16.gmra.mxu1 %v572_v63  ;;  %1432 = vmatprep.mubr.bf16.mxu0 %v581_v0  ;;  %v384_v63 = vld [vmem:[%s4662_s23 + $0x20] sm:$0xff]  ;;  %v386_v0 = vld [vmem:[%s4662_s23 + $0x30] sm:$0xff] }
  0x97   : > { %1625 = vmatprep.mubr.bf16.mxu1 %v583_v2  ;;  %v484_v2 = vunpack.c.l.s8.bf16 %v384_v63  ;;  %v486_v4 = vunpack.c.l.s8.bf16 %v386_v0  ;;  %v494_v10 = vunpack.c.h.s8.bf16 %v384_v63  ;;  %v4466_v63 = vld [vmem:[%s5580_s1 + $0x260] sm:$0xff]  }
  0x9d   : > { %1433 = vmatmul.mubr.bf16.gmra.mxu0 %v580_v5  ;;  %v495_v5 = vunpack.c.h.s8.bf16 %v385_v57 }
  0x9e   : > { %1626 = vmatmul.mubr.bf16.gmra.mxu1 %v582_v6  ;;  %1440 = vmatprep.mubr.bf16.mxu0 %v591_v7  ;;  %v497_v6 = vunpack.c.h.s8.bf16 %v387_v58  ;;  %v4456_v7 = vld [vmem:[%s5580_s1 + $0x230] sm:$0xff]  }
  0x9f   : > { %1633 = vmatprep.mubr.bf16.mxu1 %v593_v8  ;;  %v395_v8 = vld [vmem:[%s4662_s23 + $0x78] sm:$0xff] }
  0xa5   : > { %1441 = vmatmul.mubr.bf16.gmra.mxu0 %v590_v11  ;;  %v496_v11 = vunpack.c.h.s8.bf16 %v386_v0 }
  0xa6   : > { %1634 = vmatmul.mubr.bf16.gmra.mxu1 %v592_v12  ;;  %1448 = vmatprep.mubr.bf16.mxu0 %v601_v13  ;;  %v505_v12 = vunpack.c.l.s8.bf16 %v395_v8  ;;  %v507_v13 = vunpack.c.l.s8.bf16 %v397_v9  ;;  %v557_v9 = vunpack.c.h.s8.bf16 %v417_v46 }
  0xa7   : > { %1641 = vmatprep.mubr.bf16.mxu1 %v603_v14  ;;  %v4457_v14 = vld [vmem:[%s5580_s1 + $0x228] sm:$0xff]  }
  0xad   : > { %1449 = vmatmul.mubr.bf16.gmra.mxu0 %v600_v17  ;;  %v4458_v17 = vld [vmem:[%s5580_s1 + $0x220] sm:$0xff]  }
  0xae   : > { %1642 = vmatmul.mubr.bf16.gmra.mxu1 %v602_v18  ;;  %1456 = vmatprep.mubr.bf16.mxu0 %v611_v19  ;;  %v504_v18 = vunpack.c.l.s8.bf16 %v394_v15  ;;  %v506_v19 = vunpack.c.l.s8.bf16 %v396_v16  ;;  %v425_v16 = vld [vmem:[%s4662_s23 + $0x168] sm:$0xff] }
  0xaf   : > { %1649 = vmatprep.mubr.bf16.mxu1 %v613_v20  ;;  %v515_v20 = vunpack.c.h.s8.bf16 %v395_v8 }
  0xb5   : > { %1457 = vmatmul.mubr.bf16.gmra.mxu0 %v610_v23  ;;  %v405_v23 = vld [vmem:[%s4662_s23 + $0xc8] sm:$0xff] }
  0xb6   : > { %1650 = vmatmul.mubr.bf16.gmra.mxu1 %v612_v24  ;;  %1464 = vmatprep.mubr.bf16.mxu0 %v621_v25  ;;  %v4460_v24 = vld [vmem:[%s5580_s1 + $0x210] sm:$0xff]   ;;  %v407_v25 = vld [vmem:[%s4662_s23 + $0xd8] sm:$0xff]  ;;  %v525_v28 = vunpack.c.l.s8.bf16 %v405_v23 }
  0xb7   : > { %1657 = vmatprep.mubr.bf16.mxu1 %v623_v26  ;;  %v514_v26 = vunpack.c.h.s8.bf16 %v394_v15 }
  0xbd   : > { %1465 = vmatmul.mubr.bf16.gmra.mxu0 %v620_v29  ;;  %v527_v29 = vunpack.c.l.s8.bf16 %v407_v25 }
  0xbe   : > { %1658 = vmatmul.mubr.bf16.gmra.mxu1 %v622_v30  ;;  %1472 = vmatprep.mubr.bf16.mxu0 %v631_v31  ;;  %v4461_v30 = vld [vmem:[%s5580_s1 + $0x208] sm:$0xff]   ;;  %v404_v31 = vld [vmem:[%s4662_s23 + $0xc0] sm:$0xff] }
  0xbf   : > { %1665 = vmatprep.mubr.bf16.mxu1 %v633_v32  ;;  %v406_v32 = vld [vmem:[%s4662_s23 + $0xd0] sm:$0xff]  ;;  %v524_v34 = vunpack.c.l.s8.bf16 %v404_v31 }
  0xc5   : > { %1473 = vmatmul.mubr.bf16.gmra.mxu0 %v630_v35  ;;  %v526_v35 = vunpack.c.l.s8.bf16 %v406_v32 }
  0xc6   : > { %1666 = vmatmul.mubr.bf16.gmra.mxu1 %v632_v36  ;;  %1480 = vmatprep.mubr.bf16.mxu0 %v641_v37  ;;  %v535_v36 = vunpack.c.h.s8.bf16 %v405_v23  ;;  %v537_v37 = vunpack.c.h.s8.bf16 %v407_v25 }
  0xc7   : > { %1673 = vmatprep.mubr.bf16.mxu1 %v643_v38  ;;  %v4463_v38 = vld [vmem:[%s5580_s1 + $0x278] sm:$0xff]  }
  0xcd   : > { %1481 = vmatmul.mubr.bf16.gmra.mxu0 %v640_v41 }
  0xce   : > { %1674 = vmatmul.mubr.bf16.gmra.mxu1 %v642_v42  ;;  %1488 = vmatprep.mubr.bf16.mxu0 %v651_v43  ;;  %v415_v43 = vld [vmem:[%s4662_s23 + $0x118] sm:$0xff] }
  0xcf   : > { %1681 = vmatprep.mubr.bf16.mxu1 %v653_v44  ;;  %v4464_v44 = vld [vmem:[%s5580_s1 + $0x270] sm:$0xff]   ;;  %v545_v51 = vunpack.c.l.s8.bf16 %v415_v43 }
  0xd5   : > { %1489 = vmatmul.mubr.bf16.gmra.mxu0 %v650_v47 }
  0xd6   : > { %1682 = vmatmul.mubr.bf16.gmra.mxu1 %v652_v48  ;;  %1496 = vmatprep.mubr.bf16.mxu0 %v661_v49  ;;  %v534_v48 = vunpack.c.h.s8.bf16 %v404_v31 }
  0xd7   : > { %1689 = vmatprep.mubr.bf16.mxu1 %v663_v50  ;;  %v536_v50 = vunpack.c.h.s8.bf16 %v406_v32  ;;  %v424_v32 = vld [vmem:[%s4662_s23 + $0x160] sm:$0xff] }
  0xdd   : > { %1497 = vmatmul.mubr.bf16.gmra.mxu0 %v660_v53 }
  0xde   : > { %1690 = vmatmul.mubr.bf16.gmra.mxu1 %v662_v54  ;;  %1504 = vmatprep.mubr.bf16.mxu0 %v671_v55  ;;  %v547_v54 = vunpack.c.l.s8.bf16 %v417_v46  ;;  %v4465_v55 = vld [vmem:[%s5580_s1 + $0x268] sm:$0xff]  }
  0xdf   : > { %1697 = vmatprep.mubr.bf16.mxu1 %v673_v56 }
  0xe5   : > { %1505 = vmatmul.mubr.bf16.gmra.mxu0 %v670_v59  ;;  %v414_v59 = vld [vmem:[%s4662_s23 + $0x110] sm:$0xff] }
  0xe6   : > { %1698 = vmatmul.mubr.bf16.gmra.mxu1 %v672_v60  ;;  %1738 = vmatprep.mubr.bf16.mxu0 %v485_v61 }
  0xe7   : > { %1931 = vmatprep.mubr.bf16.mxu1 %v487_v62  ;;  %v416_v62 = vld [vmem:[%s4662_s23 + $0x120] sm:$0xff] }
  0xe8   : > { %v556_v23 = vunpack.c.h.s8.bf16 %v416_v62 }
  0xed   : > { %1739 = vmatmul.mubr.bf16.vlgmr.msra.gmra.mxu0 %v484_v2 }
  0xee   : > { %2093 = vmatpush1.bf16.msra.mxu0 %v4455_v3  ;;  %1932 = vmatmul.mubr.bf16.vlgmr.msra.gmra.mxu1 %v486_v4  ;;  %v544_v3 = vunpack.c.l.s8.bf16 %v414_v59 }
  0xef   : > { %1746 = vmatprep.mubr.bf16.mxu0 %v495_v5  ;;  %1939 = vmatprep.mubr.bf16.mxu1 %v497_v6  ;;  %v546_v5 = vunpack.c.l.s8.bf16 %v416_v62  ;;  %v555_v6 = vunpack.c.h.s8.bf16 %v415_v43  ;;  %v575_v43 = vunpack.c.h.s8.bf16 %v425_v16 }
  0xf0   : > { %2094 = vmatprep.subr.bf16.mxu0 %v4531_v1 }
  0xf2   : > { %2095 = vmatpush1.bf16.msra.mxu0 %v4456_v7 }
  0xf3   : > { %2096 = vmatprep.subr.bf16.mxu0 %v4531_v1 }
  0xf5   : > { %1747 = vmatmul.mubr.bf16.gmra.mxu0 %v494_v10  ;;  %v4467_v10 = vld [vmem:[%s5580_s1 + $0x258] sm:$0xff]  }
  0xf6   : > { %1940 = vmatmul.mubr.bf16.gmra.mxu1 %v496_v11  ;;  %1754 = vmatprep.mubr.bf16.mxu0 %v505_v12 }
  0xf7   : > { %1947 = vmatprep.mubr.bf16.mxu1 %v507_v13  ;;  %2097 = vmatpush1.bf16.msra.mxu0 %v4457_v14 }
  0xf8   : > { %2098 = vmatprep.subr.bf16.mxu0 %v4531_v1 }
  0xfb   : > { %2099 = vmatpush1.bf16.msra.mxu0 %v4458_v17  ;;  %v4468_v17 = vld [vmem:[%s5580_s1 + $0x250] sm:$0xff]  }
  0xfc   : > { %2100 = vmatprep.subr.bf16.mxu0 %v4531_v1 }
  0xfd   : > { %1755 = vmatmul.mubr.bf16.gmra.mxu0 %v504_v18 }
  0xfe   : > { %1948 = vmatmul.mubr.bf16.gmra.mxu1 %v506_v19  ;;  %1762 = vmatprep.mubr.bf16.mxu0 %v515_v20  ;;  %v427_v19 = vld [vmem:[%s4662_s23 + $0x178] sm:$0xff] }
  0xff   : > { %1955 = vmatprep.mubr.bf16.mxu1 %v517_v21  ;;  %2101 = vmatpush1.bf16.msra.mxu0 %v4459_v22  ;;  %v554_v21 = vunpack.c.h.s8.bf16 %v414_v59  ;;  %v577_v46 = vunpack.c.h.s8.bf16 %v427_v19 }
 0x100   : > { %2102 = vmatprep.subr.bf16.mxu0 %v4531_v1 }
 0x103   : > { %2103 = vmatpush1.bf16.msra.mxu0 %v4460_v24  ;;  %v565_v24 = vunpack.c.l.s8.bf16 %v425_v16 }
 0x104   : > { %2104 = vmatprep.subr.bf16.mxu0 %v4531_v1 }
 0x105   : > { %1763 = vmatmul.mubr.bf16.gmra.mxu0 %v514_v26 }
 0x106   : > { %1956 = vmatmul.mubr.bf16.gmra.mxu1 %v516_v27  ;;  %1770 = vmatprep.mubr.bf16.mxu0 %v525_v28  ;;  %v567_v27 = vunpack.c.l.s8.bf16 %v427_v19  ;;  %v4469_v28 = vld [vmem:[%s5580_s1 + $0x248] sm:$0xff]  }
 0x107   : > { %1963 = vmatprep.mubr.bf16.mxu1 %v527_v29  ;;  %2105 = vmatpush1.bf16.msra.mxu0 %v4461_v30 }
 0x108   : > { %2106 = vmatprep.subr.bf16.mxu0 %v4531_v1 }
 0x10b   : > { %2107 = vmatpush1.bf16.msra.mxu0 %v4462_v33 }
 0x10c   : > { %2108 = vmatprep.subr.bf16.mxu0 %v4531_v1 }
 0x10d   : > { %v1354_v39 = vpop.f32.mrf.mxu0  ;;  %1771 = vmatmul.mubr.bf16.gmra.mxu0 %v524_v34 }
 0x10e   : > { %v1547_v40 = vpop.f32.mrf.mxu1  ;;  %1964 = vmatmul.mubr.bf16.gmra.mxu1 %v526_v35  ;;  %1778 = vmatprep.mubr.bf16.mxu0 %v535_v36  ;;  %v426_v35 = vld [vmem:[%s4662_s23 + $0x170] sm:$0xff]  ;;  %v4470_v36 = vld [vmem:[%s5580_s1 + $0x240] sm:$0xff]  }
 0x10f   : > { %v4952_v41 = vadd.f32 %v1547_v40, %v1354_v39  ;;  %v1356_v42 = vpop.f32.mrf.mxu0  ;;  %1971 = vmatprep.mubr.bf16.mxu1 %v537_v37  ;;  %2109 = vmatpush2.bf16.msra.mxu0 %v4463_v38  ;;  %v564_v39 = vunpack.c.l.s8.bf16 %v424_v32 }
 0x110   : > { %v1549_v45 = vpop.f32.mrf.mxu1  ;;  %2110 = vmatprep.subr.bf16.mxu0 %v4531_v1  ;;  %v566_v42 = vunpack.c.l.s8.bf16 %v426_v35 }
 0x111   : > { %v1357_v47 = vpop.f32.mrf.mxu0 }
 0x112   : > { %v1550_v49 = vpop.f32.mrf.mxu1 }
 0x113   : > { %v4960_v52 = vadd.f32 %v1550_v49, %v1357_v47  ;;  %v1359_v53 = vpop.f32.mrf.mxu0  ;;  %2111 = vmatpush2.bf16.msra.mxu0 %v4464_v44 }
 0x114   : > { %v1552_v56 = vpop.f32.mrf.mxu1  ;;  %2112 = vmatprep.subr.bf16.mxu0 %v4531_v1 }
 0x115   : > { %v1362_v57 = vpop.f32.mrf.mxu0  ;;  %1779 = vmatmul.mubr.bf16.gmra.mxu0 %v534_v48  ;;  %v574_v56 = vunpack.c.h.s8.bf16 %v424_v32 }
 0x116   : > { %v1555_v58 = vpop.f32.mrf.mxu1  ;;  %1972 = vmatmul.mubr.bf16.gmra.mxu1 %v536_v50  ;;  %1786 = vmatprep.mubr.bf16.mxu0 %v545_v51  ;;  %v435_v51 = vld [vmem:[%s4662_s23 + $0x1b8] sm:$0xff] }
 0x117   : > { %v4967_v60 = vadd.f32 %v1555_v58, %v1362_v57  ;;  %v1364_v61 = vpop.f32.mrf.mxu0  ;;  %1979 = vmatprep.mubr.bf16.mxu1 %v547_v54  ;;  %2113 = vmatpush2.bf16.msra.mxu0 %v4465_v55  ;;  %v437_v54 = vld [vmem:[%s4662_s23 + $0x1c8] sm:$0xff]  ;;  %v576_v58 = vunpack.c.h.s8.bf16 %v426_v35  ;;  %v585_v59 = vunpack.c.l.s8.bf16 %v435_v51 }
 0x118   : > { %v1557_v0 = vpop.f32.mrf.mxu1  ;;  %2114 = vmatprep.subr.bf16.mxu0 %v4531_v1 }
 0x119   : > { %v1365_v2 = vpop.f32.mrf.mxu0 }
 0x11a   : > { %v1558_v4 = vpop.f32.mrf.mxu1 }
 0x11b   : > { %v4974_v7 = vadd.f32 %v1558_v4, %v1365_v2  ;;  %v1367_v8 = vpop.f32.mrf.mxu0  ;;  %2115 = vmatpush2.bf16.msra.mxu0 %v4466_v63  ;;  %v587_v63 = vunpack.c.l.s8.bf16 %v437_v54  ;;  %v434_v4 = vld [vmem:[%s4662_s23 + $0x1b0] sm:$0xff] }
 0x11c   : > { %v1560_v11 = vpop.f32.mrf.mxu1  ;;  %2116 = vmatprep.subr.bf16.mxu0 %v4531_v1  ;;  %v436_v8 = vld [vmem:[%s4662_s23 + $0x1c0] sm:$0xff] }
 0x11d   : > { %v1370_v12 = vpop.f32.mrf.mxu0  ;;  %1787 = vmatmul.mubr.bf16.gmra.mxu0 %v544_v3  ;;  %v584_v11 = vunpack.c.l.s8.bf16 %v434_v4 }
 0x11e   : > { %v1563_v13 = vpop.f32.mrf.mxu1  ;;  %1980 = vmatmul.mubr.bf16.gmra.mxu1 %v546_v5  ;;  %1794 = vmatprep.mubr.bf16.mxu0 %v555_v6 }
 0x11f   : > { %v4980_v14 = vadd.f32 %v1563_v13, %v1370_v12  ;;  %v1372_v15 = vpop.f32.mrf.mxu0  ;;  %1987 = vmatprep.mubr.bf16.mxu1 %v557_v9  ;;  %2117 = vmatpush2.bf16.msra.mxu0 %v4467_v10  ;;  %v586_v13 = vunpack.c.l.s8.bf16 %v436_v8 }
 0x120   : > { %v1565_v18 = vpop.f32.mrf.mxu1  ;;  %2118 = vmatprep.subr.bf16.mxu0 %v4531_v1  ;;  %v595_v15 = vunpack.c.h.s8.bf16 %v435_v51 }
 0x121   : > { %v1373_v20 = vpop.f32.mrf.mxu0  ;;  %v597_v18 = vunpack.c.h.s8.bf16 %v437_v54 }
 0x122   : > { %v1566_v22 = vpop.f32.mrf.mxu1 }
 0x123   : > { %v4988_v25 = vadd.f32 %v1566_v22, %v1373_v20  ;;  %v1375_v26 = vpop.f32.mrf.mxu0  ;;  %2119 = vmatpush2.bf16.msra.mxu0 %v4468_v17 }
 0x124   : > { %v1568_v29 = vpop.f32.mrf.mxu1  ;;  %2120 = vmatprep.subr.bf16.mxu0 %v4531_v1 }
 0x125   : > { %v1378_v30 = vpop.f32.mrf.mxu0  ;;  %1795 = vmatmul.mubr.bf16.gmra.mxu0 %v554_v21  ;;  %v594_v29 = vunpack.c.h.s8.bf16 %v434_v4 }
 0x126   : > { %v1571_v31 = vpop.f32.mrf.mxu1  ;;  %1988 = vmatmul.mubr.bf16.gmra.mxu1 %v556_v23  ;;  %1802 = vmatprep.mubr.bf16.mxu0 %v565_v24  ;;  %v445_v24 = vld [vmem:[%s4662_s23 + $0x208] sm:$0xff] }
 0x127   : > { %v4995_v33 = vadd.f32 %v1571_v31, %v1378_v30  ;;  %v1380_v34 = vpop.f32.mrf.mxu0  ;;  %1995 = vmatprep.mubr.bf16.mxu1 %v567_v27  ;;  %2121 = vmatpush2.bf16.msra.mxu0 %v4469_v28  ;;  %v447_v27 = vld [vmem:[%s4662_s23 + $0x218] sm:$0xff]  ;;  %v596_v31 = vunpack.c.h.s8.bf16 %v436_v8  ;;  %v605_v32 = vunpack.c.l.s8.bf16 %v445_v24  ;;  %v615_v51 = vunpack.c.h.s8.bf16 %v445_v24 }
 0x128   : > { %v1573_v37 = vpop.f32.mrf.mxu1  ;;  %2122 = vmatprep.subr.bf16.mxu0 %v4531_v1 }
 0x129   : > { %v1381_v38 = vpop.f32.mrf.mxu0 }
 0x12a   : > { %v1574_v40 = vpop.f32.mrf.mxu1 }
 0x12b   : > { %v5002_v44 = vadd.f32 %v1574_v40, %v1381_v38  ;;  %v1383_v45 = vpop.f32.mrf.mxu0  ;;  %2123 = vmatpush2.bf16.msra.mxu0 %v4470_v36  ;;  %v607_v36 = vunpack.c.l.s8.bf16 %v447_v27  ;;  %v444_v40 = vld [vmem:[%s4662_s23 + $0x200] sm:$0xff] }
 0x12c   : > { %v1576_v47 = vpop.f32.mrf.mxu1  ;;  %v446_v45 = vld [vmem:[%s4662_s23 + $0x210] sm:$0xff]  ;;  %v614_v4 = vunpack.c.h.s8.bf16 %v444_v40 }
 0x12d   : > { %v1386_v48 = vpop.f32.mrf.mxu0  ;;  %1803 = vmatmul.mubr.bf16.gmra.mxu0 %v564_v39  ;;  %v616_v8 = vunpack.c.h.s8.bf16 %v446_v45 }
 0x12e   : > { %v1579_v49 = vpop.f32.mrf.mxu1  ;;  %1996 = vmatmul.mubr.bf16.gmra.mxu1 %v566_v42  ;;  %1810 = vmatprep.mubr.bf16.mxu0 %v575_v43 }
 0x12f   : > { %v5004_v50 = vadd.f32 %v1579_v49, %v1386_v48  ;;  %v1388_v1 = vpop.f32.mrf.mxu0  ;;  %2003 = vmatprep.mubr.bf16.mxu1 %v577_v46  ;;  %v604_v48 = vunpack.c.l.s8.bf16 %v444_v40 }
 0x130   : > { %v1581_v53 = vpop.f32.mrf.mxu1  ;;  %v606_v1 = vunpack.c.l.s8.bf16 %v446_v45 }
 0x131   : > { %v1389_v55 = vpop.f32.mrf.mxu0 }
 0x132   : > { %v1582_v57 = vpop.f32.mrf.mxu1 }
 0x133   : > { %v5008_v61 = vadd.f32 %v1582_v57, %v1389_v55  ;;  %v1391_v62 = vpop.f32.mrf.mxu0  ;;  %v617_v55 = vunpack.c.h.s8.bf16 %v447_v27  ;;  %v2498_v27 = vld [vmem:[%s5045_s10 + $0x10] sm:$0xff] }
 0x134   : > { %v1584_v0 = vpop.f32.mrf.mxu1  ;;  %2548 = vperm.xlu1 %4390, %v2498_v27  }
 0x135   : > { %v1394_v2 = vpop.f32.mrf.mxu0  ;;  %1811 = vmatmul.mubr.bf16.gmra.mxu0 %v574_v56 }
 0x136   : > { %v1587_v3 = vpop.f32.mrf.mxu1  ;;  %2004 = vmatmul.mubr.bf16.gmra.mxu1 %v576_v58  ;;  %1818 = vmatprep.mubr.bf16.mxu0 %v585_v59 }
 0x137   : > { %v5011_v5 = vadd.f32 %v1587_v3, %v1394_v2  ;;  %v1396_v6 = vpop.f32.mrf.mxu0  ;;  %2011 = vmatprep.mubr.bf16.mxu1 %v587_v63  ;;  %v455_v63 = vld [vmem:[%s4662_s23 + $0x258] sm:$0xff]  ;;  %v457_v2 = vld [vmem:[%s4662_s23 + $0x268] sm:$0xff] }
 0x138   : > { %v1589_v9 = vpop.f32.mrf.mxu1 }
 0x139   : > { %v1397_v10 = vpop.f32.mrf.mxu0  ;;  %v625_v9 = vunpack.c.l.s8.bf16 %v455_v63 }
 0x13a   : > { %v1590_v12 = vpop.f32.mrf.mxu1 }
 0x13b   : > { %v5014_v16 = vadd.f32 %v1590_v12, %v1397_v10  ;;  %v1399_v17 = vpop.f32.mrf.mxu0  ;;  %v627_v12 = vunpack.c.l.s8.bf16 %v457_v2 }
 0x13c   : > { %v1592_v19 = vpop.f32.mrf.mxu1 }
 0x13d   : > { %v1402_v20 = vpop.f32.mrf.mxu0  ;;  %1819 = vmatmul.mubr.bf16.gmra.mxu0 %v584_v11  ;;  %v454_v19 = vld [vmem:[%s4662_s23 + $0x250] sm:$0xff] }
 0x13e   : > { %v1595_v21 = vpop.f32.mrf.mxu1  ;;  %2012 = vmatmul.mubr.bf16.gmra.mxu1 %v586_v13  ;;  %1826 = vmatprep.mubr.bf16.mxu0 %v595_v15  ;;  %v2496_v15 = vld [vmem:[%s5045_s10] sm:$0xff] }
 0x13f   : > { %v5016_v22 = vadd.f32 %v1595_v21, %v1402_v20  ;;  %v1404_v23 = vpop.f32.mrf.mxu0  ;;  %2019 = vmatprep.mubr.bf16.mxu1 %v597_v18  ;;  %2538 = vperm.xlu0 %4389, %v2496_v15   ;;  %v2504_v15 = vld [vmem:[%s5045_s10 + $0x40] sm:$0xff] }
 0x140   : > { %v1597_v26 = vpop.f32.mrf.mxu1  ;;  %v456_v23 = vld [vmem:[%s4662_s23 + $0x260] sm:$0xff] }
 0x141   : > { %v1405_v28 = vpop.f32.mrf.mxu0  ;;  %v2497_v26 = vld [vmem:[%s5045_s10 + $0x8] sm:$0xff] }
 0x142   : > { %v1598_v30 = vpop.f32.mrf.mxu1 }
 0x143   : > { %v5020_v34 = vadd.f32 %v1598_v30, %v1405_v28  ;;  %v1407_v35 = vpop.f32.mrf.mxu0  ;;  %2543 = vperm.xlu0 %4389, %v2497_v26  }
 0x144   : > { %v1600_v37 = vpop.f32.mrf.mxu1 }
 0x145   : > { %v1410_v38 = vpop.f32.mrf.mxu0  ;;  %1827 = vmatmul.mubr.bf16.gmra.mxu0 %v594_v29  ;;  %v624_v29 = vunpack.c.l.s8.bf16 %v454_v19  ;;  %v637_v37 = vunpack.c.h.s8.bf16 %v457_v2  ;;  %v2502_v2 = vld [vmem:[%s5045_s10 + $0x30] sm:$0xff] }
 0x146   : > { %v1603_v39 = vpop.f32.mrf.mxu1  ;;  %2020 = vmatmul.mubr.bf16.gmra.mxu1 %v596_v31  ;;  %1834 = vmatprep.mubr.bf16.mxu0 %v605_v32  ;;  %v626_v31 = vunpack.c.l.s8.bf16 %v456_v23  ;;  %v635_v32 = vunpack.c.h.s8.bf16 %v455_v63 }
 0x147   : > { %v5023_v42 = vadd.f32 %v1603_v39, %v1410_v38  ;;  %v1412_v43 = vpop.f32.mrf.mxu0  ;;  %2027 = vmatprep.mubr.bf16.mxu1 %v607_v36  ;;  %v2499_v39 = vld [vmem:[%s5045_s10 + $0x18] sm:$0xff] }
 0x148   : > { %v1605_v46 = vpop.f32.mrf.mxu1  ;;  %2553 = vperm.xlu1 %4390, %v2499_v39  }
 0x149   : > { %v1413_v47 = vpop.f32.mrf.mxu0 }
 0x14a   : > { %v1606_v49 = vpop.f32.mrf.mxu1 }
 0x14b   : > { %v5026_v53 = vadd.f32 %v1606_v49, %v1413_v47  ;;  %v1415_v54 = vpop.f32.mrf.mxu0  ;;  %v465_v47 = vld [vmem:[%s4662_s23 + $0x2a8] sm:$0xff] }
 0x14c   : > { %v1608_v56 = vpop.f32.mrf.mxu1  ;;  %v655_v26 = vunpack.c.h.s8.bf16 %v465_v47 }
 0x14d   : > { %v1418_v57 = vpop.f32.mrf.mxu0  ;;  %1835 = vmatmul.mubr.bf16.gmra.mxu0 %v604_v48  ;;  %v2500_v48 = vld [vmem:[%s5045_s10 + $0x20] sm:$0xff] }
 0x14e   : > { %v1611_v58 = vpop.f32.mrf.mxu1  ;;  %2028 = vmatmul.mubr.bf16.gmra.mxu1 %v606_v1  ;;  %1842 = vmatprep.mubr.bf16.mxu0 %v615_v51  ;;  %v467_v1 = vld [vmem:[%s4662_s23 + $0x2b8] sm:$0xff]  ;;  %v2501_v51 = vld [vmem:[%s5045_s10 + $0x28] sm:$0xff] }
 0x14f   : > { %v5032_v59 = vadd.f32 %v1611_v58, %v1418_v57  ;;  %v1420_v62 = vpop.f32.mrf.mxu0  ;;  %2035 = vmatprep.mubr.bf16.mxu1 %v617_v55  ;;  %2558 = vperm.xlu0 %4389, %v2500_v48   ;;  %v634_v55 = vunpack.c.h.s8.bf16 %v454_v19  ;;  %v636_v57 = vunpack.c.h.s8.bf16 %v456_v23  ;;  %v645_v58 = vunpack.c.l.s8.bf16 %v465_v47  ;;  %v477_v47 = vld [vmem:[%s4662_s23 + $0x308] sm:$0xff] }
 0x150   : > { %v1613_v0 = vpop.f32.mrf.mxu1  ;;  %2563 = vperm.xlu1 %4390, %v2501_v51   ;;  %v2509_v48 = vld [vmem:[%s5045_s10 + $0x68] sm:$0xff] }
 0x151   : > { %v1421_v3 = vpop.f32.mrf.mxu0  ;;  %v647_v0 = vunpack.c.l.s8.bf16 %v467_v1 }
 0x152   : > { %v1614_v6 = vpop.f32.mrf.mxu1 }
 0x153   : > { %v5040_v10 = vadd.f32 %v1614_v6, %v1421_v3  ;;  %v1423_v11 = vpop.f32.mrf.mxu0  ;;  %2568 = vperm.xlu0 %4389, %v2502_v2   ;;  %v2511_v2 = vld [vmem:[%s5045_s10 + $0x78] sm:$0xff] }
 0x154   : > { %v1616_v13 = vpop.f32.mrf.mxu1 }
 0x155   : > { %v1426_v17 = vpop.f32.mrf.mxu0  ;;  %1843 = vmatmul.mubr.bf16.gmra.mxu0 %v614_v4  ;;  %v2503_v4 = vld [vmem:[%s5045_s10 + $0x38] sm:$0xff]  ;;  %v466_v13 = vld [vmem:[%s4662_s23 + $0x2b0] sm:$0xff] }
 0x156   : > { %v1619_v18 = vpop.f32.mrf.mxu1  ;;  %2036 = vmatmul.mubr.bf16.gmra.mxu1 %v616_v8  ;;  %1850 = vmatprep.mubr.bf16.mxu0 %v625_v9  ;;  %v464_v9 = vld [vmem:[%s4662_s23 + $0x2a0] sm:$0xff] }
 0x157   : > { %v5049_v20 = vadd.f32 %v1619_v18, %v1426_v17  ;;  %v1428_v21 = vpop.f32.mrf.mxu0  ;;  %2043 = vmatprep.mubr.bf16.mxu1 %v627_v12  ;;  %2573 = vperm.xlu1 %4390, %v2503_v4   ;;  %v2505_v18 = vld [vmem:[%s5045_s10 + $0x48] sm:$0xff] }
 0x158   : > { %v1621_v24 = vpop.f32.mrf.mxu1  ;;  %2578 = vperm.xlu0 %4389, %v2504_v15   ;;  %v644_v21 = vunpack.c.l.s8.bf16 %v464_v9 }
 0x159   : > { %v1429_v28 = vpop.f32.mrf.mxu0  ;;  %v646_v24 = vunpack.c.l.s8.bf16 %v466_v13 }
 0x15a   : > { %v1622_v30 = vpop.f32.mrf.mxu1 }
 0x15b   : > { %v5054_v35 = vadd.f32 %v1622_v30, %v1429_v28  ;;  %v1431_v36 = vpop.f32.mrf.mxu0  ;;  %2583 = vperm.xlu1 %4390, %v2505_v18   ;;  %v2506_v30 = vld [vmem:[%s5045_s10 + $0x50] sm:$0xff] }
 0x15c   : > { %v1624_v38 = vpop.f32.mrf.mxu1  ;;  %2588 = vperm.xlu0 %4389, %v2506_v30   ;;  %v2514_v30 = vld [vmem:[%s5045_s10 + $0x90] sm:$0xff] }
 0x15d   : > { %v1434_v40 = vpop.f32.mrf.mxu0  ;;  %1851 = vmatmul.mubr.bf16.gmra.mxu0 %v624_v29  ;;  %v657_v29 = vunpack.c.h.s8.bf16 %v467_v1  ;;  %v654_v1 = vunpack.c.h.s8.bf16 %v464_v9 }
 0x15e   : > { %v1627_v43 = vpop.f32.mrf.mxu1  ;;  %2044 = vmatmul.mubr.bf16.gmra.mxu1 %v626_v31  ;;  %1858 = vmatprep.mubr.bf16.mxu0 %v635_v32  ;;  %v2507_v32 = vld [vmem:[%s5045_s10 + $0x58] sm:$0xff] }
 0x15f   : > { %v5057_v45 = vadd.f32 %v1627_v43, %v1434_v40  ;;  %v1436_v46 = vpop.f32.mrf.mxu0  ;;  %2051 = vmatprep.mubr.bf16.mxu1 %v637_v37  ;;  %2593 = vperm.xlu1 %4390, %v2507_v32   ;;  %v475_v40 = vld [vmem:[%s4662_s23 + $0x2f8] sm:$0xff]  ;;  %v2508_v43 = vld [vmem:[%s5045_s10 + $0x60] sm:$0xff] }
 0x160   : > { %v1629_v49 = vpop.f32.mrf.mxu1  ;;  %2598 = vperm.xlu0 %4389, %v2508_v43   ;;  %v2515_v32 = vld [vmem:[%s5045_s10 + $0x98] sm:$0xff]  ;;  %v389_v43 = vld [vmem:[%s4662_s23 + $0x48] sm:$0xff] }
 0x161   : > { %v1437_v54 = vpop.f32.mrf.mxu0 }
 0x162   : > { %v1630_v56 = vpop.f32.mrf.mxu1 }
 0x163   : > { %v5063_v62 = vadd.f32 %v1630_v56, %v1437_v54  ;;  %v1439_v63 = vpop.f32.mrf.mxu0  ;;  %2603 = vperm.xlu1 %4390, %v2509_v48   ;;  %v656_v54 = vunpack.c.h.s8.bf16 %v466_v13  ;;  %v2512_v13 = vld [vmem:[%s5045_s10 + $0x80] sm:$0xff]  ;;  %v2517_v48 = vld [vmem:[%s5045_s10 + $0xa8] sm:$0xff] }
 0x164   : > { %v1632_v3 = vpop.f32.mrf.mxu1  ;;  %v2510_v63 = vld [vmem:[%s5045_s10 + $0x70] sm:$0xff] }
 0x165   : > { %v1442_v6 = vpop.f32.mrf.mxu0  ;;  %1859 = vmatmul.mubr.bf16.gmra.mxu0 %v634_v55  ;;  %v665_v55 = vunpack.c.l.s8.bf16 %v475_v40  ;;  %2608 = vperm.xlu0 %4389, %v2510_v63   ;;  %v2518_v63 = vld [vmem:[%s5045_s10 + $0xb0] sm:$0xff] }
 0x166   : > { %v1635_v8 = vpop.f32.mrf.mxu1  ;;  %2052 = vmatmul.mubr.bf16.gmra.mxu1 %v636_v57  ;;  %1866 = vmatprep.mubr.bf16.mxu0 %v645_v58  ;;  %v667_v58 = vunpack.c.l.s8.bf16 %v477_v47 }
 0x167   : > { %v5068_v11 = vadd.f32 %v1635_v8, %v1442_v6  ;;  %v1444_v12 = vpop.f32.mrf.mxu0  ;;  %2059 = vmatprep.mubr.bf16.mxu1 %v647_v0  ;;  %2613 = vperm.xlu1 %4390, %v2511_v2   ;;  %v474_v6 = vld [vmem:[%s4662_s23 + $0x2f0] sm:$0xff]  ;;  %v2519_v2 = vld [vmem:[%s5045_s10 + $0xb8] sm:$0xff] }
 0x168   : > { %v1637_v17 = vpop.f32.mrf.mxu1  ;;  %v476_v12 = vld [vmem:[%s4662_s23 + $0x300] sm:$0xff] }
 0x169   : > { %v1445_v19 = vpop.f32.mrf.mxu0  ;;  %2618 = vperm.xlu0 %4389, %v2512_v13   ;;  %v2513_v17 = vld [vmem:[%s5045_s10 + $0x88] sm:$0xff]  ;;  %v2520_v13 = vld [vmem:[%s5045_s10 + $0xc0] sm:$0xff] }
 0x16a   : > { %v1638_v23 = vpop.f32.mrf.mxu1 }
 0x16b   : > { %v5073_v27 = vadd.f32 %v1638_v23, %v1445_v19  ;;  %v1447_v28 = vpop.f32.mrf.mxu0  ;;  %v664_v19 = vunpack.c.l.s8.bf16 %v474_v6  ;;  %2623 = vperm.xlu1 %4390, %v2513_v17   ;;  %v666_v23 = vunpack.c.l.s8.bf16 %v476_v12  ;;  %v4471_v17 = vld [vmem:[%s5584_s5 + $0x38] sm:$0xff]  }
 0x16c   : > { %v1640_v31 = vpop.f32.mrf.mxu1  ;;  %4251 = vmatprep.subr.bf16.mxu1 %v4471_v17 }
 0x16d   : > { %v1450_v36 = vpop.f32.mrf.mxu0  ;;  %1867 = vmatmul.mubr.bf16.gmra.mxu0 %v644_v21  ;;  %2628 = vperm.xlu0 %4389, %v2514_v30   ;;  %v2522_v30 = vld [vmem:[%s5045_s10 + $0xd0] sm:$0xff] }
 0x16e   : > { %v1643_v37 = vpop.f32.mrf.mxu1  ;;  %2060 = vmatmul.mubr.bf16.gmra.mxu1 %v646_v24  ;;  %1874 = vmatprep.mubr.bf16.mxu0 %v655_v26  ;;  %v675_v24 = vunpack.c.h.s8.bf16 %v475_v40 }
 0x16f   : > { %v5077_v38 = vadd.f32 %v1643_v37, %v1450_v36  ;;  %v1452_v39 = vpop.f32.mrf.mxu0  ;;  %2067 = vmatprep.mubr.bf16.mxu1 %v657_v29  ;;  %v677_v29 = vunpack.c.h.s8.bf16 %v477_v47  ;;  %2633 = vperm.xlu1 %4390, %v2515_v32   ;;  %v2523_v32 = vld [vmem:[%s5045_s10 + $0xd8] sm:$0xff] }
 0x170   : > { %v1645_v46 = vpop.f32.mrf.mxu1  ;;  %4252 = vmatpush3.bf16.msra.mxu1 %v4471_v17  ;;  %v2528_v17 = vld [vmem:[%s5045_s10 + $0x100] sm:$0xff] }
 0x171   : > { %v1453_v49 = vpop.f32.mrf.mxu0  ;;  %v2516_v46 = vld [vmem:[%s5045_s10 + $0xa0] sm:$0xff] }
 0x172   : > { %v1646_v51 = vpop.f32.mrf.mxu1  ;;  %2638 = vperm.xlu0 %4389, %v2516_v46   ;;  %v399_v46 = vld [vmem:[%s4662_s23 + $0x98] sm:$0xff] }
 0x173   : > { %v5083_v56 = vadd.f32 %v1646_v51, %v1453_v49  ;;  %v1455_v57 = vpop.f32.mrf.mxu0  ;;  %2643 = vperm.xlu1 %4390, %v2517_v48  }
 0x174   : > { %v1648_v0 = vpop.f32.mrf.mxu1 }
 0x175   : > { %v1458_v3 = vpop.f32.mrf.mxu0  ;;  %1875 = vmatmul.mubr.bf16.gmra.mxu0 %v654_v1  ;;  %v674_v1 = vunpack.c.h.s8.bf16 %v474_v6  ;;  %v388_v6 = vld [vmem:[%s4662_s23 + $0x40] sm:$0xff] }
 0x176   : > { %v1651_v4 = vpop.f32.mrf.mxu1  ;;  %2068 = vmatmul.mubr.bf16.gmra.mxu1 %v656_v54  ;;  %1882 = vmatprep.mubr.bf16.mxu0 %v665_v55  ;;  %v676_v54 = vunpack.c.h.s8.bf16 %v476_v12  ;;  %v489_v55 = vunpack.c.l.s8.bf16 %v389_v43 }
 0x177   : > { %v5088_v8 = vadd.f32 %v1651_v4, %v1458_v3  ;;  %v1460_v9 = vpop.f32.mrf.mxu0  ;;  %2075 = vmatprep.mubr.bf16.mxu1 %v667_v58  ;;  %2648 = vperm.xlu0 %4389, %v2518_v63  }
 0x178   : > { %v1653_v15 = vpop.f32.mrf.mxu1  ;;  %2653 = vperm.xlu1 %4390, %v2519_v2  }
 0x179   : > { %v1461_v18 = vpop.f32.mrf.mxu0 }
 0x17a   : > { %v1654_v21 = vpop.f32.mrf.mxu1 }
 0x17b   : > { %v5093_v26 = vadd.f32 %v1654_v21, %v1461_v18  ;;  %v1463_v28 = vpop.f32.mrf.mxu0  ;;  %2658 = vperm.xlu0 %4389, %v2520_v13   ;;  %v2521_v18 = vld [vmem:[%s5045_s10 + $0xc8] sm:$0xff]  ;;  %v488_v21 = vunpack.c.l.s8.bf16 %v388_v6  ;;  %v398_v13 = vld [vmem:[%s4662_s23 + $0x90] sm:$0xff] }
 0x17c   : > { %v1656_v31 = vpop.f32.mrf.mxu1  ;;  %2663 = vperm.xlu1 %4390, %v2521_v18  }
 0x17d   : > { %v1466_v36 = vpop.f32.mrf.mxu0  ;;  %1883 = vmatmul.mubr.bf16.gmra.mxu0 %v664_v19 }
 0x17e   : > { %v1659_v37 = vpop.f32.mrf.mxu1  ;;  %2076 = vmatmul.mubr.bf16.gmra.mxu1 %v666_v23  ;;  %1890 = vmatprep.mubr.bf16.mxu0 %v675_v24  ;;  %v499_v24 = vunpack.c.h.s8.bf16 %v389_v43 }
 0x17f   : > { %v5097_v39 = vadd.f32 %v1659_v37, %v1466_v36  ;;  %v1468_v40 = vpop.f32.mrf.mxu0  ;;  %2083 = vmatprep.mubr.bf16.mxu1 %v677_v29  ;;  %2668 = vperm.xlu0 %4389, %v2522_v30  }
 0x180   : > { %v1661_v47 = vpop.f32.mrf.mxu1  ;;  %2673 = vperm.xlu1 %4390, %v2523_v32   ;;  %v2530_v32 = vld [vmem:[%s5045_s10 + $0x110] sm:$0xff] }
 0x181   : > { %v1469_v49 = vpop.f32.mrf.mxu0  ;;  %v2524_v47 = vld [vmem:[%s5045_s10 + $0xe0] sm:$0xff] }
 0x182   : > { %v1662_v51 = vpop.f32.mrf.mxu1 }
 0x183   : > { %v5102_v57 = vadd.f32 %v1662_v51, %v1469_v49  ;;  %v1471_v58 = vpop.f32.mrf.mxu0  ;;  %2678 = vperm.xlu0 %4389, %v2524_v47   ;;  %v2525_v49 = vld [vmem:[%s5045_s10 + $0xe8] sm:$0xff]  ;;  %v498_v51 = vunpack.c.h.s8.bf16 %v388_v6 }
 0x184   : > { %v1664_v0 = vpop.f32.mrf.mxu1  ;;  %2683 = vperm.xlu1 %4390, %v2525_v49  }
 0x185   : > { %v1474_v3 = vpop.f32.mrf.mxu0  ;;  %1891 = vmatmul.mubr.bf16.gmra.mxu0 %v674_v1  ;;  %v2526_v0 = vld [vmem:[%s5045_s10 + $0xf0] sm:$0xff] }
 0x186   : > { %v1667_v4 = vpop.f32.mrf.mxu1  ;;  %2084 = vmatmul.mubr.bf16.gmra.mxu1 %v676_v54  ;;  %2124 = vmatprep.mubr.bf16.mxu0 %v489_v55  ;;  %v509_v55 = vunpack.c.l.s8.bf16 %v399_v46 }
 0x187   : > { %v5107_v9 = vadd.f32 %v1667_v4, %v1474_v3  ;;  %v1476_v12 = vpop.f32.mrf.mxu0  ;;  %2688 = vperm.xlu0 %4389, %v2526_v0   ;;  %v2527_v3 = vld [vmem:[%s5045_s10 + $0xf8] sm:$0xff]  ;;  %v518_v0 = vunpack.c.h.s8.bf16 %v398_v13 }
 0x188   : > { %v1669_v15 = vpop.f32.mrf.mxu1  ;;  %2693 = vperm.xlu1 %4390, %v2527_v3  }
 0x189   : > { %v1477_v19 = vpop.f32.mrf.mxu0 }
 0x18a   : > { %v1670_v23 = vpop.f32.mrf.mxu1 }
 0x18b   : > { %v5114_v28 = vadd.f32 %v1670_v23, %v1477_v19  ;;  %v1479_v29 = vpop.f32.mrf.mxu0  ;;  %2698 = vperm.xlu0 %4389, %v2528_v17   ;;  %v2529_v19 = vld [vmem:[%s5045_s10 + $0x108] sm:$0xff]  ;;  %v508_v23 = vunpack.c.l.s8.bf16 %v398_v13 }
 0x18c   : > { %v1672_v31 = vpop.f32.mrf.mxu1  ;;  %2703 = vperm.xlu1 %4390, %v2529_v19   ;;  %v519_v29 = vunpack.c.h.s8.bf16 %v399_v46 }
 0x18d   : > { %v1482_v36 = vpop.f32.mrf.mxu0  ;;  %2125 = vmatmul.mubr.bf16.vlgmr.msra.gmra.mxu0 %v488_v21 }
 0x18e   : > { %v1675_v37 = vpop.f32.mrf.mxu1  ;;  %2132 = vmatprep.mubr.bf16.mxu0 %v499_v24 }
 0x18f   : > { %v5118_v40 = vadd.f32 %v1675_v37, %v1482_v36  ;;  %v1484_v43 = vpop.f32.mrf.mxu0  ;;  %2708 = vperm.xlu0 %4389, %v2530_v32   ;;  %v4472_v37 = vld [vmem:[%s5584_s5 + $0x30] sm:$0xff]  }
 0x190   : > { %v1677_v48 = vpop.f32.mrf.mxu1  ;;  %v2531_v43 = vld [vmem:[%s5045_s10 + $0x118] sm:$0xff]  ;;  %4253 = vmatprep.subr.bf16.mxu1 %v4472_v37 }
 0x191   : > { %v1485_v1 = vpop.f32.mrf.mxu0  ;;  %2713 = vperm.xlu1 %4390, %v2531_v43   ;;  %4254 = vmatpush3.bf16.msra.mxu1 %v4472_v37 }
 0x192   : > { %v1678_v54 = vpop.f32.mrf.mxu1 }
 0x193   : > { %v5123_v58 = vadd.f32 %v1678_v54, %v1485_v1  ;;  %v1487_v63 = vpop.f32.mrf.mxu0  ;;  %v409_v1 = vld [vmem:[%s4662_s23 + $0xe8] sm:$0xff] }
 0x194   : > { %v1680_v2 = vpop.f32.mrf.mxu1  ;;  %v529_v3 = vunpack.c.l.s8.bf16 %v409_v1  ;;  %v539_v37 = vunpack.c.h.s8.bf16 %v409_v1 }
 0x195   : > { %v1490_v4 = vpop.f32.mrf.mxu0  ;;  %2133 = vmatmul.mubr.bf16.gmra.mxu0 %v498_v51  ;;  %v2532_v51 = vld [vmem:[%s5045_s10 + $0x120] sm:$0xff] }
 0x196   : > { %v1683_v12 = vpop.f32.mrf.mxu1  ;;  %2140 = vmatprep.mubr.bf16.mxu0 %v509_v55  ;;  %2718 = vperm.xlu0 %4389, %v2532_v51   ;;  %v2533_v55 = vld [vmem:[%s5045_s10 + $0x128] sm:$0xff] }
 0x197   : > { %v5128_v6 = vadd.f32 %v1683_v12, %v1490_v4  ;;  %v1492_v15 = vpop.f32.mrf.mxu0  ;;  %2723 = vperm.xlu1 %4390, %v2533_v55  }
 0x198   : > { %v1685_v18 = vpop.f32.mrf.mxu1  ;;  %v2534_v15 = vld [vmem:[%s5045_s10 + $0x130] sm:$0xff] }
 0x199   : > { %v1493_v21 = vpop.f32.mrf.mxu0  ;;  %v2535_v18 = vld [vmem:[%s5045_s10 + $0x138] sm:$0xff] }
 0x19a   : > { %v1686_v24 = vpop.f32.mrf.mxu1  ;;  %2728 = vperm.xlu0 %4389, %v2534_v15  }
 0x19b   : > { %v5132_v30 = vadd.f32 %v1686_v24, %v1493_v21  ;;  %v1495_v31 = vpop.f32.mrf.mxu0  ;;  %2733 = vperm.xlu1 %4390, %v2535_v18  }
 0x19c   : > { %v1688_v36 = vpop.f32.mrf.mxu1 }
 0x19d   : > { %v1498_v47 = vpop.f32.mrf.mxu0  ;;  %2141 = vmatmul.mubr.bf16.gmra.mxu0 %v508_v23  ;;  %v408_v23 = vld [vmem:[%s4662_s23 + $0xe0] sm:$0xff] }
 0x19e   : > { %v1691_v48 = vpop.f32.mrf.mxu1  ;;  %2148 = vmatprep.mubr.bf16.mxu0 %v519_v29  ;;  %v528_v32 = vunpack.c.l.s8.bf16 %v408_v23 }
 0x19f   : > { %v5139_v46 = vadd.f32 %v1691_v48, %v1498_v47  ;;  %v1500_v49 = vpop.f32.mrf.mxu0 }
 0x1a0   : > { %v1693_v54 = vpop.f32.mrf.mxu1 }
 0x1a1   : > { %v1501_v63 = vpop.f32.mrf.mxu0 }
 0x1a2   : > { %v1694_v2 = vpop.f32.mrf.mxu1 }
 0x1a3   : > { %v5144_v4 = vadd.f32 %v1694_v2, %v1501_v63  ;;  %v1503_v12 = vpop.f32.mrf.mxu0  ;;  %v419_v63 = vld [vmem:[%s4662_s23 + $0x138] sm:$0xff] }
 0x1a4   : > { %v1696_v17 = vpop.f32.mrf.mxu1  ;;  %v538_v12 = vunpack.c.h.s8.bf16 %v408_v23  ;;  %v549_v18 = vunpack.c.l.s8.bf16 %v419_v63 }
 0x1a5   : > { %v1506_v19 = vpop.f32.mrf.mxu0  ;;  %2149 = vmatmul.mubr.bf16.gmra.mxu0 %v518_v0 }
 0x1a6   : > { %v1699_v21 = vpop.f32.mrf.mxu1  ;;  %2156 = vmatprep.mubr.bf16.mxu0 %v529_v3  ;;  %v4473_v3 = vld [vmem:[%s5584_s5 + $0x28] sm:$0xff]  }
 0x1a7   : > { %v5149_v24 = vadd.f32 %v1699_v21, %v1506_v19  ;;  %v1508_v13 = vpop.f32.mrf.mxu0  ;;  %4255 = vmatprep.subr.bf16.mxu1 %v4473_v3 }
 0x1a8   : > { %v1701_v29 = vpop.f32.mrf.mxu1  ;;  %4256 = vmatpush3.bf16.msra.mxu1 %v4473_v3 }
 0x1a9   : > { %v1509_v31 = vpop.f32.mrf.mxu0 }
 0x1aa   : > { %v1702_v36 = vpop.f32.mrf.mxu1 }
 0x1ab   : > { %v5151_v43 = vadd.f32 %v1702_v36, %v1509_v31  ;;  %v1511_v47 = vpop.f32.mrf.mxu0 }
 0x1ac   : > { %v1704_v48 = vpop.f32.mrf.mxu1 }
 0x1ad   : > { %v1740_v49 = vpop.f32.mrf.mxu0  ;;  %2157 = vmatmul.mubr.bf16.gmra.mxu0 %v528_v32  ;;  %v418_v32 = vld [vmem:[%s4662_s23 + $0x130] sm:$0xff] }
 0x1ae   : > { %v1741_v51 = vadd.f32 %v1740_v49, %v4952_v41  ;;  %v1933_v54 = vpop.f32.mrf.mxu1  ;;  %2164 = vmatprep.mubr.bf16.mxu0 %v539_v37  ;;  %v548_v47 = vunpack.c.l.s8.bf16 %v418_v32 }
 0x1af   : > { %v1742_v55 = vpop.f32.mrf.mxu0 }
 0x1b0   : > { %v5155_v0 = vadd.f32 %v1933_v54, %v1741_v51  ;;  %v1935_v2 = vpop.f32.mrf.mxu1  ;;  %v559_v51 = vunpack.c.h.s8.bf16 %v419_v63 }
 0x1b1   : > { %v1743_v1 = vpop.f32.mrf.mxu0 }
 0x1b2   : > { %v1744_v15 = vadd.f32 %v1743_v1, %v4960_v52  ;;  %v1936_v17 = vpop.f32.mrf.mxu1 }
 0x1b3   : > { %v1745_v41 = vpop.f32.mrf.mxu0 }
 0x1b4   : > { %v5161_v19 = vadd.f32 %v1936_v17, %v1744_v15  ;;  %v1938_v21 = vpop.f32.mrf.mxu1  ;;  %v429_v15 = vld [vmem:[%s4662_s23 + $0x188] sm:$0xff] }
 0x1b5   : > { %v1748_v13 = vpop.f32.mrf.mxu0  ;;  %2165 = vmatmul.mubr.bf16.gmra.mxu0 %v538_v12 }
 0x1b6   : > { %v1749_v29 = vadd.f32 %v1748_v13, %v4967_v60  ;;  %v1941_v31 = vpop.f32.mrf.mxu1  ;;  %2172 = vmatprep.mubr.bf16.mxu0 %v549_v18  ;;  %v569_v13 = vunpack.c.l.s8.bf16 %v429_v15 }
 0x1b7   : > { %v1750_v36 = vpop.f32.mrf.mxu0 }
 0x1b8   : > { %v5165_v37 = vadd.f32 %v1941_v31, %v1749_v29  ;;  %v1943_v52 = vpop.f32.mrf.mxu1 }
 0x1b9   : > { %v1751_v23 = vpop.f32.mrf.mxu0 }
 0x1ba   : > { %v1752_v48 = vadd.f32 %v1751_v23, %v4974_v7  ;;  %v1944_v49 = vpop.f32.mrf.mxu1  ;;  %v558_v7 = vunpack.c.h.s8.bf16 %v418_v32 }
 0x1bb   : > { %v1753_v54 = vpop.f32.mrf.mxu0 }
 0x1bc   : > { %v5168_v55 = vadd.f32 %v1944_v49, %v1752_v48  ;;  %v1946_v2 = vpop.f32.mrf.mxu1  ;;  %v428_v48 = vld [vmem:[%s4662_s23 + $0x180] sm:$0xff] }
 0x1bd   : > { %v1756_v3 = vpop.f32.mrf.mxu0  ;;  %2173 = vmatmul.mubr.bf16.gmra.mxu0 %v548_v47  ;;  %v568_v54 = vunpack.c.l.s8.bf16 %v428_v48 }
 0x1be   : > { %v1757_v60 = vadd.f32 %v1756_v3, %v4980_v14  ;;  %v1949_v1 = vpop.f32.mrf.mxu1  ;;  %2180 = vmatprep.mubr.bf16.mxu0 %v559_v51  ;;  %v4474_v14 = vld [vmem:[%s5584_s5 + $0x20] sm:$0xff]  }
 0x1bf   : > { %v1758_v12 = vpop.f32.mrf.mxu0  ;;  %4257 = vmatprep.subr.bf16.mxu1 %v4474_v14 }
 0x1c0   : > { %v5172_v17 = vadd.f32 %v1949_v1, %v1757_v60  ;;  %v1951_v18 = vpop.f32.mrf.mxu1  ;;  %4258 = vmatpush3.bf16.msra.mxu1 %v4474_v14  ;;  %v579_v60 = vunpack.c.h.s8.bf16 %v429_v15 }
 0x1c1   : > { %v1759_v41 = vpop.f32.mrf.mxu0 }
 0x1c2   : > { %v1760_v63 = vadd.f32 %v1759_v41, %v4988_v25  ;;  %v1952_v21 = vpop.f32.mrf.mxu1 }
 0x1c3   : > { %v1761_v29 = vpop.f32.mrf.mxu0 }
 0x1c4   : > { %v5175_v31 = vadd.f32 %v1952_v21, %v1760_v63  ;;  %v1954_v36 = vpop.f32.mrf.mxu1  ;;  %v439_v21 = vld [vmem:[%s4662_s23 + $0x1d8] sm:$0xff] }
 0x1c5   : > { %v1764_v52 = vpop.f32.mrf.mxu0  ;;  %2181 = vmatmul.mubr.bf16.gmra.mxu0 %v558_v7  ;;  %v578_v36 = vunpack.c.h.s8.bf16 %v428_v48 }
 0x1c6   : > { %v1765_v23 = vadd.f32 %v1764_v52, %v4995_v33  ;;  %v1957_v47 = vpop.f32.mrf.mxu1  ;;  %2188 = vmatprep.mubr.bf16.mxu0 %v569_v13  ;;  %v4475_v13 = vld [vmem:[%s5584_s5 + $0x18] sm:$0xff]  }
 0x1c7   : > { %v1766_v32 = vpop.f32.mrf.mxu0  ;;  %4259 = vmatprep.subr.bf16.mxu1 %v4475_v13 }
 0x1c8   : > { %v5182_v25 = vadd.f32 %v1957_v47, %v1765_v23  ;;  %v1959_v49 = vpop.f32.mrf.mxu1  ;;  %v589_v23 = vunpack.c.l.s8.bf16 %v439_v21  ;;  %4260 = vmatpush3.bf16.msra.mxu1 %v4475_v13  ;;  %v4476_v47 = vld [vmem:[%s5584_s5 + $0x10] sm:$0xff]   ;;  %v4478_v13 = vld [vmem:[%s5584_s5] sm:$0xff]  }
 0x1c9   : > { %v1767_v51 = vpop.f32.mrf.mxu0  ;;  %4261 = vmatprep.subr.bf16.mxu1 %v4476_v47 }
 0x1ca   : > { %v1768_v2 = vadd.f32 %v1767_v51, %v5002_v44  ;;  %v1960_v3 = vpop.f32.mrf.mxu1 }
 0x1cb   : > { %v1769_v1 = vpop.f32.mrf.mxu0 }
 0x1cc   : > { %v5185_v12 = vadd.f32 %v1960_v3, %v1768_v2  ;;  %v1962_v33 = vpop.f32.mrf.mxu1  ;;  %v438_v2 = vld [vmem:[%s4662_s23 + $0x1d0] sm:$0xff]  ;;  %4262 = vmatpush3.bf16.msra.mxu1 %v4476_v47  ;;  %v4477_v3 = vld [vmem:[%s5584_s5 + $0x8] sm:$0xff]  }
 0x1cd   : > { %v1772_v18 = vpop.f32.mrf.mxu0  ;;  %2189 = vmatmul.mubr.bf16.gmra.mxu0 %v568_v54  ;;  %4263 = vmatprep.subr.bf16.mxu1 %v4477_v3 }
 0x1ce   : > { %v1773_v41 = vadd.f32 %v1772_v18, %v5004_v50  ;;  %v1965_v7 = vpop.f32.mrf.mxu1  ;;  %2196 = vmatprep.mubr.bf16.mxu0 %v579_v60  ;;  %v588_v18 = vunpack.c.l.s8.bf16 %v438_v2 }
 0x1cf   : > { %v1774_v63 = vpop.f32.mrf.mxu0 }
 0x1d0   : > { %v5192_v29 = vadd.f32 %v1965_v7, %v1773_v41  ;;  %v1967_v44 = vpop.f32.mrf.mxu1  ;;  %4264 = vmatpush3.bf16.msra.mxu1 %v4477_v3 }
 0x1d1   : > { %v1775_v15 = vpop.f32.mrf.mxu0  ;;  %4265 = vmatprep.subr.bf16.mxu1 %v4478_v13 }
 0x1d2   : > { %v1776_v14 = vadd.f32 %v1775_v15, %v5008_v61  ;;  %v1968_v52 = vpop.f32.mrf.mxu1 }
 0x1d3   : > { %v1777_v50 = vpop.f32.mrf.mxu0 }
 0x1d4   : > { %v5198_v32 = vadd.f32 %v1968_v52, %v1776_v14  ;;  %v1970_v49 = vpop.f32.mrf.mxu1  ;;  %4266 = vmatpush3.bf16.msra.mxu1 %v4478_v13 }
 0x1d5   : > { %v1780_v51 = vpop.f32.mrf.mxu0  ;;  %2197 = vmatmul.mubr.bf16.gmra.mxu0 %v578_v36  ;;  %v598_v49 = vunpack.c.h.s8.bf16 %v438_v2 }
 0x1d6   : > { %v1781_v48 = vadd.f32 %v1780_v51, %v5011_v5  ;;  %v1973_v54 = vpop.f32.mrf.mxu1  ;;  %2204 = vmatprep.mubr.bf16.mxu0 %v589_v23  ;;  %v599_v5 = vunpack.c.h.s8.bf16 %v439_v21  ;;  %v449_v23 = vld [vmem:[%s4662_s23 + $0x228] sm:$0xff] }
 0x1d7   : > { %v1782_v61 = vpop.f32.mrf.mxu0 }
 0x1d8   : > { %v5205_v60 = vadd.f32 %v1973_v54, %v1781_v48  ;;  %v1975_v1 = vpop.f32.mrf.mxu1  ;;  %v609_v54 = vunpack.c.l.s8.bf16 %v449_v23 }
 0x1d9   : > { %v1783_v33 = vpop.f32.mrf.mxu0 }
 0x1da   : > { %v1784_v41 = vadd.f32 %v1783_v33, %v5014_v16  ;;  %v1976_v7 = vpop.f32.mrf.mxu1 }
 0x1db   : > { %v1785_v63 = vpop.f32.mrf.mxu0 }
 0x1dc   : > { %v5211_v44 = vadd.f32 %v1976_v7, %v1784_v41  ;;  %v1978_v15 = vpop.f32.mrf.mxu1  ;;  %v448_v41 = vld [vmem:[%s4662_s23 + $0x220] sm:$0xff] }
 0x1dd   : > { %v1788_v36 = vpop.f32.mrf.mxu0  ;;  %2205 = vmatmul.mubr.bf16.gmra.mxu0 %v588_v18 }
 0x1de   : > { %v1789_v14 = vadd.f32 %v1788_v36, %v5016_v22  ;;  %v1981_v52 = vpop.f32.mrf.mxu1  ;;  %2212 = vmatprep.mubr.bf16.mxu0 %v599_v5  ;;  %v619_v36 = vunpack.c.h.s8.bf16 %v449_v23 }
 0x1df   : > { %v1790_v16 = vpop.f32.mrf.mxu0 }
 0x1e0   : > { %v5215_v21 = vadd.f32 %v1981_v52, %v1789_v14  ;;  %v1983_v50 = vpop.f32.mrf.mxu1 }
 0x1e1   : > { %v1791_v47 = vpop.f32.mrf.mxu0 }
 0x1e2   : > { %v1792_v51 = vadd.f32 %v1791_v47, %v5020_v34  ;;  %v1984_v48 = vpop.f32.mrf.mxu1  ;;  %v608_v34 = vunpack.c.l.s8.bf16 %v448_v41 }
 0x1e3   : > { %v1793_v61 = vpop.f32.mrf.mxu0 }
 0x1e4   : > { %v5218_v3 = vadd.f32 %v1984_v48, %v1792_v51  ;;  %v1986_v1 = vpop.f32.mrf.mxu1  ;;  %v459_v51 = vld [vmem:[%s4662_s23 + $0x278] sm:$0xff] }
 0x1e5   : > { %v1796_v22 = vpop.f32.mrf.mxu0  ;;  %2213 = vmatmul.mubr.bf16.gmra.mxu0 %v598_v49 }
 0x1e6   : > { %v1797_v33 = vadd.f32 %v1796_v22, %v5023_v42  ;;  %v1989_v18 = vpop.f32.mrf.mxu1  ;;  %2220 = vmatprep.mubr.bf16.mxu0 %v609_v54  ;;  %v629_v22 = vunpack.c.l.s8.bf16 %v459_v51 }
 0x1e7   : > { %v1798_v7 = vpop.f32.mrf.mxu0 }
 0x1e8   : > { %v5222_v5 = vadd.f32 %v1989_v18, %v1797_v33  ;;  %v1991_v2 = vpop.f32.mrf.mxu1 }
 0x1e9   : > { %v1799_v63 = vpop.f32.mrf.mxu0 }
 0x1ea   : > { %v1800_v13 = vadd.f32 %v1799_v63, %v5026_v53  ;;  %v1992_v15 = vpop.f32.mrf.mxu1  ;;  %v618_v53 = vunpack.c.h.s8.bf16 %v448_v41 }
 0x1eb   : > { %v1801_v14 = vpop.f32.mrf.mxu0 }
 0x1ec   : > { %v5225_v52 = vadd.f32 %v1992_v15, %v1800_v13  ;;  %v1994_v16 = vpop.f32.mrf.mxu1 }
 0x1ed   : > { %v1804_v50 = vpop.f32.mrf.mxu0  ;;  %2221 = vmatmul.mubr.bf16.gmra.mxu0 %v608_v34  ;;  %v458_v34 = vld [vmem:[%s4662_s23 + $0x270] sm:$0xff] }
 0x1ee   : > { %v1805_v42 = vadd.f32 %v1804_v50, %v5032_v59  ;;  %v1997_v47 = vpop.f32.mrf.mxu1  ;;  %2228 = vmatprep.mubr.bf16.mxu0 %v619_v36  ;;  %v639_v50 = vunpack.c.h.s8.bf16 %v459_v51 }
 0x1ef   : > { %v1806_v49 = vpop.f32.mrf.mxu0 }
 0x1f0   : > { %v5229_v48 = vadd.f32 %v1997_v47, %v1805_v42  ;;  %v1999_v54 = vpop.f32.mrf.mxu1 }
 0x1f1   : > { %v1807_v61 = vpop.f32.mrf.mxu0 }
 0x1f2   : > { %v1808_v23 = vadd.f32 %v1807_v61, %v5040_v10  ;;  %v2000_v1 = vpop.f32.mrf.mxu1  ;;  %v628_v10 = vunpack.c.l.s8.bf16 %v458_v34 }
 0x1f3   : > { %v1809_v33 = vpop.f32.mrf.mxu0 }
 0x1f4   : > { %v5232_v18 = vadd.f32 %v2000_v1, %v1808_v23  ;;  %v2002_v7 = vpop.f32.mrf.mxu1  ;;  %v469_v23 = vld [vmem:[%s4662_s23 + $0x2c8] sm:$0xff] }
 0x1f5   : > { %v1812_v2 = vpop.f32.mrf.mxu0  ;;  %2229 = vmatmul.mubr.bf16.gmra.mxu0 %v618_v53 }
 0x1f6   : > { %v1813_v59 = vadd.f32 %v1812_v2, %v5049_v20  ;;  %v2005_v63 = vpop.f32.mrf.mxu1  ;;  %2236 = vmatprep.mubr.bf16.mxu0 %v629_v22  ;;  %v649_v2 = vunpack.c.l.s8.bf16 %v469_v23 }
 0x1f7   : > { %v1814_v13 = vpop.f32.mrf.mxu0 }
 0x1f8   : > { %v5236_v15 = vadd.f32 %v2005_v63, %v1813_v59  ;;  %v2007_v41 = vpop.f32.mrf.mxu1 }
 0x1f9   : > { %v1815_v36 = vpop.f32.mrf.mxu0 }
 0x1fa   : > { %v1816_v14 = vadd.f32 %v1815_v36, %v5054_v35  ;;  %v2008_v16 = vpop.f32.mrf.mxu1  ;;  %v638_v35 = vunpack.c.h.s8.bf16 %v458_v34 }
 0x1fb   : > { %v1817_v42 = vpop.f32.mrf.mxu0 }
 0x1fc   : > { %v5239_v47 = vadd.f32 %v2008_v16, %v1816_v14  ;;  %v2010_v49 = vpop.f32.mrf.mxu1 }
 0x1fd   : > { %v1820_v54 = vpop.f32.mrf.mxu0  ;;  %2237 = vmatmul.mubr.bf16.gmra.mxu0 %v628_v10  ;;  %v468_v10 = vld [vmem:[%s4662_s23 + $0x2c0] sm:$0xff] }
 0x1fe   : > { %v1821_v20 = vadd.f32 %v1820_v54, %v5057_v45  ;;  %v2013_v61 = vpop.f32.mrf.mxu1  ;;  %2244 = vmatprep.mubr.bf16.mxu0 %v639_v50  ;;  %v659_v54 = vunpack.c.h.s8.bf16 %v469_v23 }
 0x1ff   : > { %v1822_v53 = vpop.f32.mrf.mxu0 }
 0x200   : > { %v5243_v1 = vadd.f32 %v2013_v61, %v1821_v20  ;;  %v2015_v22 = vpop.f32.mrf.mxu1 }
 0x201   : > { %v1823_v33 = vpop.f32.mrf.mxu0 }
 0x202   : > { %v1824_v51 = vadd.f32 %v1823_v33, %v5063_v62  ;;  %v2016_v7 = vpop.f32.mrf.mxu1  ;;  %v648_v62 = vunpack.c.l.s8.bf16 %v468_v10 }
 0x203   : > { %v1825_v59 = vpop.f32.mrf.mxu0 }
 0x204   : > { %v5246_v63 = vadd.f32 %v2016_v7, %v1824_v51  ;;  %v2018_v13 = vpop.f32.mrf.mxu1  ;;  %v479_v51 = vld [vmem:[%s4662_s23 + $0x318] sm:$0xff] }
 0x205   : > { %v1828_v41 = vpop.f32.mrf.mxu0  ;;  %2245 = vmatmul.mubr.bf16.gmra.mxu0 %v638_v35 }
 0x206   : > { %v1829_v45 = vadd.f32 %v1828_v41, %v5068_v11  ;;  %v2021_v36 = vpop.f32.mrf.mxu1  ;;  %2252 = vmatprep.mubr.bf16.mxu0 %v649_v2  ;;  %v669_v41 = vunpack.c.l.s8.bf16 %v479_v51 }
 0x207   : > { %v1830_v14 = vpop.f32.mrf.mxu0 }
 0x208   : > { %v5250_v16 = vadd.f32 %v2021_v36, %v1829_v45  ;;  %v2023_v34 = vpop.f32.mrf.mxu1 }
 0x209   : > { %v1831_v50 = vpop.f32.mrf.mxu0 }
 0x20a   : > { %v1832_v42 = vadd.f32 %v1831_v50, %v5073_v27  ;;  %v2024_v49 = vpop.f32.mrf.mxu1  ;;  %v658_v27 = vunpack.c.h.s8.bf16 %v468_v10 }
 0x20b   : > { %v1833_v20 = vpop.f32.mrf.mxu0 }
 0x20c   : > { %v5253_v61 = vadd.f32 %v2024_v49, %v1832_v42  ;;  %v2026_v53 = vpop.f32.mrf.mxu1 }
 0x20d   : > { %v1836_v22 = vpop.f32.mrf.mxu0  ;;  %2253 = vmatmul.mubr.bf16.gmra.mxu0 %v648_v62  ;;  %v478_v62 = vld [vmem:[%s4662_s23 + $0x310] sm:$0xff] }
 0x20e   : > { %v1837_v11 = vadd.f32 %v1836_v22, %v5077_v38  ;;  %v2029_v33 = vpop.f32.mrf.mxu1  ;;  %2260 = vmatprep.mubr.bf16.mxu0 %v659_v54  ;;  %v668_v20 = vunpack.c.l.s8.bf16 %v478_v62  ;;  %v679_v22 = vunpack.c.h.s8.bf16 %v479_v51 }
 0x20f   : > { %v1838_v35 = vpop.f32.mrf.mxu0 }
 0x210   : > { %v5257_v7 = vadd.f32 %v2029_v33, %v1837_v11  ;;  %v2031_v2 = vpop.f32.mrf.mxu1 }
 0x211   : > { %v1839_v59 = vpop.f32.mrf.mxu0 }
 0x212   : > { %v1840_v23 = vadd.f32 %v1839_v59, %v5083_v56  ;;  %v2032_v13 = vpop.f32.mrf.mxu1 }
 0x213   : > { %v1841_v45 = vpop.f32.mrf.mxu0 }
 0x214   : > { %v5260_v36 = vadd.f32 %v2032_v13, %v1840_v23  ;;  %v2034_v14 = vpop.f32.mrf.mxu1  ;;  %v678_v45 = vunpack.c.h.s8.bf16 %v478_v62  ;;  %v5281_v62 = vld [vmem:[%s5583_s4 + $0x38] sm:$0xff]  }
 0x215   : > { %v1844_v34 = vpop.f32.mrf.mxu0  ;;  %2261 = vmatmul.mubr.bf16.gmra.mxu0 %v658_v27  ;;  %4307 = vmatprep.subr.bf16.mxu1 %v5281_v62 }
 0x216   : > { %v1845_v38 = vadd.f32 %v1844_v34, %v5088_v8  ;;  %v2037_v50 = vpop.f32.mrf.mxu1  ;;  %2268 = vmatprep.mubr.bf16.mxu0 %v669_v41 }
 0x217   : > { %v1846_v42 = vpop.f32.mrf.mxu0 }
 0x218   : > { %v5264_v49 = vadd.f32 %v2037_v50, %v1845_v38  ;;  %v2039_v54 = vpop.f32.mrf.mxu1 }
 0x219   : > { %v1847_v10 = vpop.f32.mrf.mxu0 }
 0x21a   : > { %v1848_v56 = vadd.f32 %v1847_v10, %v5093_v26  ;;  %v2040_v53 = vpop.f32.mrf.mxu1 }
 0x21b   : > { %v1849_v11 = vpop.f32.mrf.mxu0 }
 0x21c   : > { %v5267_v33 = vadd.f32 %v2040_v53, %v1848_v56  ;;  %v2042_v35 = vpop.f32.mrf.mxu1 }
 0x21d   : > { %v1852_v2 = vpop.f32.mrf.mxu0  ;;  %2269 = vmatmul.mubr.bf16.gmra.mxu0 %v668_v20 }
 0x21e   : > { %v1853_v8 = vadd.f32 %v1852_v2, %v5097_v39  ;;  %v2045_v59 = vpop.f32.mrf.mxu1  ;;  %2276 = vmatprep.mubr.bf16.mxu0 %v679_v22 }
 0x21f   : > { %v1854_v27 = vpop.f32.mrf.mxu0 }
 0x220   : > { %v5270_v23 = vadd.f32 %v2045_v59, %v1853_v8  ;;  %v2047_v13 = vpop.f32.mrf.mxu1 }
 0x221   : > { %v1855_v41 = vpop.f32.mrf.mxu0 }
 0x222   : > { %v1856_v26 = vadd.f32 %v1855_v41, %v5102_v57  ;;  %v2048_v14 = vpop.f32.mrf.mxu1 }
 0x223   : > { %v1857_v51 = vpop.f32.mrf.mxu0 }
 0x224   : > { %v5273_v34 = vadd.f32 %v2048_v14, %v1856_v26  ;;  %v2050_v38 = vpop.f32.mrf.mxu1 }
 0x225   : > { %v1860_v50 = vpop.f32.mrf.mxu0  ;;  %2277 = vmatmul.mubr.bf16.gmra.mxu0 %v678_v45 }
 0x226   : > { %v1861_v42 = vadd.f32 %v1860_v50, %v5107_v9  ;;  %v2053_v39 = vpop.f32.mrf.mxu1 }
 0x227   : > { %v1862_v54 = vpop.f32.mrf.mxu0 }
 0x228   : > { %v5276_v10 = vadd.f32 %v2053_v39, %v1861_v42  ;;  %v2055_v20 = vpop.f32.mrf.mxu1 }
 0x229   : > { %v1863_v57 = vpop.f32.mrf.mxu0 }
 0x22a   : > { %v1864_v56 = vadd.f32 %v1863_v57, %v5114_v28  ;;  %v2056_v53 = vpop.f32.mrf.mxu1 }
 0x22b   : > { %v1865_v22 = vpop.f32.mrf.mxu0 }
 0x22c   : > { %v5285_v11 = vadd.f32 %v2056_v53, %v1864_v56  ;;  %v2058_v9 = vpop.f32.mrf.mxu1 }
 0x22d   : > { %v1868_v35 = vpop.f32.mrf.mxu0 }
 0x22e   : > { %v1869_v2 = vadd.f32 %v1868_v35, %v5118_v40  ;;  %v2061_v8 = vpop.f32.mrf.mxu1 }
 0x22f   : > { %v1870_v59 = vpop.f32.mrf.mxu0 }
 0x230   : > { %v5288_v27 = vadd.f32 %v2061_v8, %v1869_v2  ;;  %v2063_v13 = vpop.f32.mrf.mxu1 }
 0x231   : > { %v1871_v41 = vpop.f32.mrf.mxu0 }
 0x232   : > { %v1872_v45 = vadd.f32 %v1871_v41, %v5123_v58  ;;  %v2064_v26 = vpop.f32.mrf.mxu1 }
 0x233   : > { %v1873_v28 = vpop.f32.mrf.mxu0 }
 0x234   : > { %v5291_v14 = vadd.f32 %v2064_v26, %v1872_v45  ;;  %v2066_v51 = vpop.f32.mrf.mxu1 }
 0x235   : > { %v1876_v38 = vpop.f32.mrf.mxu0 }
 0x236   : > { %v1877_v50 = vadd.f32 %v1876_v38, %v5128_v6  ;;  %v2069_v42 = vpop.f32.mrf.mxu1 }
 0x237   : > { %v1878_v39 = vpop.f32.mrf.mxu0 }
 0x238   : > { %v5294_v54 = vadd.f32 %v2069_v42, %v1877_v50  ;;  %v2071_v40 = vpop.f32.mrf.mxu1 }
 0x239   : > { %v1879_v20 = vpop.f32.mrf.mxu0 }
 0x23a   : > { %v1880_v57 = vadd.f32 %v1879_v20, %v5132_v30  ;;  %v2072_v56 = vpop.f32.mrf.mxu1 }
 0x23b   : > { %v1881_v53 = vpop.f32.mrf.mxu0 }
 0x23c   : > { %v5297_v22 = vadd.f32 %v2072_v56, %v1880_v57  ;;  %v2074_v58 = vpop.f32.mrf.mxu1  ;;  %v2539_v53 = vpop.permute.xlu0 %2538 }
 0x23d   : > { %v1884_v9 = vpop.f32.mrf.mxu0 }
 0x23e   : > { %v1885_v35 = vadd.f32 %v1884_v9, %v5139_v46  ;;  %v2077_v2 = vpop.f32.mrf.mxu1 }
 0x23f   : > { %v1886_v8 = vpop.f32.mrf.mxu0 }
 0x240   : > { %v5300_v59 = vadd.f32 %v2077_v2, %v1885_v35  ;;  %v2079_v6 = vpop.f32.mrf.mxu1 }
 0x241   : > { %v1887_v13 = vpop.f32.mrf.mxu0 }
 0x242   : > { %v1888_v41 = vadd.f32 %v1887_v13, %v5144_v4  ;;  %v2080_v45 = vpop.f32.mrf.mxu1 }
 0x243   : > { %v1889_v26 = vpop.f32.mrf.mxu0 }
 0x244   : > { %v5303_v28 = vadd.f32 %v2080_v45, %v1888_v41  ;;  %v2082_v30 = vpop.f32.mrf.mxu1  ;;  %v2549_v26 = vpop.permute.xlu1 %2548 }
 0x245   : > { %v1892_v51 = vpop.f32.mrf.mxu0 }
 0x246   : > { %v1893_v38 = vadd.f32 %v1892_v51, %v5149_v24  ;;  %v2085_v50 = vpop.f32.mrf.mxu1  ;;  %v2544_v24 = vpop.permute.xlu0 %2543 }
 0x247   : > { %v1894_v42 = vpop.f32.mrf.mxu0 }
 0x248   : > { %v5306_v39 = vadd.f32 %v2085_v50, %v1893_v38  ;;  %v2087_v46 = vpop.f32.mrf.mxu1 }
 0x249   : > { %v1895_v40 = vpop.f32.mrf.mxu0  ;;  %v2554_v46 = vpop.permute.xlu1 %2553 }
 0x24a   : > { %v1896_v20 = vadd.f32 %v1895_v40, %v5151_v43  ;;  %v2088_v57 = vpop.f32.mrf.mxu1 }
 0x24b   : > { %v1897_v56 = vpop.f32.mrf.mxu0 }
 0x24c   : > { %v5309_v4 = vadd.f32 %v2088_v57, %v1896_v20  ;;  %v2090_v58 = vpop.f32.mrf.mxu1 }
 0x24d   : > { %v2126_v9 = vpop.f32.mrf.mxu0 }
 0x24e   : > { %v2127_v2 = vadd.f32 %v2126_v9, %v5155_v0 }
 0x24f   : > { %v2128_v35 = vpop.f32.mrf.mxu0 }
 0x250   : > { %v2736_v41 = vmul.f32 %v2539_v53, %v2127_v2  ;;  %v4481_v35 = vld [vmem:[%s5583_s4 + $0x28] sm:$0xff]   ;;  %v2564_v2 = vpop.permute.xlu1 %2563 }
 0x251   : > { %v2129_v8 = vpop.f32.mrf.mxu0 }
 0x252   : > { %v2130_v6 = vadd.f32 %v2129_v8, %v5161_v19  ;;  %v4480_v19 = vld [vmem:[%s5583_s4 + $0x30] sm:$0xff]  }
 0x253   : > { %v2131_v13 = vpop.f32.mrf.mxu0 }
 0x254   : > { %v2737_v45 = vmul.f32 %v2544_v24, %v2130_v6 }
 0x255   : > { %v2134_v30 = vpop.f32.mrf.mxu0 }
 0x256   : > { %v2776_v43 = vpack.c.bf16 %v2737_v45, %v2736_v41  ;;  %v2135_v38 = vadd.f32 %v2134_v30, %v5165_v37  ;;  %v2559_v37 = vpop.permute.xlu0 %2558 }
 0x257   : > { %v2136_v51 = vpop.f32.mrf.mxu0 }
 0x258   : > { %4267 = vmatprep.mubr.bf16.mxu1 %v2776_v43  ;;  %v2738_v0 = vmul.f32 %v2549_v26, %v2135_v38  ;;  %v4483_v43 = vld [vmem:[%s5583_s4 + $0x18] sm:$0xff]   ;;  %v2574_v51 = vpop.permute.xlu1 %2573 }
 0x259   : > { %v2137_v50 = vpop.f32.mrf.mxu0 }
 0x25a   : > { %v2138_v42 = vadd.f32 %v2137_v50, %v5168_v55  ;;  %v2569_v26 = vpop.permute.xlu0 %2568 }
 0x25b   : > { %v2139_v40 = vpop.f32.mrf.mxu0 }
 0x25c   : > { %v2739_v20 = vmul.f32 %v2554_v46, %v2138_v42  ;;  %v4484_v40 = vld [vmem:[%s5583_s4 + $0x10] sm:$0xff]  }
 0x25d   : > { %v2142_v57 = vpop.f32.mrf.mxu0 }
 0x25e   : > { %v2777_v56 = vpack.c.bf16 %v2739_v20, %v2738_v0  ;;  %v2143_v58 = vadd.f32 %v2142_v57, %v5172_v17  ;;  %v4482_v17 = vld [vmem:[%s5583_s4 + $0x20] sm:$0xff]   ;;  %v2579_v57 = vpop.permute.xlu0 %2578 }
 0x25f   : > { %v2144_v53 = vpop.f32.mrf.mxu0 }
 0x260   : > { %4268 = vmatmul.mubr.bf16.vlgmr.msra.gmra.mxu1 %v2777_v56  ;;  %v2740_v24 = vmul.f32 %v2559_v37, %v2143_v58  ;;  %v2584_v53 = vpop.permute.xlu1 %2583 }
 0x261   : > { %v2145_v9 = vpop.f32.mrf.mxu0  ;;  %4308 = vmatpush3.bf16.msra.mxu1 %v5281_v62 }
 0x262   : > { %v2146_v55 = vadd.f32 %v2145_v9, %v5175_v31  ;;  %4309 = vmatprep.subr.bf16.mxu1 %v4480_v19 }
 0x263   : > { %v2147_v8 = vpop.f32.mrf.mxu0 }
 0x264   : > { %v2741_v6 = vmul.f32 %v2564_v2, %v2146_v55 }
 0x265   : > { %v2150_v13 = vpop.f32.mrf.mxu0  ;;  %4310 = vmatpush3.bf16.msra.mxu1 %v4480_v19  ;;  %v4485_v19 = vld [vmem:[%s5583_s4 + $0x8] sm:$0xff]  }
 0x266   : > { %v2778_v41 = vpack.c.bf16 %v2741_v6, %v2740_v24  ;;  %4311 = vmatprep.subr.bf16.mxu1 %v4481_v35  ;;  %v2151_v31 = vadd.f32 %v2150_v13, %v5182_v25  ;;  %v2589_v24 = vpop.permute.xlu0 %2588  ;;  %v2594_v13 = vpop.permute.xlu1 %2593 }
 0x267   : > { %v2152_v62 = vpop.f32.mrf.mxu0 }
 0x268   : > { %4271 = vmatprep.mubr.bf16.mxu1 %v2778_v41  ;;  %v2742_v50 = vmul.f32 %v2569_v26, %v2151_v31 }
 0x269   : > { %v2153_v45 = vpop.f32.mrf.mxu0  ;;  %4312 = vmatpush3.bf16.msra.mxu1 %v4481_v35 }
 0x26a   : > { %v2154_v30 = vadd.f32 %v2153_v45, %v5185_v12  ;;  %4313 = vmatprep.subr.bf16.mxu1 %v4482_v17 }
 0x26b   : > { %v2155_v38 = vpop.f32.mrf.mxu0 }
 0x26c   : > { %v2743_v42 = vmul.f32 %v2574_v51, %v2154_v30  ;;  %v2604_v38 = vpop.permute.xlu1 %2603 }
 0x26d   : > { %v2158_v46 = vpop.f32.mrf.mxu0  ;;  %4314 = vmatpush3.bf16.msra.mxu1 %v4482_v17 }
 0x26e   : > { %v2779_v25 = vpack.c.bf16 %v2743_v42, %v2742_v50  ;;  %4315 = vmatprep.subr.bf16.mxu1 %v4483_v43  ;;  %v2159_v12 = vadd.f32 %v2158_v46, %v5192_v29 }
 0x26f   : > { %v2160_v0 = vpop.f32.mrf.mxu0 }
 0x270   : > { %4272 = vmatmul.mubr.bf16.gmra.mxu1 %v2779_v25  ;;  %v2744_v9 = vmul.f32 %v2579_v57, %v2159_v12 }
 0x271   : > { %v2161_v20 = vpop.f32.mrf.mxu0  ;;  %4316 = vmatpush3.bf16.msra.mxu1 %v4483_v43 }
 0x272   : > { %v2162_v56 = vadd.f32 %v2161_v20, %v5198_v32  ;;  %4317 = vmatprep.subr.bf16.mxu1 %v4484_v40  ;;  %v4486_v32 = vld [vmem:[%s5583_s4] sm:$0xff]  }
 0x273   : > { %v2163_v58 = vpop.f32.mrf.mxu0 }
 0x274   : > { %v2745_v37 = vmul.f32 %v2584_v53, %v2162_v56 }
 0x275   : > { %v2166_v55 = vpop.f32.mrf.mxu0  ;;  %4318 = vmatpush3.bf16.msra.mxu1 %v4484_v40 }
 0x276   : > { %v2780_v29 = vpack.c.bf16 %v2745_v37, %v2744_v9  ;;  %4319 = vmatprep.subr.bf16.mxu1 %v4485_v19  ;;  %v2167_v2 = vadd.f32 %v2166_v55, %v5205_v60  ;;  %v2599_v60 = vpop.permute.xlu0 %2598 }
 0x277   : > { %v2168_v35 = vpop.f32.mrf.mxu0 }
 0x278   : > { %4275 = vmatprep.mubr.bf16.mxu1 %v2780_v29  ;;  %v2746_v17 = vmul.f32 %v2589_v24, %v2167_v2 }
 0x279   : > { %v2169_v8 = vpop.f32.mrf.mxu0  ;;  %4320 = vmatpush3.bf16.msra.mxu1 %v4485_v19 }
 0x27a   : > { %v2170_v6 = vadd.f32 %v2169_v8, %v5211_v44  ;;  %4321 = vmatprep.subr.bf16.mxu1 %v4486_v32  ;;  %v2609_v20 = vpop.permute.xlu0 %2608 }
 0x27b   : > { %v2171_v41 = vpop.f32.mrf.mxu0 }
 0x27c   : > { %v2747_v62 = vmul.f32 %v2594_v13, %v2170_v6 }
 0x27d   : > { %v2174_v31 = vpop.f32.mrf.mxu0  ;;  %4322 = vmatpush3.bf16.msra.mxu1 %v4486_v32 }
 0x27e   : > { %v2781_v45 = vpack.c.bf16 %v2747_v62, %v2746_v17  ;;  %v2175_v30 = vadd.f32 %v2174_v31, %v5215_v21  ;;  %v2614_v21 = vpop.permute.xlu1 %2613  ;;  %v2619_v29 = vpop.permute.xlu0 %2618 }
 0x27f   : > { %v2176_v26 = vpop.f32.mrf.mxu0 }
 0x280   : > { %4276 = vmatmul.mubr.bf16.gmra.mxu1 %v2781_v45  ;;  %v2748_v42 = vmul.f32 %v2599_v60, %v2175_v30 }
 0x281   : > { %v2177_v43 = vpop.f32.mrf.mxu0 }
 0x282   : > { %v2178_v51 = vadd.f32 %v2177_v43, %v5218_v3  ;;  %v2629_v17 = vpop.permute.xlu0 %2628 }
 0x283   : > { %v2179_v50 = vpop.f32.mrf.mxu0 }
 0x284   : > { %v2749_v44 = vmul.f32 %v2604_v38, %v2178_v51 }
 0x285   : > { %v2182_v46 = vpop.f32.mrf.mxu0 }
 0x286   : > { %v2782_v25 = vpack.c.bf16 %v2749_v44, %v2748_v42  ;;  %v2183_v0 = vadd.f32 %v2182_v46, %v5222_v5  ;;  %v2624_v5 = vpop.permute.xlu1 %2623  ;;  %v2639_v38 = vpop.permute.xlu0 %2638 }
 0x287   : > { %v2184_v40 = vpop.f32.mrf.mxu0 }
 0x288   : > { %4279 = vmatprep.mubr.bf16.mxu1 %v2782_v25  ;;  %v2750_v19 = vmul.f32 %v2609_v20, %v2183_v0 }
 0x289   : > { %v2185_v12 = vpop.f32.mrf.mxu0 }
 0x28a   : > { %v2186_v57 = vadd.f32 %v2185_v12, %v5225_v52  ;;  %v2649_v20 = vpop.permute.xlu0 %2648 }
 0x28b   : > { %v2187_v56 = vpop.f32.mrf.mxu0 }
 0x28c   : > { %v2751_v53 = vmul.f32 %v2614_v21, %v2186_v57 }
 0x28d   : > { %v2190_v58 = vpop.f32.mrf.mxu0 }
 0x28e   : > { %v2783_v3 = vpack.c.bf16 %v2751_v53, %v2750_v19  ;;  %v2191_v37 = vadd.f32 %v2190_v58, %v5229_v48  ;;  %v2634_v48 = vpop.permute.xlu1 %2633 }
 0x28f   : > { %v2192_v9 = vpop.f32.mrf.mxu0 }
 0x290   : > { %4280 = vmatmul.mubr.bf16.gmra.mxu1 %v2783_v3  ;;  %v2752_v2 = vmul.f32 %v2619_v29, %v2191_v37  ;;  %v2659_v37 = vpop.permute.xlu0 %2658 }
 0x291   : > { %v2193_v55 = vpop.f32.mrf.mxu0 }
 0x292   : > { %v2194_v32 = vadd.f32 %v2193_v55, %v5232_v18 }
 0x293   : > { %v2195_v35 = vpop.f32.mrf.mxu0 }
 0x294   : > { %v2753_v8 = vmul.f32 %v2624_v5, %v2194_v32 }
 0x295   : > { %v2198_v24 = vpop.f32.mrf.mxu0 }
 0x296   : > { %v2784_v52 = vpack.c.bf16 %v2753_v8, %v2752_v2  ;;  %v2199_v13 = vadd.f32 %v2198_v24, %v5236_v15  ;;  %v2644_v15 = vpop.permute.xlu1 %2643 }
 0x297   : > { %v2200_v6 = vpop.f32.mrf.mxu0 }
 0x298   : > { %4283 = vmatprep.mubr.bf16.mxu1 %v2784_v52  ;;  %v2754_v45 = vmul.f32 %v2629_v17, %v2199_v13  ;;  %v2669_v52 = vpop.permute.xlu0 %2668 }
 0x299   : > { %v2201_v41 = vpop.f32.mrf.mxu0 }
 0x29a   : > { %v2202_v62 = vadd.f32 %v2201_v41, %v5239_v47 }
 0x29b   : > { %v2203_v31 = vpop.f32.mrf.mxu0 }
 0x29c   : > { %v2755_v26 = vmul.f32 %v2634_v48, %v2202_v62 }
 0x29d   : > { %v2206_v30 = vpop.f32.mrf.mxu0 }
 0x29e   : > { %v2785_v18 = vpack.c.bf16 %v2755_v26, %v2754_v45  ;;  %v2207_v60 = vadd.f32 %v2206_v30, %v5243_v1  ;;  %v2654_v1 = vpop.permute.xlu1 %2653  ;;  %v2679_v26 = vpop.permute.xlu0 %2678 }
 0x29f   : > { %v2208_v43 = vpop.f32.mrf.mxu0 }
 0x2a0   : > { %4284 = vmatmul.mubr.bf16.gmra.mxu1 %v2785_v18  ;;  %v2756_v44 = vmul.f32 %v2639_v38, %v2207_v60 }
 0x2a1   : > { %v2209_v51 = vpop.f32.mrf.mxu0 }
 0x2a2   : > { %v2210_v50 = vadd.f32 %v2209_v51, %v5246_v63 }
 0x2a3   : > { %v2211_v42 = vpop.f32.mrf.mxu0 }
 0x2a4   : > { %v2757_v46 = vmul.f32 %v2644_v15, %v2210_v50  ;;  %v2689_v42 = vpop.permute.xlu0 %2688 }
 0x2a5   : > { %v2214_v25 = vpop.f32.mrf.mxu0 }
 0x2a6   : > { %v2786_v47 = vpack.c.bf16 %v2757_v46, %v2756_v44  ;;  %v2215_v0 = vadd.f32 %v2214_v25, %v5250_v16  ;;  %v2664_v16 = vpop.permute.xlu1 %2663 }
 0x2a7   : > { %v2216_v40 = vpop.f32.mrf.mxu0 }
 0x2a8   : > { %4287 = vmatprep.mubr.bf16.mxu1 %v2786_v47  ;;  %v2758_v56 = vmul.f32 %v2649_v20, %v2215_v0 }
 0x2a9   : > { %v2217_v12 = vpop.f32.mrf.mxu0 }
 0x2aa   : > { %v2218_v57 = vadd.f32 %v2217_v12, %v5253_v61 }
 0x2ab   : > { %v2219_v21 = vpop.f32.mrf.mxu0 }
 0x2ac   : > { %v2759_v19 = vmul.f32 %v2654_v1, %v2218_v57  ;;  %v2699_v57 = vpop.permute.xlu0 %2698 }
 0x2ad   : > { %v2222_v53 = vpop.f32.mrf.mxu0 }
 0x2ae   : > { %v2787_v63 = vpack.c.bf16 %v2759_v19, %v2758_v56  ;;  %v2223_v3 = vadd.f32 %v2222_v53, %v5257_v7  ;;  %v2674_v7 = vpop.permute.xlu1 %2673 }
 0x2af   : > { %v2224_v58 = vpop.f32.mrf.mxu0 }
 0x2b0   : > { %4288 = vmatmul.mubr.bf16.gmra.mxu1 %v2787_v63  ;;  %v2760_v32 = vmul.f32 %v2659_v37, %v2223_v3 }
 0x2b1   : > { %v2225_v9 = vpop.f32.mrf.mxu0 }
 0x2b2   : > { %v2226_v55 = vadd.f32 %v2225_v9, %v5260_v36  ;;  %v2709_v9 = vpop.permute.xlu0 %2708 }
 0x2b3   : > { %v2227_v29 = vpop.f32.mrf.mxu0 }
 0x2b4   : > { %v2761_v5 = vmul.f32 %v2664_v16, %v2226_v55 }
 0x2b5   : > { %v2230_v35 = vpop.f32.mrf.mxu0 }
 0x2b6   : > { %v2788_v61 = vpack.c.bf16 %v2761_v5, %v2760_v32  ;;  %v2231_v8 = vadd.f32 %v2230_v35, %v5264_v49  ;;  %v2684_v49 = vpop.permute.xlu1 %2683 }
 0x2b7   : > { %v2232_v2 = vpop.f32.mrf.mxu0 }
 0x2b8   : > { %4291 = vmatprep.mubr.bf16.mxu1 %v2788_v61  ;;  %v2762_v41 = vmul.f32 %v2669_v52, %v2231_v8  ;;  %v2719_v2 = vpop.permute.xlu0 %2718 }
 0x2b9   : > { %v2233_v24 = vpop.f32.mrf.mxu0 }
 0x2ba   : > { %v2234_v6 = vadd.f32 %v2233_v24, %v5267_v33 }
 0x2bb   : > { %v2235_v13 = vpop.f32.mrf.mxu0 }
 0x2bc   : > { %v2763_v17 = vmul.f32 %v2674_v7, %v2234_v6 }
 0x2bd   : > { %v2238_v62 = vpop.f32.mrf.mxu0 }
 0x2be   : > { %v2789_v36 = vpack.c.bf16 %v2763_v17, %v2762_v41  ;;  %v2239_v31 = vadd.f32 %v2238_v62, %v5270_v23  ;;  %v2694_v23 = vpop.permute.xlu1 %2693  ;;  %v2729_v17 = vpop.permute.xlu0 %2728 }
 0x2bf   : > { %v2240_v48 = vpop.f32.mrf.mxu0 }
 0x2c0   : > { %4292 = vmatmul.mubr.bf16.gmra.mxu1 %v2789_v36  ;;  %v2764_v43 = vmul.f32 %v2679_v26, %v2239_v31 }
 0x2c1   : > { %v2241_v45 = vpop.f32.mrf.mxu0 }
 0x2c2   : > { %v2242_v30 = vadd.f32 %v2241_v45, %v5273_v34  ;;  %v4487_v45 = vld [vmem:[%s5345_s9] sm:$0xff]  }
 0x2c3   : > { %v2243_v18 = vpop.f32.mrf.mxu0 }
 0x2c4   : > { %v2765_v60 = vmul.f32 %v2684_v49, %v2242_v30  ;;  %v4489_v30 = vld [vmem:[%s5345_s9 + $0x10] sm:$0xff]   ;;  %v4490_v49 = vld [vmem:[%s5345_s9 + $0x18] sm:$0xff]   ;;  %v4492_v18 = vld [vmem:[%s5345_s9 + $0x28] sm:$0xff]  }
 0x2c5   : > { %v2246_v51 = vpop.f32.mrf.mxu0 }
 0x2c6   : > { %v2790_v33 = vpack.c.bf16 %v2765_v60, %v2764_v43  ;;  %v2247_v50 = vadd.f32 %v2246_v51, %v5276_v10  ;;  %v2704_v10 = vpop.permute.xlu1 %2703  ;;  %v4493_v43 = vld [vmem:[%s5345_s9 + $0x30] sm:$0xff]   ;;  %v4494_v60 = vld [vmem:[%s5345_s9 + $0x38] sm:$0xff]   ;;  %v4495_v51 = vld [vmem:[%s5345_s9 + $0x40] sm:$0xff]  }
 0x2c7   : > { %v2248_v38 = vpop.f32.mrf.mxu0 }
 0x2c8   : > { %4295 = vmatprep.mubr.bf16.mxu1 %v2790_v33  ;;  %v2766_v25 = vmul.f32 %v2689_v42, %v2247_v50  ;;  %v4496_v33 = vld [vmem:[%s5345_s9 + $0x48] sm:$0xff]   ;;  %v4497_v38 = vld [vmem:[%s5345_s9 + $0x50] sm:$0xff]   ;;  %v4498_v50 = vld [vmem:[%s5345_s9 + $0x58] sm:$0xff]  }
 0x2c9   : > { %v2249_v15 = vpop.f32.mrf.mxu0  ;;  %v4500_v42 = vld [vmem:[%s5345_s9 + $0x68] sm:$0xff]  }
 0x2ca   : > { %v2250_v44 = vadd.f32 %v2249_v15, %v5285_v11  ;;  %v4499_v15 = vld [vmem:[%s5345_s9 + $0x60] sm:$0xff]  }
 0x2cb   : > { %v2251_v46 = vpop.f32.mrf.mxu0 }
 0x2cc   : > { %v2767_v47 = vmul.f32 %v2694_v23, %v2250_v44  ;;  %v4501_v44 = vld [vmem:[%s5345_s9 + $0x70] sm:$0xff]   ;;  %v4502_v23 = vld [vmem:[%s5345_s9 + $0x78] sm:$0xff]   ;;  %v4503_v46 = vld [vmem:[%s5345_s9 + $0x80] sm:$0xff]  }
 0x2cd   : > { %v2254_v40 = vpop.f32.mrf.mxu0 }
 0x2ce   : > { %v2791_v34 = vpack.c.bf16 %v2767_v47, %v2766_v25  ;;  %v2255_v12 = vadd.f32 %v2254_v40, %v5288_v27  ;;  %v2714_v27 = vpop.permute.xlu1 %2713  ;;  %v4504_v47 = vld [vmem:[%s5345_s9 + $0x88] sm:$0xff]   ;;  %v4505_v40 = vld [vmem:[%s5345_s9 + $0x90] sm:$0xff]  }
 0x2cf   : > { %v2256_v0 = vpop.f32.mrf.mxu0 }
 0x2d0   : > { %4296 = vmatmul.mubr.bf16.gmra.mxu1 %v2791_v34  ;;  %v2768_v56 = vmul.f32 %v2699_v57, %v2255_v12  ;;  %v4506_v12 = vld [vmem:[%s5345_s9 + $0x98] sm:$0xff]  }
 0x2d1   : > { %v2257_v20 = vpop.f32.mrf.mxu0 }
 0x2d2   : > { %v2258_v1 = vadd.f32 %v2257_v20, %v5291_v14 }
 0x2d3   : > { %v2259_v21 = vpop.f32.mrf.mxu0 }
 0x2d4   : > { %v2769_v19 = vmul.f32 %v2704_v10, %v2258_v1 }
 0x2d5   : > { %v2262_v53 = vpop.f32.mrf.mxu0 }
 0x2d6   : > { %v2792_v11 = vpack.c.bf16 %v2769_v19, %v2768_v56  ;;  %v2263_v58 = vadd.f32 %v2262_v53, %v5294_v54  ;;  %v2724_v54 = vpop.permute.xlu1 %2723 }
 0x2d7   : > { %v2264_v63 = vpop.f32.mrf.mxu0 }
 0x2d8   : > { %4299 = vmatprep.mubr.bf16.mxu1 %v2792_v11  ;;  %v2770_v16 = vmul.f32 %v2709_v9, %v2263_v58 }
 0x2d9   : > { %v2265_v3 = vpop.f32.mrf.mxu0 }
 0x2da   : > { %v2266_v37 = vadd.f32 %v2265_v3, %v5297_v22 }
 0x2db   : > { %v2267_v55 = vpop.f32.mrf.mxu0 }
 0x2dc   : > { %v2771_v29 = vmul.f32 %v2714_v27, %v2266_v37 }
 0x2dd   : > { %v2270_v32 = vpop.f32.mrf.mxu0 }
 0x2de   : > { %v2793_v14 = vpack.c.bf16 %v2771_v29, %v2770_v16  ;;  %v2271_v35 = vadd.f32 %v2270_v32, %v5300_v59 }
 0x2df   : > { %v2272_v5 = vpop.f32.mrf.mxu0 }
 0x2e0   : > { %4300 = vmatmul.mubr.bf16.gmra.mxu1 %v2793_v14  ;;  %v2772_v52 = vmul.f32 %v2719_v2, %v2271_v35 }
 0x2e1   : > { %v2273_v61 = vpop.f32.mrf.mxu0 }
 0x2e2   : > { %v2274_v8 = vadd.f32 %v2273_v61, %v5303_v28  ;;  %v2734_v28 = vpop.permute.xlu1 %2733 }
 0x2e3   : > { %v2275_v24 = vpop.f32.mrf.mxu0 }
 0x2e4   : > { %v2773_v6 = vmul.f32 %v2724_v54, %v2274_v8 }
 0x2e5   : > { %v2278_v22 = vpop.f32.mrf.mxu0 }
 0x2e6   : > { %v2794_v7 = vpack.c.bf16 %v2773_v6, %v2772_v52  ;;  %v2279_v41 = vadd.f32 %v2278_v22, %v5306_v39  ;;  %v4488_v39 = vld [vmem:[%s5345_s9 + $0x8] sm:$0xff]  }
 0x2e7   : > { %v2280_v13 = vpop.f32.mrf.mxu0 }
 0x2e8   : > { %4303 = vmatprep.mubr.bf16.mxu1 %v2794_v7  ;;  %v2774_v48 = vmul.f32 %v2729_v17, %v2279_v41 }
 0x2e9   : > { %v2281_v59 = vpop.f32.mrf.mxu0 }
 0x2ea   : > { %v2282_v62 = vadd.f32 %v2281_v59, %v5309_v4  ;;  %v4491_v4 = vld [vmem:[%s5345_s9 + $0x20] sm:$0xff]  }
 0x2eb   : > { %v2283_v36 = vpop.f32.mrf.mxu0 }
 0x2ec   : > { %v2775_v31 = vmul.f32 %v2734_v28, %v2282_v62 }
 0x2ee   : > { %v2795_v26 = vpack.c.bf16 %v2775_v31, %v2774_v48  ;;  %v5469_v31 = vld [vmem:[%s5585_s6] ss:$0 sm:$0xff] }
 0x2f0   : > { %4304 = vmatmul.mubr.bf16.gmra.mxu1 %v2795_v26 }
 0x2f1   : > { %4323 = vmatprep.mubr.bf16.mxu1 %v4487_v45 }
 0x2f8   : > { %4324 = vmatmul.mubr.bf16.vlgmr.msra.gmra.mxu1 %v4488_v39 }
 0x2f9   : > { %4327 = vmatprep.mubr.bf16.mxu1 %v4489_v30 }
 0x300   : > { %4328 = vmatmul.mubr.bf16.gmra.mxu1 %v4490_v49 }
 0x301   : > { %4331 = vmatprep.mubr.bf16.mxu1 %v4491_v4 }
 0x308   : > { %4332 = vmatmul.mubr.bf16.gmra.mxu1 %v4492_v18 }
 0x309   : > { %4335 = vmatprep.mubr.bf16.mxu1 %v4493_v43 }
 0x310   : > { %4336 = vmatmul.mubr.bf16.gmra.mxu1 %v4494_v60 }
 0x311   : > { %4339 = vmatprep.mubr.bf16.mxu1 %v4495_v51 }
 0x318   : > { %4340 = vmatmul.mubr.bf16.gmra.mxu1 %v4496_v33 }
 0x319   : > { %4343 = vmatprep.mubr.bf16.mxu1 %v4497_v38 }
 0x320   : > { %4344 = vmatmul.mubr.bf16.gmra.mxu1 %v4498_v50  ;;  %v4269_v25 = vpop.f32.mrf.mxu1 }
 0x321   : > { %4347 = vmatprep.mubr.bf16.mxu1 %v4499_v15 }
 0x322   : > { %v2950_v34 = vpop.f32.mrf.mxu1 }
 0x324   : > { %v4270_v0 = vpop.f32.mrf.mxu1 }
 0x326   : > { %v2953_v20 = vpop.f32.mrf.mxu1 }
 0x328   : > { %4348 = vmatmul.mubr.bf16.gmra.mxu1 %v4500_v42 }
 0x329   : > { %4351 = vmatprep.mubr.bf16.mxu1 %v4501_v44 }
 0x330   : > { %4352 = vmatmul.mubr.bf16.gmra.mxu1 %v4502_v23  ;;  %v4273_v57 = vpop.f32.mrf.mxu1 }
 0x331   : > { %4355 = vmatprep.mubr.bf16.mxu1 %v4503_v46 }
 0x332   : > { %v2966_v1 = vpop.f32.mrf.mxu1 }
 0x334   : > { %v4274_v10 = vpop.f32.mrf.mxu1 }
 0x336   : > { %v5400_v21 = vpop.f32.mrf.mxu1 }
 0x338   : > { %4356 = vmatmul.mubr.bf16.gmra.mxu1 %v4504_v47 }
 0x339   : > { %4359 = vmatprep.mubr.bf16.mxu1 %v4505_v40 }
 0x340   : > { %4360 = vmatmul.mubr.bf16.gmra.mxu1 %v4506_v12  ;;  %v5402_v56 = vpop.f32.mrf.mxu1 }
 0x342   : > { %v5404_v19 = vpop.f32.mrf.mxu1 }
 0x344   : > { %v5406_v53 = vpop.f32.mrf.mxu1 }
 0x346   : > { %v5408_v11 = vpop.f32.mrf.mxu1 }
 0x350   : > { %v5410_v63 = vpop.f32.mrf.mxu1 }
 0x352   : > { %v5412_v58 = vpop.f32.mrf.mxu1 }
 0x354   : > { %v5414_v3 = vpop.f32.mrf.mxu1 }
 0x356   : > { %v5416_v9 = vpop.f32.mrf.mxu1 }
 0x360   : > { %v5418_v37 = vpop.f32.mrf.mxu1 }
 0x362   : > { %v5420_v27 = vpop.f32.mrf.mxu1 }
 0x364   : > { %v5422_v55 = vpop.f32.mrf.mxu1 }
 0x366   : > { %v5424_v16 = vpop.f32.mrf.mxu1 }
 0x370   : > { %v5426_v29 = vpop.f32.mrf.mxu1 }
 0x372   : > { %v5428_v32 = vpop.f32.mrf.mxu1 }
 0x374   : > { %v5430_v14 = vpop.f32.mrf.mxu1 }
 0x376   : > { %v5432_v5 = vpop.f32.mrf.mxu1 }
 0x380   : > { %v5434_v35 = vpop.f32.mrf.mxu1 }
 0x382   : > { %v5436_v61 = vpop.f32.mrf.mxu1 }
 0x384   : > { %v5438_v2 = vpop.f32.mrf.mxu1 }
 0x386   : > { %v5440_v8 = vpop.f32.mrf.mxu1 }
 0x390   : > { %v5442_v54 = vpop.f32.mrf.mxu1 }
 0x392   : > { %v5444_v24 = vpop.f32.mrf.mxu1 }
 0x394   : > { %v5446_v52 = vpop.f32.mrf.mxu1 }
 0x396   : > { %v5448_v6 = vpop.f32.mrf.mxu1 }
 0x3a0   : > { %v5450_v22 = vpop.f32.mrf.mxu1 }
 0x3a2   : > { %v5452_v7 = vpop.f32.mrf.mxu1 }
 0x3a4   : > { %v5454_v13 = vpop.f32.mrf.mxu1 }
 0x3a6   : > { %v5456_v41 = vpop.f32.mrf.mxu1 }
 0x3b0   : > { %v5458_v59 = vpop.f32.mrf.mxu1 }
 0x3b2   : > { %v5460_v17 = vpop.f32.mrf.mxu1 }
 0x3b4   : > { %v5462_v62 = vpop.f32.mrf.mxu1 }
 0x3b6   : > { %v5464_v28 = vpop.f32.mrf.mxu1 }
 0x3b8   : > { %v4325_v36 = vpop.f32.mrf.mxu1 }
 0x3b9   : > { %v3320_v48 = vadd.f32 %v4325_v36, %v4269_v25 }
 0x3ba   : > { %v3311_v45 = vpop.f32.mrf.mxu1 }
 0x3bb   : > { %v3312_v26 = vadd.f32 %v3311_v45, %v2950_v34  ;;  %v3479_v30 = vadd.f32 %v5469_v31, %v3320_v48 }
 0x3bc   : > { %v4326_v39 = vpop.f32.mrf.mxu1 }
 0x3bd   : > { %v3323_v49 = vadd.f32 %v4326_v39, %v4270_v0  ;;  %v3477_v18 = vadd.f32 %v5469_v31, %v3312_v26  ;;  %v3519_v33 = vmax.f32 %v3479_v30, 0.0 }
 0x3be   : > { %v3314_v4 = vpop.f32.mrf.mxu1 }
 0x3bf   : > { %v3480_v43 = vadd.f32 %v5469_v31, %v3323_v49  ;;  %v3315_v60 = vadd.f32 %v3314_v4, %v2953_v20  ;;  %v3517_v44 = vmax.f32 %v3477_v18, 0.0 }
 0x3c0   : > { %v4329_v51 = vpop.f32.mrf.mxu1 }
 0x3c1   : > { %v3520_v38 = vmax.f32 %v3480_v43, 0.0  ;;  %v3478_v50 = vadd.f32 %v5469_v31, %v3315_v60  ;;  %v3336_v15 = vadd.f32 %v4329_v51, %v4273_v57 }
 0x3c2   : > { %v3327_v42 = vpop.f32.mrf.mxu1 }
 0x3c3   : > { %v4084_v23 = vpack.c.bf16 %v3520_v38, %v3519_v33  ;;  %v3518_v46 = vmax.f32 %v3478_v50, 0.0  ;;  %v3328_v25 = vadd.f32 %v3327_v42, %v2966_v1  ;;  %v3483_v34 = vadd.f32 %v5469_v31, %v3336_v15 }
 0x3c4   : > { %v4330_v47 = vpop.f32.mrf.mxu1 }
 0x3c5   : > { %4176 = vst [vmem:[%s5479_s15 + $0x8] sm:$0xff] %v4084_v23   ;;  %v4079_v40 = vpack.c.bf16 %v3518_v46, %v3517_v44  ;;  %v3339_v0 = vadd.f32 %v4330_v47, %v4274_v10  ;;  %v3481_v20 = vadd.f32 %v5469_v31, %v3328_v25  ;;  %v3523_v45 = vmax.f32 %v3483_v34, 0.0 }
 0x3c6   : > { %v3330_v12 = vpop.f32.mrf.mxu1 }
 0x3c7   : > { %4080 = vst [vmem:[%s5479_s15] sm:$0xff] %v4079_v40   ;;  %v3484_v57 = vadd.f32 %v5469_v31, %v3339_v0  ;;  %v3331_v36 = vadd.f32 %v3330_v12, %v5400_v21  ;;  %v3521_v49 = vmax.f32 %v3481_v20, 0.0 }
 0x3c8   : > { %v4333_v48 = vpop.f32.mrf.mxu1 }
 0x3c9   : > { %v3524_v26 = vmax.f32 %v3484_v57, 0.0  ;;  %v3482_v1 = vadd.f32 %v5469_v31, %v3331_v36  ;;  %v3352_v39 = vadd.f32 %v4333_v48, %v5402_v56 }
 0x3ca   : > { %v3343_v30 = vpop.f32.mrf.mxu1 }
 0x3cb   : > { %v4094_v10 = vpack.c.bf16 %v3524_v26, %v3523_v45  ;;  %v3522_v4 = vmax.f32 %v3482_v1, 0.0  ;;  %v3344_v18 = vadd.f32 %v3343_v30, %v5404_v19  ;;  %v3487_v51 = vadd.f32 %v5469_v31, %v3352_v39 }
 0x3cc   : > { %v4334_v43 = vpop.f32.mrf.mxu1 }
 0x3cd   : > { %4178 = vst [vmem:[%s5479_s15 + $0x18] sm:$0xff] %v4094_v10   ;;  %v4089_v60 = vpack.c.bf16 %v3522_v4, %v3521_v49  ;;  %v3355_v21 = vadd.f32 %v4334_v43, %v5406_v53  ;;  %v3485_v38 = vadd.f32 %v5469_v31, %v3344_v18  ;;  %v3527_v42 = vmax.f32 %v3487_v51, 0.0 }
 0x3ce   : > { %v3346_v33 = vpop.f32.mrf.mxu1 }
 0x3cf   : > { %4177 = vst [vmem:[%s5479_s15 + $0x10] sm:$0xff] %v4089_v60   ;;  %v3488_v56 = vadd.f32 %v5469_v31, %v3355_v21  ;;  %v3347_v50 = vadd.f32 %v3346_v33, %v5408_v11  ;;  %v3525_v25 = vmax.f32 %v3485_v38, 0.0 }
 0x3d0   : > { %v4337_v15 = vpop.f32.mrf.mxu1 }
 0x3d1   : > { %v3528_v19 = vmax.f32 %v3488_v56, 0.0  ;;  %v3486_v44 = vadd.f32 %v5469_v31, %v3347_v50  ;;  %v3368_v23 = vadd.f32 %v4337_v15, %v5410_v63 }
 0x3d2   : > { %v3359_v46 = vpop.f32.mrf.mxu1 }
 0x3d3   : > { %v4104_v53 = vpack.c.bf16 %v3528_v19, %v3527_v42  ;;  %v3526_v47 = vmax.f32 %v3486_v44, 0.0  ;;  %v3360_v40 = vadd.f32 %v3359_v46, %v5412_v58  ;;  %v3491_v12 = vadd.f32 %v5469_v31, %v3368_v23 }
 0x3d4   : > { %v4338_v34 = vpop.f32.mrf.mxu1 }
 0x3d5   : > { %4180 = vst [vmem:[%s5479_s15 + $0x28] sm:$0xff] %v4104_v53   ;;  %v4099_v0 = vpack.c.bf16 %v3526_v47, %v3525_v25  ;;  %v3371_v11 = vadd.f32 %v4338_v34, %v5414_v3  ;;  %v3489_v57 = vadd.f32 %v5469_v31, %v3360_v40  ;;  %v3531_v45 = vmax.f32 %v3491_v12, 0.0 }
 0x3d6   : > { %v3362_v20 = vpop.f32.mrf.mxu1 }
 0x3d7   : > { %4179 = vst [vmem:[%s5479_s15 + $0x20] sm:$0xff] %v4099_v0   ;;  %v3492_v63 = vadd.f32 %v5469_v31, %v3371_v11  ;;  %v3363_v36 = vadd.f32 %v3362_v20, %v5416_v9  ;;  %v3529_v30 = vmax.f32 %v3489_v57, 0.0 }
 0x3d8   : > { %v4341_v48 = vpop.f32.mrf.mxu1 }
 0x3d9   : > { %v3532_v58 = vmax.f32 %v3492_v63, 0.0  ;;  %v3490_v26 = vadd.f32 %v5469_v31, %v3363_v36  ;;  %v3384_v1 = vadd.f32 %v4341_v48, %v5418_v37 }
 0x3da   : > { %v3375_v39 = vpop.f32.mrf.mxu1 }
 0x3db   : > { %v4114_v3 = vpack.c.bf16 %v3532_v58, %v3531_v45  ;;  %v3530_v49 = vmax.f32 %v3490_v26, 0.0  ;;  %v3376_v10 = vadd.f32 %v3375_v39, %v5420_v27  ;;  %v3495_v43 = vadd.f32 %v5469_v31, %v3384_v1 }
 0x3dc   : > { %v4342_v4 = vpop.f32.mrf.mxu1 }
 0x3dd   : > { %4182 = vst [vmem:[%s5479_s15 + $0x38] sm:$0xff] %v4114_v3   ;;  %v4109_v18 = vpack.c.bf16 %v3530_v49, %v3529_v30  ;;  %v3387_v9 = vadd.f32 %v4342_v4, %v5422_v55  ;;  %v3493_v51 = vadd.f32 %v5469_v31, %v3376_v10  ;;  %v3535_v38 = vmax.f32 %v3495_v43, 0.0 }
 0x3de   : > { %v3378_v60 = vpop.f32.mrf.mxu1 }
 0x3df   : > { %4181 = vst [vmem:[%s5479_s15 + $0x30] sm:$0xff] %v4109_v18   ;;  %v3496_v37 = vadd.f32 %v5469_v31, %v3387_v9  ;;  %v3379_v21 = vadd.f32 %v3378_v60, %v5424_v16  ;;  %v3533_v42 = vmax.f32 %v3493_v51, 0.0 }
 0x3e0   : > { %v4345_v33 = vpop.f32.mrf.mxu1 }
 0x3e1   : > { %v3536_v27 = vmax.f32 %v3496_v37, 0.0  ;;  %v3494_v56 = vadd.f32 %v5469_v31, %v3379_v21  ;;  %v3400_v50 = vadd.f32 %v4345_v33, %v5426_v29 }
 0x3e2   : > { %v3391_v15 = vpop.f32.mrf.mxu1 }
 0x3e3   : > { %v4124_v55 = vpack.c.bf16 %v3536_v27, %v3535_v38  ;;  %v3534_v19 = vmax.f32 %v3494_v56, 0.0  ;;  %v3392_v44 = vadd.f32 %v3391_v15, %v5428_v32  ;;  %v3499_v25 = vadd.f32 %v5469_v31, %v3400_v50 }
 0x3e4   : > { %v4346_v23 = vpop.f32.mrf.mxu1 }
 0x3e5   : > { %4184 = vst [vmem:[%s5479_s15 + $0x48] sm:$0xff] %v4124_v55   ;;  %v4119_v46 = vpack.c.bf16 %v3534_v19, %v3533_v42  ;;  %v3403_v16 = vadd.f32 %v4346_v23, %v5430_v14  ;;  %v3497_v47 = vadd.f32 %v5469_v31, %v3392_v44  ;;  %v3539_v0 = vmax.f32 %v3499_v25, 0.0 }
 0x3e6   : > { %v3394_v53 = vpop.f32.mrf.mxu1 }
 0x3e7   : > { %4183 = vst [vmem:[%s5479_s15 + $0x40] sm:$0xff] %v4119_v46   ;;  %v3500_v29 = vadd.f32 %v5469_v31, %v3403_v16  ;;  %v3395_v40 = vadd.f32 %v3394_v53, %v5432_v5  ;;  %v3537_v57 = vmax.f32 %v3497_v47, 0.0 }
 0x3e8   : > { %v4349_v34 = vpop.f32.mrf.mxu1 }
 0x3e9   : > { %v3540_v32 = vmax.f32 %v3500_v29, 0.0  ;;  %v3498_v12 = vadd.f32 %v5469_v31, %v3395_v40  ;;  %v3416_v11 = vadd.f32 %v4349_v34, %v5434_v35 }
 0x3ea   : > { %v3407_v20 = vpop.f32.mrf.mxu1 }
 0x3eb   : > { %v4134_v14 = vpack.c.bf16 %v3540_v32, %v3539_v0  ;;  %v3538_v63 = vmax.f32 %v3498_v12, 0.0  ;;  %v3408_v36 = vadd.f32 %v3407_v20, %v5436_v61  ;;  %v3503_v58 = vadd.f32 %v5469_v31, %v3416_v11 }
 0x3ec   : > { %v4350_v48 = vpop.f32.mrf.mxu1 }
 0x3ed   : > { %4186 = vst [vmem:[%s5479_s15 + $0x58] sm:$0xff] %v4134_v14   ;;  %v4129_v45 = vpack.c.bf16 %v3538_v63, %v3537_v57  ;;  %v3419_v5 = vadd.f32 %v4350_v48, %v5438_v2  ;;  %v3501_v1 = vadd.f32 %v5469_v31, %v3408_v36  ;;  %v3543_v3 = vmax.f32 %v3503_v58, 0.0 }
 0x3ee   : > { %v3410_v26 = vpop.f32.mrf.mxu1 }
 0x3ef   : > { %4185 = vst [vmem:[%s5479_s15 + $0x50] sm:$0xff] %v4129_v45   ;;  %v3504_v35 = vadd.f32 %v5469_v31, %v3419_v5  ;;  %v3411_v39 = vadd.f32 %v3410_v26, %v5440_v8  ;;  %v3541_v18 = vmax.f32 %v3501_v1, 0.0 }
 0x3f0   : > { %v4353_v30 = vpop.f32.mrf.mxu1 }
 0x3f1   : > { %v3544_v61 = vmax.f32 %v3504_v35, 0.0  ;;  %v3502_v49 = vadd.f32 %v5469_v31, %v3411_v39  ;;  %v3432_v10 = vadd.f32 %v4353_v30, %v5442_v54 }
 0x3f2   : > { %v3423_v4 = vpop.f32.mrf.mxu1 }
 0x3f3   : > { %v4144_v2 = vpack.c.bf16 %v3544_v61, %v3543_v3  ;;  %v3542_v43 = vmax.f32 %v3502_v49, 0.0  ;;  %v3424_v9 = vadd.f32 %v3423_v4, %v5444_v24  ;;  %v3507_v37 = vadd.f32 %v5469_v31, %v3432_v10 }
 0x3f4   : > { %v4354_v60 = vpop.f32.mrf.mxu1 }
 0x3f5   : > { %4188 = vst [vmem:[%s5479_s15 + $0x68] sm:$0xff] %v4144_v2   ;;  %v4139_v51 = vpack.c.bf16 %v3542_v43, %v3541_v18  ;;  %v3435_v8 = vadd.f32 %v4354_v60, %v5446_v52  ;;  %v3505_v33 = vadd.f32 %v5469_v31, %v3424_v9  ;;  %v3547_v56 = vmax.f32 %v3507_v37, 0.0 }
 0x3f6   : > { %v3426_v21 = vpop.f32.mrf.mxu1 }
 0x3f7   : > { %4187 = vst [vmem:[%s5479_s15 + $0x60] sm:$0xff] %v4139_v51   ;;  %v3508_v54 = vadd.f32 %v5469_v31, %v3435_v8  ;;  %v3427_v38 = vadd.f32 %v3426_v21, %v5448_v6  ;;  %v3545_v55 = vmax.f32 %v3505_v33, 0.0 }
 0x3f8   : > { %v4357_v27 = vpop.f32.mrf.mxu1 }
 0x3f9   : > { %v3548_v24 = vmax.f32 %v3508_v54, 0.0  ;;  %v3506_v50 = vadd.f32 %v5469_v31, %v3427_v38  ;;  %v3448_v15 = vadd.f32 %v4357_v27, %v5450_v22 }
 0x3fa   : > { %v3439_v42 = vpop.f32.mrf.mxu1 }
 0x3fb   : > { %v4154_v52 = vpack.c.bf16 %v3548_v24, %v3547_v56  ;;  %v3546_v19 = vmax.f32 %v3506_v50, 0.0  ;;  %v3440_v44 = vadd.f32 %v3439_v42, %v5452_v7  ;;  %v3511_v25 = vadd.f32 %v5469_v31, %v3448_v15 }
 0x3fc   : > { %v4358_v23 = vpop.f32.mrf.mxu1 }
 0x3fd   : > { %4190 = vst [vmem:[%s5479_s15 + $0x78] sm:$0xff] %v4154_v52   ;;  %v4149_v46 = vpack.c.bf16 %v3546_v19, %v3545_v55  ;;  %v3451_v6 = vadd.f32 %v4358_v23, %v5454_v13  ;;  %v3509_v53 = vadd.f32 %v5469_v31, %v3440_v44  ;;  %v3551_v40 = vmax.f32 %v3511_v25, 0.0 }
 0x3fe   : > { %v3442_v16 = vpop.f32.mrf.mxu1 }
 0x3ff   : > { %4189 = vst [vmem:[%s5479_s15 + $0x70] sm:$0xff] %v4149_v46   ;;  %v3512_v22 = vadd.f32 %v5469_v31, %v3451_v6  ;;  %v3443_v47 = vadd.f32 %v3442_v16, %v5456_v41  ;;  %v3549_v12 = vmax.f32 %v3509_v53, 0.0 }
 0x400   : > { %v4361_v29 = vpop.f32.mrf.mxu1 }
 0x401   : > { %v3552_v7 = vmax.f32 %v3512_v22, 0.0  ;;  %v3510_v34 = vadd.f32 %v5469_v31, %v3443_v47  ;;  %v3464_v0 = vadd.f32 %v4361_v29, %v5458_v59 }
 0x402   : > { %v3455_v32 = vpop.f32.mrf.mxu1 }
 0x403   : > { %v4164_v13 = vpack.c.bf16 %v3552_v7, %v3551_v40  ;;  %v3550_v11 = vmax.f32 %v3510_v34, 0.0  ;;  %v3456_v20 = vadd.f32 %v3455_v32, %v5460_v17  ;;  %v3515_v41 = vadd.f32 %v5469_v31, %v3464_v0 }
 0x404   : > { %v4362_v57 = vpop.f32.mrf.mxu1 }
 0x405   : > { %4192 = vst [vmem:[%s5479_s15 + $0x88] sm:$0xff] %v4164_v13   ;;  %v4159_v14 = vpack.c.bf16 %v3550_v11, %v3549_v12  ;;  %v3467_v63 = vadd.f32 %v4362_v57, %v5462_v62  ;;  %v3513_v48 = vadd.f32 %v5469_v31, %v3456_v20  ;;  %v3555_v58 = vmax.f32 %v3515_v41, 0.0 }
 0x406   : > { %v3458_v36 = vpop.f32.mrf.mxu1 }
 0x407   : > { %4191 = vst [vmem:[%s5479_s15 + $0x80] sm:$0xff] %v4159_v14   ;;  %v3516_v59 = vadd.f32 %v5469_v31, %v3467_v63  ;;  %v3459_v45 = vadd.f32 %v3458_v36, %v5464_v28  ;;  %v3553_v26 = vmax.f32 %v3513_v48, 0.0 }
 0x409   : > { %v3556_v5 = vmax.f32 %v3516_v59, 0.0  ;;  %v3514_v17 = vadd.f32 %v5469_v31, %v3459_v45 }
 0x40b   : > { %v4174_v1 = vpack.c.bf16 %v3556_v5, %v3555_v58  ;;  %v3554_v35 = vmax.f32 %v3514_v17, 0.0 }
 0x40d   : > { %4194 = vst [vmem:[%s5479_s15 + $0x98] sm:$0xff] %v4174_v1   ;;  %v4169_v39 = vpack.c.bf16 %v3554_v35, %v3553_v26 }
 0x40f   : > { %4193 = vst [vmem:[%s5479_s15 + $0x90] sm:$0xff] %v4169_v39  }
 0x410 PF: > { %s17_s26 = sadd.s32 1, %s4529_s26   ;;  %s5587_s24 = smov %s4525_s25 }
 0x411   : > { %p14_p7 = scmp.ge.s32.totalorder %s17_s26, 4   ;;  %s5588_s25 = smov %s5590_s27 }
 0x413   :  { %16 = sbr.rel (!%p14_p7) target bundleno = 2 (0x2), region = 99 }

// kernel: graphsage_forward.3
= control target key start
LH: loop header
LB: loop body
LE: loop exit
PB: predicated region body
PF: predicated region fallthrough
CT: control target
= control target key end

     0   :  { %v2403_v49 = vmov 0   ;;  %s3209_s1 = inlined_call_operand.vmem [shape: bf16[640,128], index: 1, kind: input, shape index: {}, may-alias: {1,2}]   ;;  %s3210_s0 = inlined_call_operand.vmem [shape: s8[224,640], index: 0, kind: input, shape index: {}]   ;;  %s3211_s3 = inlined_call_operand.vmem [shape: f32[224,1], index: 3, kind: input, shape index: {}]   ;;  %s3212_s4 = inlined_call_operand.vmem [shape: bf16[128,128], index: 4, kind: input, shape index: {}]   ;;  %s3213_s5 = inlined_call_operand.vmem [shape: bf16[128,128], index: 5, kind: input, shape index: {}]   ;;  %s3214_s2 = inlined_call_operand.vmem [shape: bf16[640,128], index: 2, kind: input, shape index: {}, may-alias: {1,2}]   ;;  %s3215_s6 = inlined_call_operand.vmem [shape: f32[1,128], index: 6, kind: input, shape index: {}]   ;;  %s3216_s7 = inlined_call_operand.vmem [shape: f32[224,128], index: 7, kind: output, shape index: {}]  }
   0x1   :  { %v2333_v0 = vld [vmem:[%s3209_s1 + $0x78] sm:$0xff]   ;;  %v2337_v4 = vld [vmem:[%s3209_s1 + $0x70] sm:$0xff]   ;;  %v2341_v8 = vld [vmem:[%s3209_s1 + $0x68] sm:$0xff]   ;;  %2331 = vset.pattern.permute.xlu0 %v2403_v49  ;;  %2332 = vset.pattern.permute.xlu1 %v2403_v49 }
   0x2   :  { %v2334_v1 = vld [vmem:[%s3209_s1 + $0xf8] sm:$0xff]   ;;  %1916 = vmatprep.subr.bf16.mxu0 %v2333_v0  ;;  %v2338_v5 = vld [vmem:[%s3209_s1 + $0xf0] sm:$0xff]   ;;  %v2342_v9 = vld [vmem:[%s3209_s1 + $0xe8] sm:$0xff]  }
   0x3   :  { %v2335_v2 = vld [vmem:[%s3209_s1 + $0x38] sm:$0xff]   ;;  %2016 = vmatprep.subr.bf16.mxu1 %v2334_v1  ;;  %v2339_v6 = vld [vmem:[%s3209_s1 + $0x30] sm:$0xff]   ;;  %v2343_v10 = vld [vmem:[%s3209_s1 + $0x28] sm:$0xff]  }
   0x4   :  { %v2336_v3 = vld [vmem:[%s3209_s1 + $0xb8] sm:$0xff]   ;;  %1917 = vmatpush3.bf16.msra.mxu0 %v2335_v2  ;;  %v2340_v7 = vld [vmem:[%s3209_s1 + $0xb0] sm:$0xff]   ;;  %v2344_v11 = vld [vmem:[%s3209_s1 + $0xa8] sm:$0xff]  }
   0x5   :  { %2017 = vmatpush3.bf16.msra.mxu1 %v2336_v3  ;;  %1918 = vmatprep.subr.bf16.mxu0 %v2337_v4  ;;  %v2345_v12 = vld [vmem:[%s3209_s1 + $0x60] sm:$0xff]   ;;  %v2349_v16 = vld [vmem:[%s3209_s1 + $0x58] sm:$0xff]   ;;  %v2353_v20 = vld [vmem:[%s3209_s1 + $0x50] sm:$0xff]  }
   0x6   :  { %2018 = vmatprep.subr.bf16.mxu1 %v2338_v5  ;;  %v2346_v13 = vld [vmem:[%s3209_s1 + $0xe0] sm:$0xff]   ;;  %v2350_v17 = vld [vmem:[%s3209_s1 + $0xd8] sm:$0xff]   ;;  %v2354_v21 = vld [vmem:[%s3209_s1 + $0xd0] sm:$0xff]  }
   0x7   :  { %v2347_v14 = vld [vmem:[%s3209_s1 + $0x20] sm:$0xff]   ;;  %v2351_v18 = vld [vmem:[%s3209_s1 + $0x18] sm:$0xff]   ;;  %v2355_v22 = vld [vmem:[%s3209_s1 + $0x10] sm:$0xff]  }
   0x8   :  { %1919 = vmatpush3.bf16.msra.mxu0 %v2339_v6  ;;  %v2348_v15 = vld [vmem:[%s3209_s1 + $0xa0] sm:$0xff]   ;;  %v2352_v19 = vld [vmem:[%s3209_s1 + $0x98] sm:$0xff]   ;;  %v2356_v23 = vld [vmem:[%s3209_s1 + $0x90] sm:$0xff]  }
   0x9   :  { %2019 = vmatpush3.bf16.msra.mxu1 %v2340_v7  ;;  %1920 = vmatprep.subr.bf16.mxu0 %v2341_v8  ;;  %v2357_v24 = vld [vmem:[%s3209_s1 + $0x48] sm:$0xff]   ;;  %v2361_v28 = vld [vmem:[%s3209_s1 + $0x40] sm:$0xff]   ;;  %v30_v33 = vld [vmem:[%s3210_s0 + $0x18] sm:$0xff] }
   0xa   :  { %2020 = vmatprep.subr.bf16.mxu1 %v2342_v9  ;;  %v2358_v25 = vld [vmem:[%s3209_s1 + $0xc8] sm:$0xff]   ;;  %v2362_v29 = vld [vmem:[%s3209_s1 + $0xc0] sm:$0xff]   ;;  %v65_v37 = vunpack.c.l.s8.bf16 %v30_v33  ;;  %v29_v38 = vld [vmem:[%s3210_s0 + $0x10] sm:$0xff]  ;;  %v70_v39 = vunpack.c.h.s8.bf16 %v30_v33 }
   0xb   :  { %v2359_v26 = vld [vmem:[%s3209_s1 + $0x8] sm:$0xff]   ;;  %v2363_v30 = vld [vmem:[%s3209_s1] sm:$0xff]   ;;  %v64_v41 = vunpack.c.l.s8.bf16 %v29_v38  ;;  %v2365_v42 = vld [vmem:[%s3209_s1 + $0x138] sm:$0xff]   ;;  %v69_v48 = vunpack.c.h.s8.bf16 %v29_v38 }
   0xc   :  { %1921 = vmatpush3.bf16.msra.mxu0 %v2343_v10  ;;  %v2360_v27 = vld [vmem:[%s3209_s1 + $0x88] sm:$0xff]   ;;  %v2364_v31 = vld [vmem:[%s3209_s1 + $0x80] sm:$0xff]   ;;  %629 = vmatprep.mubr.bf16.mxu1 %v65_v37  ;;  %v2366_v43 = vld [vmem:[%s3209_s1 + $0x130] sm:$0xff]  }
   0xd   :  { %2021 = vmatpush3.bf16.msra.mxu1 %v2344_v11  ;;  %1922 = vmatprep.subr.bf16.mxu0 %v2345_v12  ;;  %v28_v32 = vld [vmem:[%s3210_s0 + $0x8] sm:$0xff]  ;;  %v27_v34 = vld [vmem:[%s3210_s0] sm:$0xff]  ;;  %v33_v44 = vld [vmem:[%s3210_s0 + $0x30] sm:$0xff] }
   0xe   :  { %2022 = vmatprep.subr.bf16.mxu1 %v2346_v13  ;;  %v63_v35 = vunpack.c.l.s8.bf16 %v28_v32  ;;  %v68_v36 = vunpack.c.h.s8.bf16 %v28_v32  ;;  %v62_v40 = vunpack.c.l.s8.bf16 %v27_v34  ;;  %v35_v45 = vld [vmem:[%s3210_s0 + $0x40] sm:$0xff]  ;;  %v2367_v46 = vld [vmem:[%s3209_s1 + $0x128] sm:$0xff]   ;;  %v67_v47 = vunpack.c.h.s8.bf16 %v27_v34  ;;  %v34_v54 = vld [vmem:[%s3210_s0 + $0x38] sm:$0xff] }
   0xf   :  { %v73_v50 = vunpack.c.l.s8.bf16 %v33_v44  ;;  %v75_v51 = vunpack.c.l.s8.bf16 %v35_v45  ;;  %v2368_v52 = vld [vmem:[%s3209_s1 + $0x120] sm:$0xff]   ;;  %v32_v53 = vld [vmem:[%s3210_s0 + $0x28] sm:$0xff]  ;;  %v2369_v55 = vld [vmem:[%s3209_s1 + $0x118] sm:$0xff]   ;;  %v74_v57 = vunpack.c.l.s8.bf16 %v34_v54  ;;  %v78_v58 = vunpack.c.h.s8.bf16 %v33_v44 }
  0x10   :  { %1923 = vmatpush3.bf16.msra.mxu0 %v2347_v14  ;;  %484 = vmatprep.mubr.bf16.mxu0 %v63_v35  ;;  %v72_v56 = vunpack.c.l.s8.bf16 %v32_v53  ;;  %v80_v59 = vunpack.c.h.s8.bf16 %v35_v45  ;;  %v2370_v60 = vld [vmem:[%s3209_s1 + $0x110] sm:$0xff]   ;;  %v1038_v61 = vld [vmem:[%s3211_s3] sm:$0xff]  ;;  %v38_v63 = vld [vmem:[%s3210_s0 + $0x58] sm:$0xff]  ;;  %v77_v2 = vunpack.c.h.s8.bf16 %v32_v53  ;;  %v79_v3 = vunpack.c.h.s8.bf16 %v34_v54 }
  0x11   :  { %2023 = vmatpush3.bf16.msra.mxu1 %v2348_v15  ;;  %1924 = vmatprep.subr.bf16.mxu0 %v2349_v16  ;;  %v1040_v62 = vld [vmem:[%s3211_s3 + $0x10] sm:$0xff]  ;;  %v40_v0 = vld [vmem:[%s3210_s0 + $0x68] sm:$0xff]  ;;  %v83_v4 = vunpack.c.l.s8.bf16 %v38_v63  ;;  %v2372_v6 = vld [vmem:[%s3209_s1 + $0x100] sm:$0xff]   ;;  %v88_v13 = vunpack.c.h.s8.bf16 %v38_v63 }
  0x12   :  { %2024 = vmatprep.subr.bf16.mxu1 %v2350_v17  ;;  %v2371_v1 = vld [vmem:[%s3209_s1 + $0x108] sm:$0xff]   ;;  %1068 = vperm.xlu0 %2331, %v1038_v61   ;;  %v85_v5 = vunpack.c.l.s8.bf16 %v40_v0  ;;  %v37_v7 = vld [vmem:[%s3210_s0 + $0x50] sm:$0xff]  ;;  %v39_v8 = vld [vmem:[%s3210_s0 + $0x60] sm:$0xff]  ;;  %v90_v14 = vunpack.c.h.s8.bf16 %v40_v0 }
  0x13   :  { %1078 = vperm.xlu1 %2332, %v1040_v62   ;;  %v1039_v9 = vld [vmem:[%s3211_s3 + $0x8] sm:$0xff]  ;;  %v1041_v10 = vld [vmem:[%s3211_s3 + $0x18] sm:$0xff]  ;;  %v82_v11 = vunpack.c.l.s8.bf16 %v37_v7  ;;  %v84_v12 = vunpack.c.l.s8.bf16 %v39_v8  ;;  %v1042_v15 = vld [vmem:[%s3211_s3 + $0x20] sm:$0xff] }
  0x14   :  { %1925 = vmatpush3.bf16.msra.mxu0 %v2351_v18  ;;  %v1043_v16 = vld [vmem:[%s3211_s3 + $0x28] sm:$0xff]  ;;  %v43_v17 = vld [vmem:[%s3210_s0 + $0x80] sm:$0xff]  ;;  %v45_v18 = vld [vmem:[%s3210_s0 + $0x90] sm:$0xff] }
  0x15   :  { %2025 = vmatpush3.bf16.msra.mxu1 %v2352_v19  ;;  %1926 = vmatprep.subr.bf16.mxu0 %v2353_v20  ;;  %v1044_v19 = vld [vmem:[%s3211_s3 + $0x30] sm:$0xff]  ;;  %v87_v20 = vunpack.c.h.s8.bf16 %v37_v7  ;;  %v1049_v32 = vld [vmem:[%s3211_s3 + $0x58] sm:$0xff]  ;;  %v98_v33 = vunpack.c.h.s8.bf16 %v43_v17  ;;  %v100_v34 = vunpack.c.h.s8.bf16 %v45_v18  ;;  %v1050_v35 = vld [vmem:[%s3211_s3 + $0x60] sm:$0xff] }
  0x16   :  { %2026 = vmatprep.subr.bf16.mxu1 %v2354_v21  ;;  %1073 = vperm.xlu0 %2331, %v1039_v9   ;;  %v89_v21 = vunpack.c.h.s8.bf16 %v39_v8  ;;  %v48_v37 = vld [vmem:[%s3210_s0 + $0xa8] sm:$0xff]  ;;  %v50_v38 = vld [vmem:[%s3210_s0 + $0xb8] sm:$0xff]  ;;  %v1054_v45 = vld [vmem:[%s3211_s3 + $0x80] sm:$0xff] }
  0x17   :  { %1083 = vperm.xlu1 %2332, %v1041_v10   ;;  %v105_v44 = vunpack.c.l.s8.bf16 %v50_v38  ;;  %v1056_v49 = vld [vmem:[%s3211_s3 + $0x90] sm:$0xff]  ;;  %v108_v53 = vunpack.c.h.s8.bf16 %v48_v37  ;;  %v110_v54 = vunpack.c.h.s8.bf16 %v50_v38  ;;  %v1061_v62 = vld [vmem:[%s3211_s3 + $0xb8] sm:$0xff] }
  0x18   :  { %1927 = vmatpush3.bf16.msra.mxu0 %v2355_v22  ;;  %v1045_v22 = vld [vmem:[%s3211_s3 + $0x38] sm:$0xff] }
  0x19   :  { %2027 = vmatpush3.bf16.msra.mxu1 %v2356_v23  ;;  %1928 = vmatprep.subr.bf16.mxu0 %v2357_v24  ;;  %v93_v23 = vunpack.c.l.s8.bf16 %v43_v17  ;;  %v95_v24 = vunpack.c.l.s8.bf16 %v45_v18  ;;  %v1065_v8 = vld [vmem:[%s3211_s3 + $0xd8] sm:$0xff]  ;;  %v57_v17 = vld [vmem:[%s3210_s0 + $0xf0] sm:$0xff]  ;;  %v59_v18 = vld [vmem:[%s3210_s0 + $0x100] sm:$0xff] }
  0x1a   :  { %2028 = vmatprep.subr.bf16.mxu1 %v2358_v25  ;;  %1088 = vperm.xlu0 %2331, %v1042_v15   ;;  %v1046_v25 = vld [vmem:[%s3211_s3 + $0x40] sm:$0xff] }
  0x1b   :  { %1093 = vperm.xlu1 %2332, %v1043_v16  }
  0x1c   :  { %1929 = vmatpush3.bf16.msra.mxu0 %v2359_v26  ;;  %v1047_v26 = vld [vmem:[%s3211_s3 + $0x48] sm:$0xff] }
  0x1d   :  { %2029 = vmatpush3.bf16.msra.mxu1 %v2360_v27  ;;  %1930 = vmatprep.subr.bf16.mxu0 %v2361_v28  ;;  %v42_v27 = vld [vmem:[%s3210_s0 + $0x78] sm:$0xff]  ;;  %v44_v28 = vld [vmem:[%s3210_s0 + $0x88] sm:$0xff] }
  0x1e   :  { %2030 = vmatprep.subr.bf16.mxu1 %v2362_v29  ;;  %1098 = vperm.xlu0 %2331, %v1044_v19   ;;  %v1048_v29 = vld [vmem:[%s3211_s3 + $0x50] sm:$0xff]  ;;  %v122_v19 = vunpack.c.l.s8.bf16 %v57_v17 }
  0x1f   :  { %1103 = vperm.xlu1 %2332, %v1045_v22  }
  0x20   :  { %1931 = vmatpush3.bf16.msra.mxu0 %v2363_v30  ;;  %v92_v30 = vunpack.c.l.s8.bf16 %v42_v27 }
  0x21   :  { %2031 = vmatpush3.bf16.msra.mxu1 %v2364_v31  ;;  %2182 = vmatprep.subr.bf16.mxu0 %v2365_v42  ;;  %v94_v31 = vunpack.c.l.s8.bf16 %v44_v28 }
  0x22   :  { %2314 = vmatprep.subr.bf16.mxu1 %v2365_v42  ;;  %1108 = vperm.xlu0 %2331, %v1046_v25   ;;  %v127_v25 = vunpack.c.h.s8.bf16 %v57_v17 }
  0x23   :  { %485 = vmatmul.mubr.bf16.vlgmr.msra.gmra.mxu0 %v62_v40  ;;  %1113 = vperm.xlu1 %2332, %v1047_v26   ;;  %v97_v40 = vunpack.c.h.s8.bf16 %v42_v27  ;;  %v129_v26 = vunpack.c.h.s8.bf16 %v59_v18 }
  0x24   :  { %630 = vmatmul.mubr.bf16.vlgmr.msra.gmra.mxu1 %v64_v41  ;;  %492 = vmatprep.mubr.bf16.mxu0 %v68_v36  ;;  %v1051_v36 = vld [vmem:[%s3211_s3 + $0x68] sm:$0xff]  ;;  %v99_v41 = vunpack.c.h.s8.bf16 %v44_v28 }
  0x25   :  { %2183 = vmatpush3.bf16.msra.mxu0 %v2365_v42  ;;  %637 = vmatprep.mubr.bf16.mxu1 %v70_v39  ;;  %v1052_v39 = vld [vmem:[%s3211_s3 + $0x70] sm:$0xff] }
  0x26   :  { %2184 = vmatprep.subr.bf16.mxu0 %v2366_v43  ;;  %2322 = vmatpush3.bf16.msra.mxu1 %v2365_v42  ;;  %v1053_v42 = vld [vmem:[%s3211_s3 + $0x78] sm:$0xff] }
  0x27   :  { %2315 = vmatprep.subr.bf16.mxu1 %v2366_v43  ;;  %1118 = vperm.xlu0 %2331, %v1048_v29   ;;  %v36_v29 = vld [vmem:[%s3210_s0 + $0x48] sm:$0xff] }
  0x28   :  { %1123 = vperm.xlu1 %2332, %v1049_v32  }
  0x29   :  { %2185 = vmatpush3.bf16.msra.mxu0 %v2366_v43 }
  0x2a   :  { %2186 = vmatprep.subr.bf16.mxu0 %v2367_v46  ;;  %2323 = vmatpush3.bf16.msra.mxu1 %v2366_v43  ;;  %v103_v43 = vunpack.c.l.s8.bf16 %v48_v37  ;;  %v81_v37 = vunpack.c.h.s8.bf16 %v36_v29 }
  0x2b   :  { %493 = vmatmul.mubr.bf16.gmra.mxu0 %v67_v47  ;;  %2316 = vmatprep.subr.bf16.mxu1 %v2367_v46  ;;  %v47_v47 = vld [vmem:[%s3210_s0 + $0xa0] sm:$0xff] }
  0x2c   :  { %638 = vmatmul.mubr.bf16.gmra.mxu1 %v69_v48  ;;  %500 = vmatprep.mubr.bf16.mxu0 %v73_v50  ;;  %v49_v48 = vld [vmem:[%s3210_s0 + $0xb0] sm:$0xff]  ;;  %v102_v50 = vunpack.c.l.s8.bf16 %v47_v47 }
  0x2d   :  { %645 = vmatprep.mubr.bf16.mxu1 %v75_v51  ;;  %2187 = vmatpush3.bf16.msra.mxu0 %v2367_v46  ;;  %v104_v51 = vunpack.c.l.s8.bf16 %v49_v48  ;;  %v109_v61 = vunpack.c.h.s8.bf16 %v49_v48  ;;  %v2375_v48 = vld [vmem:[%s3213_s5 + $0x38] sm:$0xff]  }
  0x2e   :  { %2188 = vmatprep.subr.bf16.mxu0 %v2368_v52  ;;  %2324 = vmatpush3.bf16.msra.mxu1 %v2367_v46  ;;  %v1055_v46 = vld [vmem:[%s3211_s3 + $0x88] sm:$0xff] }
  0x2f   :  { %2317 = vmatprep.subr.bf16.mxu1 %v2368_v52  ;;  %1128 = vperm.xlu0 %2331, %v1050_v35   ;;  %v41_v35 = vld [vmem:[%s3210_s0 + $0x70] sm:$0xff] }
  0x30   :  { %1133 = vperm.xlu1 %2332, %v1051_v36   ;;  %v61_v36 = vld [vmem:[%s3210_s0 + $0x110] sm:$0xff] }
  0x31   :  { %2189 = vmatpush3.bf16.msra.mxu0 %v2368_v52 }
  0x32   :  { %2190 = vmatprep.subr.bf16.mxu0 %v2369_v55  ;;  %2325 = vmatpush3.bf16.msra.mxu1 %v2368_v52  ;;  %v1057_v52 = vld [vmem:[%s3211_s3 + $0x98] sm:$0xff] }
  0x33   :  { %501 = vmatmul.mubr.bf16.gmra.mxu0 %v72_v56  ;;  %2318 = vmatprep.subr.bf16.mxu1 %v2369_v55  ;;  %v1059_v56 = vld [vmem:[%s3211_s3 + $0xa8] sm:$0xff] }
  0x34   :  { %646 = vmatmul.mubr.bf16.gmra.mxu1 %v74_v57  ;;  %508 = vmatprep.mubr.bf16.mxu0 %v78_v58  ;;  %v53_v57 = vld [vmem:[%s3210_s0 + $0xd0] sm:$0xff]  ;;  %v55_v58 = vld [vmem:[%s3210_s0 + $0xe0] sm:$0xff] }
  0x35   :  { %653 = vmatprep.mubr.bf16.mxu1 %v80_v59  ;;  %2191 = vmatpush3.bf16.msra.mxu0 %v2369_v55  ;;  %v1060_v59 = vld [vmem:[%s3211_s3 + $0xb0] sm:$0xff]  ;;  %v113_v63 = vunpack.c.l.s8.bf16 %v53_v57  ;;  %v115_v0 = vunpack.c.l.s8.bf16 %v55_v58  ;;  %v118_v9 = vunpack.c.h.s8.bf16 %v53_v57  ;;  %v120_v10 = vunpack.c.h.s8.bf16 %v55_v58  ;;  %v2384_v57 = vld [vmem:[%s3212_s4 + $0x8] sm:$0xff]  }
  0x36   :  { %2192 = vmatprep.subr.bf16.mxu0 %v2370_v60  ;;  %2326 = vmatpush3.bf16.msra.mxu1 %v2369_v55  ;;  %v1058_v55 = vld [vmem:[%s3211_s3 + $0xa0] sm:$0xff]  ;;  %v2385_v58 = vld [vmem:[%s3213_s5 + $0x10] sm:$0xff]  }
  0x37   :  { %2319 = vmatprep.subr.bf16.mxu1 %v2370_v60  ;;  %1138 = vperm.xlu0 %2331, %v1052_v39   ;;  %v86_v39 = vunpack.c.l.s8.bf16 %v41_v35 }
  0x38   :  { %1143 = vperm.xlu1 %2332, %v1053_v42   ;;  %v91_v42 = vunpack.c.h.s8.bf16 %v41_v35 }
  0x39   :  { %2193 = vmatpush3.bf16.msra.mxu0 %v2370_v60 }
  0x3a   :  { %2194 = vmatprep.subr.bf16.mxu0 %v2371_v1  ;;  %2327 = vmatpush3.bf16.msra.mxu1 %v2370_v60  ;;  %v107_v60 = vunpack.c.h.s8.bf16 %v47_v47  ;;  %v2374_v47 = vld [vmem:[%s3212_s4 + $0x30] sm:$0xff]  }
  0x3b   :  { %509 = vmatmul.mubr.bf16.gmra.mxu0 %v77_v2  ;;  %2320 = vmatprep.subr.bf16.mxu1 %v2371_v1  ;;  %v1063_v2 = vld [vmem:[%s3211_s3 + $0xc8] sm:$0xff] }
  0x3c   :  { %654 = vmatmul.mubr.bf16.gmra.mxu1 %v79_v3  ;;  %516 = vmatprep.mubr.bf16.mxu0 %v83_v4  ;;  %v52_v3 = vld [vmem:[%s3210_s0 + $0xc8] sm:$0xff]  ;;  %v54_v4 = vld [vmem:[%s3210_s0 + $0xd8] sm:$0xff] }
  0x3d   :  { %661 = vmatprep.mubr.bf16.mxu1 %v85_v5  ;;  %2195 = vmatpush3.bf16.msra.mxu0 %v2371_v1  ;;  %v1064_v5 = vld [vmem:[%s3211_s3 + $0xd0] sm:$0xff]  ;;  %v114_v7 = vunpack.c.l.s8.bf16 %v54_v4 }
  0x3e   :  { %2196 = vmatprep.subr.bf16.mxu0 %v2372_v6  ;;  %2328 = vmatpush3.bf16.msra.mxu1 %v2371_v1  ;;  %v1062_v1 = vld [vmem:[%s3211_s3 + $0xc0] sm:$0xff] }
  0x3f   :  { %2321 = vmatprep.subr.bf16.mxu1 %v2372_v6  ;;  %1148 = vperm.xlu0 %2331, %v1054_v45  }
  0x40   :  { %1153 = vperm.xlu1 %2332, %v1055_v46   ;;  %v2373_v46 = vld [vmem:[%s3212_s4 + $0x38] sm:$0xff]  }
  0x41   :  { %2197 = vmatpush3.bf16.msra.mxu0 %v2372_v6 }
  0x42   :  { %2329 = vmatpush3.bf16.msra.mxu1 %v2372_v6  ;;  %v112_v6 = vunpack.c.l.s8.bf16 %v52_v3  ;;  %2270 = vmatprep.subr.bf16.mxu0 %v2373_v46 }
  0x43   :  { %517 = vmatmul.mubr.bf16.gmra.mxu0 %v82_v11  ;;  %1158 = vperm.xlu0 %2331, %v1056_v49   ;;  %v58_v11 = vld [vmem:[%s3210_s0 + $0xf8] sm:$0xff]  ;;  %v2376_v49 = vld [vmem:[%s3212_s4 + $0x28] sm:$0xff]  }
  0x44   :  { %662 = vmatmul.mubr.bf16.gmra.mxu1 %v84_v12  ;;  %524 = vmatprep.mubr.bf16.mxu0 %v88_v13  ;;  %v60_v12 = vld [vmem:[%s3210_s0 + $0x108] sm:$0xff]  ;;  %v117_v13 = vunpack.c.h.s8.bf16 %v52_v3  ;;  %v123_v15 = vunpack.c.l.s8.bf16 %v58_v11 }
  0x45   :  { %669 = vmatprep.mubr.bf16.mxu1 %v90_v14  ;;  %1163 = vperm.xlu1 %2332, %v1057_v52   ;;  %v119_v14 = vunpack.c.h.s8.bf16 %v54_v4  ;;  %v125_v16 = vunpack.c.l.s8.bf16 %v60_v12  ;;  %v130_v22 = vunpack.c.h.s8.bf16 %v60_v12  ;;  %v2379_v52 = vld [vmem:[%s3213_s5 + $0x28] sm:$0xff]  }
  0x46   :  { %2226 = vmatprep.subr.bf16.mxu1 %v2375_v48 }
  0x47   :  { %1168 = vperm.xlu0 %2331, %v1058_v55   ;;  %v2382_v55 = vld [vmem:[%s3212_s4 + $0x10] sm:$0xff]  }
  0x49   :  { %1173 = vperm.xlu1 %2332, %v1059_v56   ;;  %v2383_v56 = vld [vmem:[%s3213_s5 + $0x18] sm:$0xff]  }
  0x4b   :  { %525 = vmatmul.mubr.bf16.gmra.mxu0 %v87_v20  ;;  %1178 = vperm.xlu0 %2331, %v1060_v59   ;;  %v124_v20 = vunpack.c.l.s8.bf16 %v59_v18  ;;  %v2386_v59 = vld [vmem:[%s3212_s4] sm:$0xff]  }
  0x4c   :  { %670 = vmatmul.mubr.bf16.gmra.mxu1 %v89_v21  ;;  %532 = vmatprep.mubr.bf16.mxu0 %v93_v23  ;;  %v128_v21 = vunpack.c.h.s8.bf16 %v58_v11  ;;  %v31_v23 = vld [vmem:[%s3210_s0 + $0x20] sm:$0xff] }
  0x4d   :  { %677 = vmatprep.mubr.bf16.mxu1 %v95_v24  ;;  %1183 = vperm.xlu1 %2332, %v1061_v62   ;;  %v51_v24 = vld [vmem:[%s3210_s0 + $0xc0] sm:$0xff]  ;;  %v66_v27 = vunpack.c.l.s8.bf16 %v31_v23  ;;  %v2389_v62 = vld [vmem:[%s3214_s2 + $0x8] sm:$0xff]  }
  0x4e   :  { %v106_v28 = vunpack.c.l.s8.bf16 %v51_v24  ;;  %v111_v32 = vunpack.c.h.s8.bf16 %v51_v24 }
  0x4f   :  { %1188 = vperm.xlu0 %2331, %v1062_v1   ;;  %v2392_v1 = vld [vmem:[%s3214_s2 + $0x18] sm:$0xff]  }
  0x51   :  { %1193 = vperm.xlu1 %2332, %v1063_v2  }
  0x53   :  { %533 = vmatmul.mubr.bf16.gmra.mxu0 %v92_v30  ;;  %1198 = vperm.xlu0 %2331, %v1064_v5   ;;  %v56_v30 = vld [vmem:[%s3210_s0 + $0xe8] sm:$0xff] }
  0x54   :  { %678 = vmatmul.mubr.bf16.gmra.mxu1 %v94_v31  ;;  %540 = vmatprep.mubr.bf16.mxu0 %v98_v33  ;;  %v71_v31 = vunpack.c.h.s8.bf16 %v31_v23  ;;  %v76_v33 = vunpack.c.l.s8.bf16 %v36_v29  ;;  %v121_v38 = vunpack.c.h.s8.bf16 %v56_v30  ;;  %v2395_v29 = vld [vmem:[%s3214_s2 + $0x30] sm:$0xff]  }
  0x55   :  { %685 = vmatprep.mubr.bf16.mxu1 %v100_v34  ;;  %1203 = vperm.xlu1 %2332, %v1065_v8   ;;  %v116_v34 = vunpack.c.l.s8.bf16 %v56_v30 }
  0x5b   :  { %541 = vmatmul.mubr.bf16.gmra.mxu0 %v97_v40  ;;  %v126_v40 = vunpack.c.l.s8.bf16 %v61_v36 }
  0x5c   :  { %686 = vmatmul.mubr.bf16.gmra.mxu1 %v99_v41  ;;  %548 = vmatprep.mubr.bf16.mxu0 %v103_v43  ;;  %v46_v41 = vld [vmem:[%s3210_s0 + $0x98] sm:$0xff]  ;;  %v131_v43 = vunpack.c.h.s8.bf16 %v61_v36 }
  0x5d   :  { %693 = vmatprep.mubr.bf16.mxu1 %v105_v44  ;;  %v96_v44 = vunpack.c.l.s8.bf16 %v46_v41  ;;  %v101_v45 = vunpack.c.h.s8.bf16 %v46_v41 }
  0x63   :  { %549 = vmatmul.mubr.bf16.gmra.mxu0 %v102_v50  ;;  %v2377_v50 = vld [vmem:[%s3213_s5 + $0x30] sm:$0xff]  }
  0x64   :  { %694 = vmatmul.mubr.bf16.gmra.mxu1 %v104_v51  ;;  %556 = vmatprep.mubr.bf16.mxu0 %v108_v53  ;;  %v2378_v51 = vld [vmem:[%s3212_s4 + $0x20] sm:$0xff]   ;;  %v2380_v53 = vld [vmem:[%s3212_s4 + $0x18] sm:$0xff]  }
  0x65   :  { %701 = vmatprep.mubr.bf16.mxu1 %v110_v54  ;;  %v2381_v54 = vld [vmem:[%s3213_s5 + $0x20] sm:$0xff]  }
  0x6b   :  { %557 = vmatmul.mubr.bf16.gmra.mxu0 %v107_v60  ;;  %v2387_v60 = vld [vmem:[%s3213_s5 + $0x8] sm:$0xff]  }
  0x6c   :  { %702 = vmatmul.mubr.bf16.gmra.mxu1 %v109_v61  ;;  %564 = vmatprep.mubr.bf16.mxu0 %v113_v63  ;;  %v2388_v61 = vld [vmem:[%s3214_s2] sm:$0xff]  }
  0x6d   :  { %709 = vmatprep.mubr.bf16.mxu1 %v115_v0  ;;  %v2390_v63 = vld [vmem:[%s3213_s5] sm:$0xff]   ;;  %v2391_v0 = vld [vmem:[%s3214_s2 + $0x10] sm:$0xff]  }
  0x73   :  { %565 = vmatmul.mubr.bf16.gmra.mxu0 %v112_v6 }
  0x74   :  { %710 = vmatmul.mubr.bf16.gmra.mxu1 %v114_v7  ;;  %572 = vmatprep.mubr.bf16.mxu0 %v118_v9 }
  0x75   :  { %717 = vmatprep.mubr.bf16.mxu1 %v120_v10 }
  0x7b   :  { %573 = vmatmul.mubr.bf16.gmra.mxu0 %v117_v13  ;;  %v2393_v13 = vld [vmem:[%s3214_s2 + $0x20] sm:$0xff]  }
  0x7c   :  { %718 = vmatmul.mubr.bf16.gmra.mxu1 %v119_v14  ;;  %580 = vmatprep.mubr.bf16.mxu0 %v123_v15 }
  0x7d   :  { %725 = vmatprep.mubr.bf16.mxu1 %v125_v16  ;;  %v2394_v16 = vld [vmem:[%s3214_s2 + $0x28] sm:$0xff]  }
  0x83   :  { %581 = vmatmul.mubr.bf16.gmra.mxu0 %v122_v19 }
  0x84   :  { %726 = vmatmul.mubr.bf16.gmra.mxu1 %v124_v20  ;;  %588 = vmatprep.mubr.bf16.mxu0 %v128_v21 }
  0x85   :  { %733 = vmatprep.mubr.bf16.mxu1 %v130_v22 }
  0x8b   :  { %589 = vmatmul.mubr.bf16.gmra.mxu0 %v127_v25 }
  0x8c   :  { %734 = vmatmul.mubr.bf16.gmra.mxu1 %v129_v26  ;;  %2198 = vmatprep.mubr.bf16.mxu0 %v66_v27 }
  0x8d   :  { %2214 = vmatprep.mubr.bf16.mxu1 %v106_v28 }
  0x93   :  { %2199 = vmatmul.mubr.bf16.vlgmr.msra.gmra.mxu0 %v71_v31 }
  0x94   :  { %2215 = vmatmul.mubr.bf16.vlgmr.msra.gmra.mxu1 %v111_v32  ;;  %2202 = vmatprep.mubr.bf16.mxu0 %v76_v33  ;;  %v2396_v32 = vld [vmem:[%s3214_s2 + $0x38] sm:$0xff]  }
  0x95   :  { %2218 = vmatprep.mubr.bf16.mxu1 %v116_v34  ;;  %2271 = vmatpush3.bf16.msra.mxu0 %v2373_v46 }
  0x96   :  { %2272 = vmatprep.subr.bf16.mxu0 %v2374_v47  ;;  %2227 = vmatpush3.bf16.msra.mxu1 %v2375_v48  ;;  %v2398_v48 = vld [vmem:[%s3214_s2 + $0x48] sm:$0xff]  }
  0x97   :  { %2228 = vmatprep.subr.bf16.mxu1 %v2377_v50 }
  0x99   :  { %2273 = vmatpush3.bf16.msra.mxu0 %v2374_v47 }
  0x9a   :  { %2274 = vmatprep.subr.bf16.mxu0 %v2376_v49  ;;  %2229 = vmatpush3.bf16.msra.mxu1 %v2377_v50 }
  0x9b   :  { %2203 = vmatmul.mubr.bf16.gmra.mxu0 %v81_v37  ;;  %2230 = vmatprep.subr.bf16.mxu1 %v2379_v52 }
  0x9c   :  { %2219 = vmatmul.mubr.bf16.gmra.mxu1 %v121_v38  ;;  %2206 = vmatprep.mubr.bf16.mxu0 %v86_v39 }
  0x9d   :  { %2222 = vmatprep.mubr.bf16.mxu1 %v126_v40  ;;  %2275 = vmatpush3.bf16.msra.mxu0 %v2376_v49 }
  0x9e   :  { %2276 = vmatprep.subr.bf16.mxu0 %v2378_v51  ;;  %2231 = vmatpush3.bf16.msra.mxu1 %v2379_v52 }
  0x9f   :  { %2232 = vmatprep.subr.bf16.mxu1 %v2381_v54 }
  0xa1   :  { %2277 = vmatpush3.bf16.msra.mxu0 %v2378_v51 }
  0xa2   :  { %2278 = vmatprep.subr.bf16.mxu0 %v2380_v53  ;;  %2233 = vmatpush3.bf16.msra.mxu1 %v2381_v54 }
  0xa3   :  { %2207 = vmatmul.mubr.bf16.gmra.mxu0 %v91_v42  ;;  %2234 = vmatprep.subr.bf16.mxu1 %v2383_v56 }
  0xa4   :  { %2223 = vmatmul.mubr.bf16.gmra.mxu1 %v131_v43  ;;  %2210 = vmatprep.mubr.bf16.mxu0 %v96_v44 }
  0xa5   :  { %2279 = vmatpush3.bf16.msra.mxu0 %v2380_v53 }
  0xa6   :  { %2280 = vmatprep.subr.bf16.mxu0 %v2382_v55  ;;  %2235 = vmatpush3.bf16.msra.mxu1 %v2383_v56 }
  0xa7   :  { %2236 = vmatprep.subr.bf16.mxu1 %v2385_v58 }
  0xa9   :  { %2281 = vmatpush3.bf16.msra.mxu0 %v2382_v55 }
  0xaa   :  { %2282 = vmatprep.subr.bf16.mxu0 %v2384_v57  ;;  %2237 = vmatpush3.bf16.msra.mxu1 %v2385_v58 }
  0xab   :  { %2211 = vmatmul.mubr.bf16.gmra.mxu0 %v101_v45  ;;  %2238 = vmatprep.subr.bf16.mxu1 %v2387_v60  ;;  %v2397_v45 = vld [vmem:[%s3214_s2 + $0x40] sm:$0xff]  }
  0xac   :  { %2286 = vmatprep.mubr.bf16.mxu0 %v2388_v61  ;;  %v2399_v61 = vld [vmem:[%s3214_s2 + $0x50] sm:$0xff]  }
  0xad   :  { %2283 = vmatpush3.bf16.msra.mxu0 %v2384_v57 }
  0xae   :  { %2284 = vmatprep.subr.bf16.mxu0 %v2386_v59  ;;  %2239 = vmatpush3.bf16.msra.mxu1 %v2387_v60 }
  0xaf   :  { %2240 = vmatprep.subr.bf16.mxu1 %v2390_v63 }
  0xb1   :  { %2285 = vmatpush3.bf16.msra.mxu0 %v2386_v59 }
  0xb2   :  { %2241 = vmatpush3.bf16.msra.mxu1 %v2390_v63 }
  0xb4   :  { %2287 = vmatmul.mubr.bf16.vlgmr.msra.gmra.mxu0 %v2389_v62 }
  0xb5   :  { %2290 = vmatprep.mubr.bf16.mxu0 %v2391_v0  ;;  %v2400_v0 = vld [vmem:[%s3214_s2 + $0x58] sm:$0xff]  }
  0xbc   :  { %2291 = vmatmul.mubr.bf16.gmra.mxu0 %v2392_v1 }
  0xbd   :  { %2294 = vmatprep.mubr.bf16.mxu0 %v2393_v13 }
  0xc4   :  { %2295 = vmatmul.mubr.bf16.gmra.mxu0 %v2394_v16 }
  0xc5   :  { %2298 = vmatprep.mubr.bf16.mxu0 %v2395_v29 }
  0xcc   :  { %2299 = vmatmul.mubr.bf16.gmra.mxu0 %v2396_v32 }
  0xcd   :  { %2302 = vmatprep.mubr.bf16.mxu0 %v2397_v45 }
  0xd4   :  { %2303 = vmatmul.mubr.bf16.gmra.mxu0 %v2398_v48 }
  0xd5   :  { %2306 = vmatprep.mubr.bf16.mxu0 %v2399_v61 }
  0xdc   :  { %2307 = vmatmul.mubr.bf16.gmra.mxu0 %v2400_v0 }
  0xe3   :  { %v1932_v2 = vpop.f32.mrf.mxu0 }
  0xe4   :  { %v2032_v3 = vpop.f32.mrf.mxu1 }
  0xe5   :  { %v1933_v4 = vpop.f32.mrf.mxu0 }
  0xe6   :  { %v2033_v5 = vpop.f32.mrf.mxu1  ;;  %v1934_v6 = vadd.f32 %v1933_v4, %v1932_v2 }
  0xe7   :  { %v2034_v7 = vadd.f32 %v2033_v5, %v2032_v3  ;;  %v1935_v8 = vpop.f32.mrf.mxu0 }
  0xe8   :  { %v2035_v9 = vpop.f32.mrf.mxu1 }
  0xe9   :  { %v2813_v10 = vadd.f32 %v2034_v7, %v1934_v6  ;;  %v1936_v11 = vpop.f32.mrf.mxu0 }
  0xea   :  { %v2036_v12 = vpop.f32.mrf.mxu1  ;;  %v1937_v14 = vadd.f32 %v1936_v11, %v1935_v8 }
  0xeb   :  { %v2037_v15 = vadd.f32 %v2036_v12, %v2035_v9  ;;  %v1938_v17 = vpop.f32.mrf.mxu0 }
  0xec   :  { %v2038_v18 = vpop.f32.mrf.mxu1 }
  0xed   :  { %v2821_v19 = vadd.f32 %v2037_v15, %v1937_v14  ;;  %v1939_v20 = vpop.f32.mrf.mxu0  ;;  %v2401_v14 = vld [vmem:[%s3214_s2 + $0x60] sm:$0xff]  }
  0xee   :  { %v2039_v21 = vpop.f32.mrf.mxu1  ;;  %v1940_v22 = vadd.f32 %v1939_v20, %v1938_v17  ;;  %v2402_v17 = vld [vmem:[%s3214_s2 + $0x68] sm:$0xff]   ;;  %2310 = vmatprep.mubr.bf16.mxu0 %v2401_v14 }
  0xef   :  { %v2040_v23 = vadd.f32 %v2039_v21, %v2038_v18  ;;  %v1941_v24 = vpop.f32.mrf.mxu0  ;;  %2311 = vmatmul.mubr.bf16.gmra.mxu0 %v2402_v17 }
  0xf0   :  { %v2041_v25 = vpop.f32.mrf.mxu1 }
  0xf1   :  { %v2823_v26 = vadd.f32 %v2040_v23, %v1940_v22  ;;  %v1942_v27 = vpop.f32.mrf.mxu0 }
  0xf2   :  { %v2042_v28 = vpop.f32.mrf.mxu1  ;;  %v1943_v30 = vadd.f32 %v1942_v27, %v1941_v24 }
  0xf3   :  { %v2043_v31 = vadd.f32 %v2042_v28, %v2041_v25  ;;  %v1944_v33 = vpop.f32.mrf.mxu0 }
  0xf4   :  { %v2044_v34 = vpop.f32.mrf.mxu1 }
  0xf5   :  { %v2831_v35 = vadd.f32 %v2043_v31, %v1943_v30  ;;  %v1945_v36 = vpop.f32.mrf.mxu0 }
  0xf6   :  { %v2045_v37 = vpop.f32.mrf.mxu1  ;;  %v1946_v38 = vadd.f32 %v1945_v36, %v1944_v33 }
  0xf7   :  { %v2046_v39 = vadd.f32 %v2045_v37, %v2044_v34  ;;  %v1947_v40 = vpop.f32.mrf.mxu0 }
  0xf8   :  { %v2047_v41 = vpop.f32.mrf.mxu1 }
  0xf9   :  { %v2833_v42 = vadd.f32 %v2046_v39, %v1946_v38  ;;  %v1948_v43 = vpop.f32.mrf.mxu0 }
  0xfa   :  { %v2048_v44 = vpop.f32.mrf.mxu1  ;;  %v1949_v46 = vadd.f32 %v1948_v43, %v1947_v40 }
  0xfb   :  { %v2049_v47 = vadd.f32 %v2048_v44, %v2047_v41  ;;  %v1950_v49 = vpop.f32.mrf.mxu0 }
  0xfc   :  { %v2050_v50 = vpop.f32.mrf.mxu1 }
  0xfd   :  { %v2841_v51 = vadd.f32 %v2049_v47, %v1949_v46  ;;  %v1951_v52 = vpop.f32.mrf.mxu0 }
  0xfe   :  { %v2051_v53 = vpop.f32.mrf.mxu1  ;;  %v1952_v54 = vadd.f32 %v1951_v52, %v1950_v49 }
  0xff   :  { %v2052_v55 = vadd.f32 %v2051_v53, %v2050_v50  ;;  %v1953_v56 = vpop.f32.mrf.mxu0  ;;  %v2889_v50 = vpop.permute.xlu1 %1078 }
 0x100   :  { %v2053_v57 = vpop.f32.mrf.mxu1 }
 0x101   :  { %v2843_v58 = vadd.f32 %v2052_v55, %v1952_v54  ;;  %v1954_v59 = vpop.f32.mrf.mxu0  ;;  %v2893_v54 = vpop.permute.xlu0 %1068 }
 0x102   :  { %v2054_v60 = vpop.f32.mrf.mxu1  ;;  %v1955_v62 = vadd.f32 %v1954_v59, %v1953_v56 }
 0x103   :  { %v2055_v63 = vadd.f32 %v2054_v60, %v2053_v57  ;;  %v1956_v1 = vpop.f32.mrf.mxu0  ;;  %v2901_v61 = vpop.permute.xlu1 %1083 }
 0x104   :  { %v2056_v2 = vpop.f32.mrf.mxu1 }
 0x105   :  { %v2851_v3 = vadd.f32 %v2055_v63, %v1955_v62  ;;  %v1957_v4 = vpop.f32.mrf.mxu0 }
 0x106   :  { %v2057_v5 = vpop.f32.mrf.mxu1  ;;  %v1958_v6 = vadd.f32 %v1957_v4, %v1956_v1  ;;  %v2907_v1 = vpop.permute.xlu0 %1073 }
 0x107   :  { %v2058_v7 = vadd.f32 %v2057_v5, %v2056_v2  ;;  %v1959_v8 = vpop.f32.mrf.mxu0 }
 0x108   :  { %v2059_v9 = vpop.f32.mrf.mxu1 }
 0x109   :  { %v2853_v11 = vadd.f32 %v2058_v7, %v1958_v6  ;;  %v1960_v12 = vpop.f32.mrf.mxu0 }
 0x10a   :  { %v2060_v13 = vpop.f32.mrf.mxu1  ;;  %v1961_v15 = vadd.f32 %v1960_v12, %v1959_v8  ;;  %v2915_v8 = vpop.permute.xlu1 %1093 }
 0x10b   :  { %3217 = vst [vmem:[#allocation3_spill] sm:$0xff] %v2853_v11  ;;  %v2061_v16 = vadd.f32 %v2060_v13, %v2059_v9  ;;  %v1962_v18 = vpop.f32.mrf.mxu0  ;;  %v2917_v13 = vpop.permute.xlu0 %1088 }
 0x10c   :  { %v2062_v20 = vpop.f32.mrf.mxu1 }
 0x10d   :  { %v2861_v21 = vadd.f32 %v2061_v16, %v1961_v15  ;;  %v1963_v22 = vpop.f32.mrf.mxu0 }
 0x10e   :  { %v2063_v23 = vpop.f32.mrf.mxu1  ;;  %v1964_v24 = vadd.f32 %v1963_v22, %v1962_v18 }
 0x10f   :  { %3218 = vst [vmem:[#allocation4_spill] sm:$0xff] %v2861_v21  ;;  %v2064_v25 = vadd.f32 %v2063_v23, %v2062_v20  ;;  %v1965_v27 = vpop.f32.mrf.mxu0  ;;  %v2919_v20 = vpop.permute.xlu1 %1103 }
 0x110   :  { %v2863_v28 = vpop.f32.mrf.mxu1 }
 0x111   :  { %v2865_v29 = vadd.f32 %v2064_v25, %v1964_v24  ;;  %v1966_v30 = vpop.f32.mrf.mxu0  ;;  %v2921_v24 = vpop.permute.xlu0 %1098 }
 0x112   :  { %v2867_v31 = vpop.f32.mrf.mxu1  ;;  %v2869_v32 = vadd.f32 %v1966_v30, %v1965_v27 }
 0x113   :  { %v1968_v33 = vpop.f32.mrf.mxu0 }
 0x114   :  { %v2871_v34 = vpop.f32.mrf.mxu1 }
 0x115   :  { %3219 = vst [vmem:[#allocation5_spill] sm:$0xff] %v2871_v34  ;;  %v1969_v36 = vpop.f32.mrf.mxu0 }
 0x116   :  { %v2873_v37 = vpop.f32.mrf.mxu1  ;;  %v2875_v38 = vadd.f32 %v1969_v36, %v1968_v33 }
 0x117   :  { %3220 = vst [vmem:[#allocation6_spill] sm:$0xff] %v2873_v37  ;;  %v1971_v39 = vpop.f32.mrf.mxu0 }
 0x118   :  { %3221 = vst [vmem:[#allocation7_spill] sm:$0xff] %v2875_v38  ;;  %v2877_v40 = vpop.f32.mrf.mxu1 }
 0x119   :  { %3222 = vst [vmem:[#allocation8_spill] sm:$0xff] %v2877_v40  ;;  %v1972_v41 = vpop.f32.mrf.mxu0 }
 0x11a   :  { %v2879_v43 = vpop.f32.mrf.mxu1  ;;  %v2881_v44 = vadd.f32 %v1972_v41, %v1971_v39  ;;  %v2927_v39 = vpop.permute.xlu1 %1113 }
 0x11b   :  { %3223 = vst [vmem:[#allocation9_spill] sm:$0xff] %v2879_v43  ;;  %v1974_v45 = vpop.f32.mrf.mxu0  ;;  %3230 = vst [vmem:[#allocation16_spill] sm:$0xff] %v2927_v39 }
 0x11c   :  { %3224 = vst [vmem:[#allocation10_spill] sm:$0xff] %v2881_v44  ;;  %v2883_v46 = vpop.f32.mrf.mxu1 }
 0x11d   :  { %v1975_v47 = vpop.f32.mrf.mxu0 }
 0x11e   :  { %v2885_v48 = vpop.f32.mrf.mxu1  ;;  %v2887_v49 = vadd.f32 %v1975_v47, %v1974_v45 }
 0x11f   :  { %3225 = vst [vmem:[#allocation11_spill] sm:$0xff] %v2885_v48  ;;  %v1977_v52 = vpop.f32.mrf.mxu0 }
 0x120   :  { %3226 = vst [vmem:[#allocation12_spill] sm:$0xff] %v2887_v49  ;;  %v2891_v53 = vpop.f32.mrf.mxu1 }
 0x121   :  { %3227 = vst [vmem:[#allocation13_spill] sm:$0xff] %v2891_v53  ;;  %v1978_v55 = vpop.f32.mrf.mxu0 }
 0x122   :  { %v2895_v56 = vpop.f32.mrf.mxu1  ;;  %v2897_v57 = vadd.f32 %v1978_v55, %v1977_v52  ;;  %v2935_v52 = vpop.permute.xlu0 %1108 }
 0x123   :  { %3228 = vst [vmem:[#allocation14_spill] sm:$0xff] %v2895_v56  ;;  %v1980_v59 = vpop.f32.mrf.mxu0  ;;  %3231 = vst [vmem:[#allocation17_spill] sm:$0xff] %v2935_v52 }
 0x124   :  { %3229 = vst [vmem:[#allocation15_spill] sm:$0xff] %v2897_v57  ;;  %v2899_v60 = vpop.f32.mrf.mxu1 }
 0x125   :  { %v1981_v62 = vpop.f32.mrf.mxu0 }
 0x126   :  { %v2903_v63 = vpop.f32.mrf.mxu1  ;;  %v2905_v0 = vadd.f32 %v1981_v62, %v1980_v59 }
 0x127   :  { %v1983_v2 = vpop.f32.mrf.mxu0 }
 0x128   :  { %v2909_v4 = vpop.f32.mrf.mxu1 }
 0x129   :  { %v1984_v5 = vpop.f32.mrf.mxu0 }
 0x12a   :  { %v2911_v6 = vpop.f32.mrf.mxu1  ;;  %v2913_v7 = vadd.f32 %v1984_v5, %v1983_v2  ;;  %v2941_v5 = vpop.permute.xlu1 %1123 }
 0x12b   :  { %v1986_v9 = vpop.f32.mrf.mxu0  ;;  %3232 = vst [vmem:[#allocation18_spill] sm:$0xff] %v2941_v5 }
 0x12c   :  { %v2086_v12 = vpop.f32.mrf.mxu1 }
 0x12d   :  { %v1987_v14 = vpop.f32.mrf.mxu0 }
 0x12e   :  { %v2087_v15 = vpop.f32.mrf.mxu1  ;;  %v1988_v16 = vadd.f32 %v1987_v14, %v1986_v9  ;;  %v2947_v38 = vpop.permute.xlu1 %1133 }
 0x12f   :  { %v1989_v17 = vpop.f32.mrf.mxu0  ;;  %3234 = vst [vmem:[#allocation20_spill] sm:$0xff] %v2947_v38  ;;  %v2088_v56 = vadd.f32 %v2087_v15, %v2086_v12 }
 0x130   :  { %v2089_v18 = vpop.f32.mrf.mxu1 }
 0x131   :  { %v1990_v22 = vpop.f32.mrf.mxu0  ;;  %v704_v37 = vadd.f32 %v2088_v56, %v1988_v16 }
 0x132   :  { %v2090_v23 = vpop.f32.mrf.mxu1  ;;  %v1991_v25 = vadd.f32 %v1990_v22, %v1989_v17  ;;  %v2943_v17 = vpop.permute.xlu0 %1118 }
 0x133   :  { %v1992_v27 = vpop.f32.mrf.mxu0  ;;  %3233 = vst [vmem:[#allocation19_spill] sm:$0xff] %v2943_v17 }
 0x134   :  { %v2923_v30 = vpop.f32.mrf.mxu1 }
 0x135   :  { %v1993_v33 = vpop.f32.mrf.mxu0 }
 0x136   :  { %v2925_v36 = vpop.f32.mrf.mxu1  ;;  %v2929_v41 = vadd.f32 %v1993_v33, %v1992_v27  ;;  %v2953_v52 = vpop.permute.xlu0 %1128 }
 0x137   :  { %v2931_v45 = vpop.f32.mrf.mxu0  ;;  %3237 = vst [vmem:[#allocation23_spill] sm:$0xff] %v2953_v52 }
 0x138   :  { %v2933_v47 = vpop.f32.mrf.mxu1 }
 0x139   :  { %v2937_v55 = vpop.f32.mrf.mxu0 }
 0x13a   :  { %v2939_v59 = vpop.f32.mrf.mxu1  ;;  %v2969_v38 = vpop.permute.xlu0 %1138 }
 0x13b   :  { %v1998_v62 = vpop.f32.mrf.mxu0  ;;  %3245 = vst [vmem:[#allocation31_spill] sm:$0xff] %v2969_v38  ;;  %v2091_v38 = vadd.f32 %v2090_v23, %v2089_v18 }
 0x13c   :  { %v2098_v2 = vpop.f32.mrf.mxu1 }
 0x13d   :  { %v1999_v9 = vpop.f32.mrf.mxu0  ;;  %v707_v15 = vadd.f32 %v2091_v38, %v1991_v25 }
 0x13e   :  { %v2099_v14 = vpop.f32.mrf.mxu1  ;;  %v2945_v22 = vadd.f32 %v1999_v9, %v1998_v62  ;;  %v2963_v9 = vpop.permute.xlu1 %1143 }
 0x13f   :  { %v2001_v27 = vpop.f32.mrf.mxu0  ;;  %3242 = vst [vmem:[#allocation28_spill] sm:$0xff] %v2963_v9  ;;  %v1149_v9 = vpop.permute.xlu0 %1148 }
 0x140   :  { %v2101_v33 = vpop.f32.mrf.mxu1 }
 0x141   :  { %v2002_v44 = vpop.f32.mrf.mxu0 }
 0x142   :  { %v2102_v57 = vpop.f32.mrf.mxu1  ;;  %v2003_v48 = vadd.f32 %v2002_v44, %v2001_v27 }
 0x143   :  { %v2949_v49 = vpop.f32.mrf.mxu0  ;;  %v1159_v12 = vpop.permute.xlu0 %1158 }
 0x144   :  { %3235 = vst [vmem:[#allocation21_spill] sm:$0xff] %v2949_v49  ;;  %v2951_v39 = vpop.f32.mrf.mxu1 }
 0x145   :  { %3236 = vst [vmem:[#allocation22_spill] sm:$0xff] %v2951_v39  ;;  %v2955_v43 = vpop.f32.mrf.mxu0 }
 0x146   :  { %3238 = vst [vmem:[#allocation24_spill] sm:$0xff] %v2955_v43  ;;  %v2957_v40 = vpop.f32.mrf.mxu1 }
 0x147   :  { %3239 = vst [vmem:[#allocation25_spill] sm:$0xff] %v2957_v40  ;;  %v2959_v21 = vpop.f32.mrf.mxu0  ;;  %v1154_v40 = vpop.permute.xlu1 %1153 }
 0x148   :  { %3240 = vst [vmem:[#allocation26_spill] sm:$0xff] %v2959_v21  ;;  %v2961_v62 = vpop.f32.mrf.mxu1 }
 0x149   :  { %3241 = vst [vmem:[#allocation27_spill] sm:$0xff] %v2961_v62  ;;  %v2965_v5 = vpop.f32.mrf.mxu0 }
 0x14a   :  { %3243 = vst [vmem:[#allocation29_spill] sm:$0xff] %v2965_v5  ;;  %v2967_v17 = vpop.f32.mrf.mxu1 }
 0x14b   :  { %3244 = vst [vmem:[#allocation30_spill] sm:$0xff] %v2967_v17  ;;  %v2971_v49 = vpop.f32.mrf.mxu0  ;;  %v1164_v53 = vpop.permute.xlu1 %1163 }
 0x14c   :  { %3246 = vst [vmem:[#allocation32_spill] sm:$0xff] %v2971_v49  ;;  %v2973_v39 = vpop.f32.mrf.mxu1  ;;  %v2082_v49 = vadd.f32 %v2903_v63, %v2899_v60  ;;  %v2100_v63 = vadd.f32 %v2099_v14, %v2098_v2 }
 0x14d   :  { %3247 = vst [vmem:[#allocation33_spill] sm:$0xff] %v2973_v39  ;;  %v2975_v52 = vpop.f32.mrf.mxu0  ;;  %v2085_v39 = vadd.f32 %v2911_v6, %v2909_v4 }
 0x14e   :  { %3248 = vst [vmem:[#allocation34_spill] sm:$0xff] %v2975_v52  ;;  %v2977_v43 = vpop.f32.mrf.mxu1 }
 0x14f   :  { %3249 = vst [vmem:[#allocation35_spill] sm:$0xff] %v2977_v43  ;;  %v2979_v21 = vpop.f32.mrf.mxu0  ;;  %v699_v60 = vadd.f32 %v2085_v39, %v2913_v7 }
 0x150   :  { %3250 = vst [vmem:[#allocation36_spill] sm:$0xff] %v2979_v21  ;;  %v2981_v62 = vpop.f32.mrf.mxu1 }
 0x151   :  { %3251 = vst [vmem:[#allocation37_spill] sm:$0xff] %v2981_v62  ;;  %v2983_v5 = vpop.f32.mrf.mxu0 }
 0x152   :  { %3252 = vst [vmem:[#allocation38_spill] sm:$0xff] %v2983_v5  ;;  %v2985_v17 = vpop.f32.mrf.mxu1 }
 0x153   :  { %3253 = vst [vmem:[#allocation39_spill] sm:$0xff] %v2985_v17  ;;  %v2200_v52 = vpop.f32.mrf.mxu0  ;;  %v696_v17 = vadd.f32 %v2082_v49, %v2905_v0 }
 0x154   :  { %v2216_v43 = vpop.f32.mrf.mxu1  ;;  %v785_v21 = vadd.f32 %v2200_v52, %v2823_v26  ;;  %v2103_v26 = vadd.f32 %v2102_v57, %v2101_v33  ;;  %v1169_v57 = vpop.permute.xlu0 %1168 }
 0x155   :  { %v776_v62 = vpop.f32.mrf.mxu0  ;;  %v849_v5 = vadd.f32 %v2216_v43, %v704_v37  ;;  %v1174_v37 = vpop.permute.xlu1 %1173 }
 0x156   :  { %v840_v34 = vpop.f32.mrf.mxu1  ;;  %v777_v4 = vadd.f32 %v776_v62, %v2813_v10  ;;  %v1208_v56 = vmul.f32 %v2889_v50, %v785_v21  ;;  %v2094_v10 = vadd.f32 %v2925_v36, %v2923_v30  ;;  %v2097_v21 = vadd.f32 %v2939_v59, %v2933_v47 }
 0x157   :  { %v2201_v18 = vpop.f32.mrf.mxu0  ;;  %v841_v16 = vadd.f32 %v840_v34, %v696_v17  ;;  %v3007_v34 = vmul.f32 %v1159_v12, %v849_v5  ;;  %v720_v30 = vadd.f32 %v2100_v63, %v2945_v22  ;;  %v723_v47 = vadd.f32 %v2103_v26, %v2003_v48 }
 0x158   :  { %v2217_v23 = vpop.f32.mrf.mxu1  ;;  %v788_v6 = vadd.f32 %v2201_v18, %v2831_v35  ;;  %v1997_v35 = vadd.f32 %v2937_v55, %v2931_v45  ;;  %v2067_v48 = vadd.f32 %v2867_v31, %v2863_v28 }
 0x159   :  { %v852_v11 = vadd.f32 %v2217_v23, %v707_v15  ;;  %v779_v52 = vpop.f32.mrf.mxu0  ;;  %v3013_v25 = vmul.f32 %v1149_v9, %v841_v16  ;;  %v1184_v14 = vpop.permute.xlu1 %1183 }
 0x15a   :  { %v843_v38 = vpop.f32.mrf.mxu1  ;;  %v1209_v43 = vmul.f32 %v2901_v61, %v788_v6  ;;  %v780_v0 = vadd.f32 %v779_v52, %v2821_v19  ;;  %v715_v27 = vadd.f32 %v2097_v21, %v1997_v35  ;;  %v3254_v52 = vld [vmem:[#allocation11_spill] sm:$0xff]  ;;  %v3258_v21 = vld [vmem:[#allocation13_spill] sm:$0xff] }
 0x15b   :  { %v2998_v49 = vmul.f32 %v1164_v53, %v852_v11  ;;  %v844_v7 = vadd.f32 %v843_v38, %v699_v60  ;;  %v2204_v44 = vpop.f32.mrf.mxu0  ;;  %v1206_v11 = vmul.f32 %v2893_v54, %v777_v4  ;;  %v712_v54 = vadd.f32 %v2094_v10, %v2929_v41  ;;  %v1179_v41 = vpop.permute.xlu0 %1178 }
 0x15c   :  { %v2220_v50 = vpop.f32.mrf.mxu1  ;;  %v1235_v53 = vpack.c.bf16 %v1209_v43, %v1208_v56  ;;  %v1207_v19 = vmul.f32 %v2907_v1, %v780_v0  ;;  %v801_v59 = vadd.f32 %v2204_v44, %v2843_v58  ;;  %v2076_v38 = vadd.f32 %v3254_v52, %v2883_v46  ;;  %v3256_v0 = vld [vmem:[#allocation5_spill] sm:$0xff] }
 0x15d   :  { %v3011_v61 = vmul.f32 %v1154_v40, %v844_v7  ;;  %v792_v36 = vpop.f32.mrf.mxu0  ;;  %v1243_v45 = vpack.c.bf16 %v2998_v49, %v3007_v34  ;;  %v865_v2 = vadd.f32 %v2220_v50, %v720_v30  ;;  %v3257_v7 = vld [vmem:[#allocation6_spill] sm:$0xff]  ;;  %v3263_v30 = vld [vmem:[#allocation8_spill] sm:$0xff]  ;;  %v3264_v46 = vld [vmem:[#allocation9_spill] sm:$0xff] }
 0x15e   :  { %v856_v39 = vpop.f32.mrf.mxu1  ;;  %v1234_v55 = vpack.c.bf16 %v1207_v19, %v1206_v11  ;;  %v793_v33 = vadd.f32 %v792_v36, %v2833_v42  ;;  %v1212_v23 = vmul.f32 %v2921_v24, %v801_v59  ;;  %v675_v24 = vadd.f32 %v2067_v48, %v2869_v32  ;;  %v3260_v32 = vld [vmem:[#allocation19_spill] sm:$0xff]  ;;  %v3266_v59 = vld [vmem:[#allocation16_spill] sm:$0xff] }
 0x15f   :  { %v2205_v5 = vpop.f32.mrf.mxu0  ;;  %v1242_v40 = vpack.c.bf16 %v3011_v61, %v3013_v25  ;;  %v857_v58 = vadd.f32 %v856_v39, %v712_v54  ;;  %v3031_v60 = vmul.f32 %v1179_v41, %v865_v2  ;;  %v2070_v10 = vadd.f32 %v3257_v7, %v3256_v0  ;;  %v3267_v54 = vld [vmem:[#allocation12_spill] sm:$0xff]  ;;  %v3269_v48 = vld [vmem:[#allocation15_spill] sm:$0xff]  ;;  %v3278_v7 = vld [vmem:[#allocation30_spill] sm:$0xff] }
 0x160   :  { %v2221_v1 = vpop.f32.mrf.mxu1  ;;  %v804_v17 = vadd.f32 %v2205_v5, %v2851_v3  ;;  %2242 = vmatprep.mubr.bf16.mxu1 %v1234_v55  ;;  %v1210_v31 = vmul.f32 %v2917_v13, %v793_v33  ;;  %v3255_v13 = vld [vmem:[#allocation3_spill] sm:$0xff]  ;;  %v2073_v36 = vadd.f32 %v3264_v46, %v3263_v30  ;;  %v688_v5 = vadd.f32 %v2076_v38, %v3267_v54  ;;  %v3283_v30 = vld [vmem:[#allocation36_spill] sm:$0xff]  ;;  %v3284_v46 = vld [vmem:[#allocation38_spill] sm:$0xff] }
 0x161   :  { %v868_v22 = vadd.f32 %v2221_v1, %v723_v47  ;;  %v795_v62 = vpop.f32.mrf.mxu0  ;;  %2243 = vmatmul.mubr.bf16.vlgmr.msra.gmra.mxu1 %v1235_v53  ;;  %v3037_v4 = vmul.f32 %v1169_v57, %v857_v58  ;;  %v3261_v57 = vld [vmem:[#allocation18_spill] sm:$0xff]  ;;  %v3262_v53 = vld [vmem:[#allocation4_spill] sm:$0xff]  ;;  %v3265_v47 = vld [vmem:[#allocation17_spill] sm:$0xff] }
 0x162   :  { %v859_v9 = vpop.f32.mrf.mxu1  ;;  %v1213_v12 = vmul.f32 %v2919_v20, %v804_v17  ;;  %v796_v18 = vadd.f32 %v795_v62, %v2841_v51  ;;  %v3277_v0 = vld [vmem:[#allocation27_spill] sm:$0xff]  ;;  %v3287_v25 = vld [vmem:[#allocation32_spill] sm:$0xff] }
 0x163   :  { %v3027_v15 = vmul.f32 %v1184_v14, %v868_v22  ;;  %v860_v3 = vadd.f32 %v859_v9, %v715_v27  ;;  %v2208_v63 = vpop.f32.mrf.mxu0  ;;  %v3268_v22 = vld [vmem:[#allocation7_spill] sm:$0xff] }
 0x164   :  { %v1211_v28 = vmul.f32 %v2915_v8, %v796_v18  ;;  %v1237_v20 = vpack.c.bf16 %v1213_v12, %v1212_v23  ;;  %v817_v51 = vadd.f32 %v2208_v63, %v2865_v29  ;;  %v3259_v29 = vld [vmem:[#allocation14_spill] sm:$0xff]  ;;  %v680_v27 = vadd.f32 %v2070_v10, %v3268_v22  ;;  %v2224_v23 = vpop.f32.mrf.mxu1  ;;  %v3271_v63 = vld [vmem:[#allocation31_spill] sm:$0xff] }
 0x165   :  { %v3034_v42 = vmul.f32 %v1174_v37, %v860_v3  ;;  %v808_v6 = vpop.f32.mrf.mxu0  ;;  %v1245_v26 = vpack.c.bf16 %v3027_v15, %v3031_v60  ;;  %v2079_v44 = vadd.f32 %v3259_v29, %v3258_v21  ;;  %v3270_v12 = vld [vmem:[#allocation10_spill] sm:$0xff]  ;;  %v2109_v10 = vadd.f32 %v3278_v7, %v3277_v0  ;;  %v3280_v21 = vld [vmem:[#allocation24_spill] sm:$0xff]  ;;  %v3290_v54 = vld [vmem:[#allocation35_spill] sm:$0xff] }
 0x166   :  { %v1236_v16 = vpack.c.bf16 %v1211_v28, %v1210_v31  ;;  %v809_v37 = vadd.f32 %v808_v6, %v3255_v13  ;;  %v1216_v50 = vmul.f32 %v3260_v32, %v817_v51  ;;  %v683_v18 = vadd.f32 %v2073_v36, %v3270_v12  ;;  %v3273_v6 = vld [vmem:[#allocation23_spill] sm:$0xff]  ;;  %v3274_v51 = vld [vmem:[#allocation20_spill] sm:$0xff]  ;;  %v3275_v13 = vld [vmem:[#allocation26_spill] sm:$0xff] }
 0x167   :  { %v2209_v56 = vpop.f32.mrf.mxu0  ;;  %v1244_v8 = vpack.c.bf16 %v3034_v42, %v3037_v4  ;;  %v691_v33 = vadd.f32 %v2079_v44, %v3269_v48  ;;  %v3272_v42 = vld [vmem:[#allocation28_spill] sm:$0xff]  ;;  %v3281_v44 = vld [vmem:[#allocation22_spill] sm:$0xff]  ;;  %v3282_v32 = vld [vmem:[#allocation25_spill] sm:$0xff]  ;;  %v2015_v36 = vadd.f32 %v3284_v46, %v3283_v30 }
 0x168   :  { %v820_v43 = vadd.f32 %v2209_v56, %v675_v24  ;;  %2246 = vmatprep.mubr.bf16.mxu1 %v1236_v16  ;;  %v1214_v55 = vmul.f32 %v3265_v47, %v809_v37  ;;  %v872_v16 = vpop.f32.mrf.mxu1  ;;  %v3276_v37 = vld [vmem:[#allocation29_spill] sm:$0xff]  ;;  %v3286_v47 = vld [vmem:[#allocation39_spill] sm:$0xff] }
 0x169   :  { %v811_v35 = vpop.f32.mrf.mxu0  ;;  %2247 = vmatmul.mubr.bf16.gmra.mxu1 %v1237_v20 }
 0x16a   :  { %v1217_v11 = vmul.f32 %v3261_v57, %v820_v43  ;;  %v812_v19 = vadd.f32 %v811_v35, %v3262_v53  ;;  %v2225_v38 = vpop.f32.mrf.mxu1  ;;  %v2009_v43 = vadd.f32 %v3276_v37, %v3275_v13  ;;  %v3279_v35 = vld [vmem:[#allocation21_spill] sm:$0xff] }
 0x16b   :  { %v2212_v39 = vpop.f32.mrf.mxu0  ;;  %v2006_v29 = vadd.f32 %v3280_v21, %v3279_v35 }
 0x16c   :  { %v1215_v2 = vmul.f32 %v3266_v59, %v812_v19  ;;  %v1239_v1 = vpack.c.bf16 %v1217_v11, %v1216_v50  ;;  %v833_v17 = vadd.f32 %v2212_v39, %v688_v5  ;;  %v2106_v50 = vadd.f32 %v3282_v32, %v3281_v44  ;;  %v875_v57 = vpop.f32.mrf.mxu1  ;;  %v3285_v39 = vld [vmem:[#allocation37_spill] sm:$0xff] }
 0x16d   :  { %v824_v14 = vpop.f32.mrf.mxu0  ;;  %v731_v11 = vadd.f32 %v2109_v10, %v2009_v43 }
 0x16e   :  { %v1238_v58 = vpack.c.bf16 %v1215_v2, %v1214_v55  ;;  %v825_v9 = vadd.f32 %v824_v14, %v680_v27  ;;  %v1220_v28 = vmul.f32 %v3271_v63, %v833_v17  ;;  %v728_v53 = vadd.f32 %v2106_v50, %v2006_v29  ;;  %v3289_v2 = vld [vmem:[#allocation33_spill] sm:$0xff]  ;;  %v1189_v17 = vpop.permute.xlu0 %1188 }
 0x16f   :  { %v2213_v62 = vpop.f32.mrf.mxu0  ;;  %v876_v19 = vadd.f32 %v875_v57, %v731_v11  ;;  %v2115_v55 = vadd.f32 %v3286_v47, %v3285_v39  ;;  %v2112_v5 = vadd.f32 %v3290_v54, %v3289_v2 }
 0x170   :  { %v836_v41 = vadd.f32 %v2213_v62, %v691_v33  ;;  %2250 = vmatprep.mubr.bf16.mxu1 %v1238_v58  ;;  %v1218_v20 = vmul.f32 %v3273_v6, %v825_v9  ;;  %v873_v61 = vadd.f32 %v872_v16, %v728_v53 }
 0x171   :  { %v827_v3 = vpop.f32.mrf.mxu0  ;;  %2251 = vmatmul.mubr.bf16.gmra.mxu1 %v1239_v1  ;;  %v1194_v1 = vpop.permute.xlu1 %1193  ;;  %v739_v22 = vadd.f32 %v2115_v55, %v2015_v36 }
 0x172   :  { %v1221_v31 = vmul.f32 %v3272_v42, %v836_v41  ;;  %v828_v4 = vadd.f32 %v827_v3, %v683_v18  ;;  %v1231_v14 = vmul.f32 %v1194_v1, %v876_v19  ;;  %v1230_v27 = vmul.f32 %v1189_v17, %v873_v61 }
 0x173   :  { %v884_v33 = vadd.f32 %v2225_v38, %v739_v22 }
 0x174   :  { %v1219_v24 = vmul.f32 %v3274_v51, %v828_v4  ;;  %v1241_v56 = vpack.c.bf16 %v1221_v31, %v1220_v28  ;;  %v1246_v58 = vpack.c.bf16 %v1231_v14, %v1230_v27  ;;  %v2288_v41 = vpop.f32.mrf.mxu0  ;;  %v3095_v51 = vld [vmem:[%s3215_s6] ss:$0 sm:$0xff] }
 0x175   :  { %v1204_v49 = vpop.permute.xlu1 %1203 }
 0x176   :  { %v1240_v52 = vpack.c.bf16 %v1219_v24, %v1218_v20  ;;  %v1233_v34 = vmul.f32 %v1204_v49, %v884_v33  ;;  %v1667_v12 = vpop.f32.mrf.mxu0 }
 0x178   :  { %2254 = vmatprep.mubr.bf16.mxu1 %v1240_v52  ;;  %v2289_v18 = vpop.f32.mrf.mxu0 }
 0x179   :  { %2255 = vmatmul.mubr.bf16.gmra.mxu1 %v1241_v56 }
 0x17a   :  { %2258 = vmatprep.mubr.bf16.mxu1 %v1242_v40  ;;  %v3288_v40 = vld [vmem:[#allocation34_spill] sm:$0xff]  ;;  %v1670_v3 = vpop.f32.mrf.mxu0 }
 0x17b   :  { %v2012_v59 = vadd.f32 %v3288_v40, %v3287_v25 }
 0x17c   :  { %v2292_v63 = vpop.f32.mrf.mxu0 }
 0x17d   :  { %v736_v48 = vadd.f32 %v2112_v5, %v2012_v59 }
 0x17e   :  { %v1683_v28 = vpop.f32.mrf.mxu0 }
 0x17f   :  { %v881_v62 = vadd.f32 %v2224_v23, %v736_v48 }
 0x180   :  { %v2293_v42 = vpop.f32.mrf.mxu0 }
 0x181   :  { %2259 = vmatmul.mubr.bf16.gmra.mxu1 %v1243_v45  ;;  %v1199_v45 = vpop.permute.xlu0 %1198 }
 0x182   :  { %2262 = vmatprep.mubr.bf16.mxu1 %v1244_v8  ;;  %v1232_v8 = vmul.f32 %v1199_v45, %v881_v62  ;;  %v1686_v31 = vpop.f32.mrf.mxu0 }
 0x184   :  { %v1247_v9 = vpack.c.bf16 %v1233_v34, %v1232_v8  ;;  %v2296_v23 = vpop.f32.mrf.mxu0 }
 0x186   :  { %v1699_v4 = vpop.f32.mrf.mxu0 }
 0x188   :  { %v2297_v6 = vpop.f32.mrf.mxu0 }
 0x189   :  { %2263 = vmatmul.mubr.bf16.gmra.mxu1 %v1245_v26 }
 0x18a   :  { %2266 = vmatprep.mubr.bf16.mxu1 %v1246_v58  ;;  %v1702_v15 = vpop.f32.mrf.mxu0 }
 0x18c   :  { %v2300_v60 = vpop.f32.mrf.mxu0 }
 0x18e   :  { %v1715_v26 = vpop.f32.mrf.mxu0 }
 0x190   :  { %v2301_v38 = vpop.f32.mrf.mxu0 }
 0x191   :  { %2267 = vmatmul.mubr.bf16.gmra.mxu1 %v1247_v9 }
 0x192   :  { %v1718_v35 = vpop.f32.mrf.mxu0 }
 0x194   :  { %v2304_v50 = vpop.f32.mrf.mxu0 }
 0x196   :  { %v1731_v36 = vpop.f32.mrf.mxu0 }
 0x198   :  { %v2305_v59 = vpop.f32.mrf.mxu0 }
 0x19a   :  { %v1734_v22 = vpop.f32.mrf.mxu0 }
 0x19c   :  { %v2308_v34 = vpop.f32.mrf.mxu0 }
 0x221   :  { %v2244_v20 = vpop.f32.mrf.mxu1 }
 0x222   :  { %v1676_v24 = vadd.f32 %v2288_v41, %v2244_v20 }
 0x223   :  { %v1390_v56 = vpop.f32.mrf.mxu1 }
 0x224   :  { %v1787_v16 = vadd.f32 %v3095_v51, %v1676_v24  ;;  %v1668_v52 = vadd.f32 %v1667_v12, %v1390_v56 }
 0x225   :  { %v2245_v13 = vpop.f32.mrf.mxu1 }
 0x226   :  { %1815 = vst [vmem:[%s3216_s7 + $0x10] sm:$0xff] %v1787_v16  ;;  %v1785_v37 = vadd.f32 %v3095_v51, %v1668_v52  ;;  %v1679_v43 = vadd.f32 %v2289_v18, %v2245_v13 }
 0x227   :  { %v1393_v0 = vpop.f32.mrf.mxu1 }
 0x228   :  { %1813 = vst [vmem:[%s3216_s7] sm:$0xff] %v1785_v37  ;;  %v1788_v7 = vadd.f32 %v3095_v51, %v1679_v43  ;;  %v1671_v10 = vadd.f32 %v1670_v3, %v1393_v0  ;;  %v1747_v3 = vpop.f32.mrf.mxu0 }
 0x229   :  { %v2248_v29 = vpop.f32.mrf.mxu1 }
 0x22a   :  { %1816 = vst [vmem:[%s3216_s7 + $0x18] sm:$0xff] %v1788_v7  ;;  %v1786_v21 = vadd.f32 %v3095_v51, %v1671_v10  ;;  %v1692_v44 = vadd.f32 %v2292_v63, %v2248_v29 }
 0x22b   :  { %v1406_v32 = vpop.f32.mrf.mxu1 }
 0x22c   :  { %1814 = vst [vmem:[%s3216_s7 + $0x8] sm:$0xff] %v1786_v21  ;;  %v1791_v57 = vadd.f32 %v3095_v51, %v1692_v44  ;;  %v1684_v11 = vadd.f32 %v1683_v28, %v1406_v32 }
 0x22d   :  { %v2249_v53 = vpop.f32.mrf.mxu1 }
 0x22e   :  { %1819 = vst [vmem:[%s3216_s7 + $0x30] sm:$0xff] %v1791_v57  ;;  %v1789_v19 = vadd.f32 %v3095_v51, %v1684_v11  ;;  %v1695_v30 = vadd.f32 %v2293_v42, %v2249_v53 }
 0x22f   :  { %v1409_v46 = vpop.f32.mrf.mxu1 }
 0x230   :  { %1817 = vst [vmem:[%s3216_s7 + $0x20] sm:$0xff] %v1789_v19  ;;  %v1792_v39 = vadd.f32 %v3095_v51, %v1695_v30  ;;  %v1687_v47 = vadd.f32 %v1686_v31, %v1409_v46 }
 0x231   :  { %v2252_v55 = vpop.f32.mrf.mxu1 }
 0x232   :  { %1820 = vst [vmem:[%s3216_s7 + $0x38] sm:$0xff] %v1792_v39  ;;  %v1790_v61 = vadd.f32 %v3095_v51, %v1687_v47  ;;  %v1708_v25 = vadd.f32 %v2296_v23, %v2252_v55 }
 0x233   :  { %v1422_v40 = vpop.f32.mrf.mxu1 }
 0x234   :  { %1818 = vst [vmem:[%s3216_s7 + $0x28] sm:$0xff] %v1790_v61  ;;  %v1795_v2 = vadd.f32 %v3095_v51, %v1708_v25  ;;  %v1700_v54 = vadd.f32 %v1699_v4, %v1422_v40 }
 0x235   :  { %v2253_v5 = vpop.f32.mrf.mxu1 }
 0x236   :  { %1823 = vst [vmem:[%s3216_s7 + $0x50] sm:$0xff] %v1795_v2  ;;  %v1793_v1 = vadd.f32 %v3095_v51, %v1700_v54  ;;  %v1711_v14 = vadd.f32 %v2297_v6, %v2253_v5  ;;  %v2309_v6 = vpop.f32.mrf.mxu0 }
 0x237   :  { %v1425_v17 = vpop.f32.mrf.mxu1 }
 0x238   :  { %1821 = vst [vmem:[%s3216_s7 + $0x40] sm:$0xff] %v1793_v1  ;;  %v1796_v27 = vadd.f32 %v3095_v51, %v1711_v14  ;;  %v1703_v48 = vadd.f32 %v1702_v15, %v1425_v17  ;;  %v1750_v16 = vpop.f32.mrf.mxu0 }
 0x239   :  { %v2256_v33 = vpop.f32.mrf.mxu1 }
 0x23a   :  { %1824 = vst [vmem:[%s3216_s7 + $0x58] sm:$0xff] %v1796_v27  ;;  %v1794_v58 = vadd.f32 %v3095_v51, %v1703_v48  ;;  %v1724_v62 = vadd.f32 %v2300_v60, %v2256_v33  ;;  %v2312_v7 = vpop.f32.mrf.mxu0 }
 0x23b   :  { %v1438_v49 = vpop.f32.mrf.mxu1 }
 0x23c   :  { %1822 = vst [vmem:[%s3216_s7 + $0x48] sm:$0xff] %v1794_v58  ;;  %v1799_v45 = vadd.f32 %v3095_v51, %v1724_v62  ;;  %v1716_v8 = vadd.f32 %v1715_v26, %v1438_v49  ;;  %v1763_v32 = vpop.f32.mrf.mxu0 }
 0x23d   :  { %v2257_v9 = vpop.f32.mrf.mxu1 }
 0x23e   :  { %1827 = vst [vmem:[%s3216_s7 + $0x70] sm:$0xff] %v1799_v45  ;;  %v1797_v41 = vadd.f32 %v3095_v51, %v1716_v8  ;;  %v1727_v12 = vadd.f32 %v2301_v38, %v2257_v9  ;;  %v2313_v46 = vpop.f32.mrf.mxu0 }
 0x23f   :  { %v1441_v18 = vpop.f32.mrf.mxu1 }
 0x240   :  { %1825 = vst [vmem:[%s3216_s7 + $0x60] sm:$0xff] %v1797_v41  ;;  %v1800_v63 = vadd.f32 %v3095_v51, %v1727_v12  ;;  %v1719_v28 = vadd.f32 %v1718_v35, %v1441_v18  ;;  %v1766_v40 = vpop.f32.mrf.mxu0 }
 0x241   :  { %v2260_v42 = vpop.f32.mrf.mxu1 }
 0x242   :  { %1828 = vst [vmem:[%s3216_s7 + $0x78] sm:$0xff] %v1800_v63  ;;  %v1798_v31 = vadd.f32 %v3095_v51, %v1719_v28  ;;  %v1740_v23 = vadd.f32 %v2304_v50, %v2260_v42 }
 0x243   :  { %v1454_v4 = vpop.f32.mrf.mxu1 }
 0x244   :  { %1826 = vst [vmem:[%s3216_s7 + $0x68] sm:$0xff] %v1798_v31  ;;  %v1803_v15 = vadd.f32 %v3095_v51, %v1740_v23  ;;  %v1732_v60 = vadd.f32 %v1731_v36, %v1454_v4 }
 0x245   :  { %v2261_v26 = vpop.f32.mrf.mxu1 }
 0x246   :  { %1831 = vst [vmem:[%s3216_s7 + $0x90] sm:$0xff] %v1803_v15  ;;  %v1801_v20 = vadd.f32 %v3095_v51, %v1732_v60  ;;  %v1743_v24 = vadd.f32 %v2305_v59, %v2261_v26 }
 0x247   :  { %v1457_v56 = vpop.f32.mrf.mxu1 }
 0x248   :  { %1829 = vst [vmem:[%s3216_s7 + $0x80] sm:$0xff] %v1801_v20  ;;  %v1804_v52 = vadd.f32 %v3095_v51, %v1743_v24  ;;  %v1735_v38 = vadd.f32 %v1734_v22, %v1457_v56 }
 0x249   :  { %v2264_v13 = vpop.f32.mrf.mxu1 }
 0x24a   :  { %1832 = vst [vmem:[%s3216_s7 + $0x98] sm:$0xff] %v1804_v52  ;;  %v1802_v37 = vadd.f32 %v3095_v51, %v1735_v38  ;;  %v1756_v43 = vadd.f32 %v2308_v34, %v2264_v13 }
 0x24b   :  { %v1470_v0 = vpop.f32.mrf.mxu1 }
 0x24c   :  { %1830 = vst [vmem:[%s3216_s7 + $0x88] sm:$0xff] %v1802_v37  ;;  %v1807_v10 = vadd.f32 %v3095_v51, %v1756_v43  ;;  %v1748_v35 = vadd.f32 %v1747_v3, %v1470_v0 }
 0x24d   :  { %v2265_v21 = vpop.f32.mrf.mxu1 }
 0x24e   :  { %1835 = vst [vmem:[%s3216_s7 + $0xb0] sm:$0xff] %v1807_v10  ;;  %v1805_v29 = vadd.f32 %v3095_v51, %v1748_v35  ;;  %v1759_v44 = vadd.f32 %v2309_v6, %v2265_v21 }
 0x24f   :  { %v1473_v50 = vpop.f32.mrf.mxu1 }
 0x250   :  { %1833 = vst [vmem:[%s3216_s7 + $0xa0] sm:$0xff] %v1805_v29  ;;  %v1808_v57 = vadd.f32 %v3095_v51, %v1759_v44  ;;  %v1751_v11 = vadd.f32 %v1750_v16, %v1473_v50 }
 0x251   :  { %v2268_v53 = vpop.f32.mrf.mxu1 }
 0x252   :  { %1836 = vst [vmem:[%s3216_s7 + $0xb8] sm:$0xff] %v1808_v57  ;;  %v1806_v19 = vadd.f32 %v3095_v51, %v1751_v11  ;;  %v1772_v30 = vadd.f32 %v2312_v7, %v2268_v53 }
 0x253   :  { %v1486_v36 = vpop.f32.mrf.mxu1 }
 0x254   :  { %1834 = vst [vmem:[%s3216_s7 + $0xa8] sm:$0xff] %v1806_v19  ;;  %v1811_v39 = vadd.f32 %v3095_v51, %v1772_v30  ;;  %v1764_v47 = vadd.f32 %v1763_v32, %v1486_v36 }
 0x255   :  { %v2269_v55 = vpop.f32.mrf.mxu1 }
 0x256   :  { %1839 = vst [vmem:[%s3216_s7 + $0xd0] sm:$0xff] %v1811_v39  ;;  %v1809_v61 = vadd.f32 %v3095_v51, %v1764_v47  ;;  %v1775_v25 = vadd.f32 %v2313_v46, %v2269_v55 }
 0x257   :  { %v1489_v59 = vpop.f32.mrf.mxu1 }
 0x258   :  { %1837 = vst [vmem:[%s3216_s7 + $0xc0] sm:$0xff] %v1809_v61  ;;  %v1812_v2 = vadd.f32 %v3095_v51, %v1775_v25  ;;  %v1767_v54 = vadd.f32 %v1766_v40, %v1489_v59 }
 0x25a   :  { %1840 = vst [vmem:[%s3216_s7 + $0xd8] sm:$0xff] %v1812_v2  ;;  %v1810_v5 = vadd.f32 %v3095_v51, %v1767_v54 }
 0x25c   :  { %1838 = vst [vmem:[%s3216_s7 + $0xc8] sm:$0xff] %v1810_v5 }

</bundles_post_ra>
